<compile_context>
chip_gen: v7x
topology: tpu7x:2x2x1
jax: 0.10.0
libtpu: 0.0.40
codegen_flags: <defaults>
</compile_context>

<pallas_src>
import functools

import jax
import jax.numpy as jnp
from jax.experimental import pallas as pl
from jax.experimental.pallas import tpu as pltpu


def _round_up(x, m):
    return (x + m - 1) // m * m


def _pick_batch_block(n, per_image_bytes, budget_bytes=8 << 20):
    """Largest divisor of n whose block fits the VMEM budget, preferring at
    least 2 grid steps so the 'parallel' batch axis can feed both TensorCores
    on megacore parts (v7x)."""
    best = 1
    for nb in range(1, n + 1):
        if n % nb or nb * per_image_bytes > budget_bytes:
            continue
        if n // nb >= 2 or n == 1:
            best = nb
    return best


def _conv_pool_relu_kernel(x_ref, w_ref, o_ref, patch_ref, *, ksize):
    """Fused 3x3 conv (stride 1) + 2x2/2 max-pool + ReLU for one batch block.

    x_ref:     (Nb, Hp, Wp, Cin)     bf16, spatially pre-padded NHWC input
    w_ref:     (KH*KW*Cin, Cp)       bf16 im2col weight, Cp = Cout padded to 128
    o_ref:     (Nb, Ho, Wo, Cp)      f32 output block (lane-dense last dim)
    patch_ref: (Nb*H*W, KH*KW*Cin)   f32 VMEM scratch (im2col patch matrix)
    """
    kh_, kw_ = ksize
    nb, _, _, cin = x_ref.shape
    _, ho, wo, cp = o_ref.shape
    h, w = 2 * ho, 2 * wo
    m = nb * h * w

    # im2col: write the KH*KW shifted taps into contiguous column groups of the
    # patch matrix; column order (kh, kw, ci) matches the weight row order.
    for i in range(kh_):
        for j in range(kw_):
            t = i * kw_ + j
            tap = x_ref[:, i:i + h, j:j + w, :]              # (Nb, H, W, Cin)
            patch_ref[:, t * cin:(t + 1) * cin] = (
                tap.reshape(m, cin).astype(jnp.float32))

    # Single MXU matmul: bf16 x bf16 operands, f32 accumulation.
    conv = jnp.dot(patch_ref[...].astype(jnp.bfloat16), w_ref[...],
                   preferred_element_type=jnp.float32)       # (M, Cp) f32

    # MaxPool2d(2, stride=2, ceil_mode=False) + ReLU, f32 on the VPU;
    # lane dim stays a dense multiple of 128 so the store is unmasked.
    conv = conv.reshape(nb, ho, 2, wo, 2, cp)
    pooled = jnp.max(conv, axis=(2, 4))
    o_ref[...] = jnp.maximum(pooled, 0.0).astype(o_ref.dtype)


def conv_pool_ac(x_nchw, w_oihw):
    """ConvPoolAc forward.  x_nchw: (N, Cin, H, W); w_oihw: (Cout, Cin, 3, 3).
    Returns (N, Cout, H//2, W//2) in float32 (PyTorch NCHW convention)."""
    N, Cin, H, W = x_nchw.shape
    Cout, Cin_w, KH, KW = w_oihw.shape
    assert Cin_w == Cin
    # TODO(synk): only the module's default config (kernel=3, stride=1,
    # padding=1, p_ceil_mode=False, even H/W) is implemented here.
    assert KH == 3 and KW == 3
    assert H % 2 == 0 and W % 2 == 0
    pad = 1
    Ho, Wo = H // 2, W // 2
    Hp, Wp = H + 2 * pad, W + 2 * pad
    Cp = _round_up(Cout, 128)          # lane-dense output channels (zero-padded)
    K = KH * KW * Cin                  # im2col contraction size

    # --- glue (single fused XLA pass): NCHW -> NHWC, halo pad, bf16 cast ------
    x_nhwc = jnp.transpose(x_nchw, (0, 2, 3, 1))
    x_pad = jnp.pad(
        x_nhwc, ((0, 0), (pad, pad), (pad, pad), (0, 0))).astype(jnp.bfloat16)
    # OIHW -> (KH*KW*Cin, Cout) with row order (kh, kw, ci); pad Cout -> Cp.
    w_mat = jnp.transpose(w_oihw, (2, 3, 1, 0)).reshape(K, Cout)
    w_mat = jnp.pad(w_mat, ((0, 0), (0, Cp - Cout))).astype(jnp.bfloat16)

    # --- batch block: fold Nb images into the matmul M dimension --------------
    per_image = (
        2 * Hp * _round_up(Wp, 16) * _round_up(Cin, 128) * 2   # input x2 (bf16)
        + 2 * Ho * _round_up(Wo, 8) * Cp * 4                   # output x2 (f32)
        + H * W * _round_up(K, 128) * 4                        # im2col scratch
        + 2 * H * W * Cp * 4)                                  # matmul/pool temps
    Nb = _pick_batch_block(N, per_image)
    M = Nb * H * W

    kernel = functools.partial(_conv_pool_relu_kernel, ksize=(KH, KW))

    out_nhwc = pl.pallas_call(
        kernel,
        out_shape=jax.ShapeDtypeStruct((N, Ho, Wo, Cp), jnp.float32),
        grid_spec=pltpu.PrefetchScalarGridSpec(
            num_scalar_prefetch=0,
            grid=(N // Nb,),
            in_specs=[
                pl.BlockSpec((Nb, Hp, Wp, Cin), lambda b: (b, 0, 0, 0)),
                pl.BlockSpec((K, Cp), lambda b: (0, 0)),
            ],
            out_specs=pl.BlockSpec((Nb, Ho, Wo, Cp), lambda b: (b, 0, 0, 0)),
            scratch_shapes=[pltpu.VMEM((M, K), jnp.float32)],
        ),
        compiler_params=pltpu.CompilerParams(
            dimension_semantics=("parallel",),
            vmem_limit_bytes=32 * 1024 * 1024),
        cost_estimate=pl.CostEstimate(
            flops=2 * N * H * W * K * Cout,
            transcendentals=0,
            bytes_accessed=(N * Hp * Wp * Cin * 2 + K * Cp * 2
                            + N * Ho * Wo * Cp * 4)),
    )(x_pad, w_mat)

    # Drop the channel padding; back to the PyTorch NCHW convention.
    return jnp.transpose(out_nhwc[..., :Cout], (0, 3, 1, 2)).astype(x_nchw.dtype)


def _reference(x_nchw, w_oihw):
    """Pure-JAX reference matching torch semantics (conv -> maxpool -> relu)."""
    conv = jax.lax.conv_general_dilated(
        x_nchw.astype(jnp.float32), w_oihw.astype(jnp.float32),
        window_strides=(1, 1), padding=((1, 1), (1, 1)),
        dimension_numbers=("NCHW", "OIHW", "NCHW"))
    pooled = jax.lax.reduce_window(
        conv, -jnp.inf, jax.lax.max,
        window_dimensions=(1, 1, 2, 2), window_strides=(1, 1, 2, 2),
        padding="VALID")
    return jnp.maximum(pooled, 0.0)


if __name__ == "__main__":
    key = jax.random.PRNGKey(0)
    kx, kw = jax.random.split(key)

    N, Cin, Cout, H, W = 2, 4, 8, 16, 16
    x = jax.random.normal(kx, (N, Cin, H, W), dtype=jnp.float32)
    # Deterministic kaiming-uniform-ish init for Conv2d weights (bias=False).
    fan_in = Cin * 3 * 3
    bound = (1.0 / fan_in) ** 0.5
    w = jax.random.uniform(kw, (Cout, Cin, 3, 3), dtype=jnp.float32,
                           minval=-bound, maxval=bound)

    out = jax.block_until_ready(conv_pool_ac(x, w))

    # Reference on bf16-quantized inputs: the kernel feeds the MXU bf16
    # operands with f32 accumulation, which is exact for bf16-representable
    # values, so only accumulation-order noise remains.
    xq = x.astype(jnp.bfloat16).astype(jnp.float32)
    wq = w.astype(jnp.bfloat16).astype(jnp.float32)
    ref = _reference(xq, wq)

    assert out.shape == (N, Cout, H // 2, W // 2), out.shape
    assert jnp.allclose(out, ref, atol=1e-4, rtol=1e-3), (
        "max abs err = %f" % float(jnp.max(jnp.abs(out - ref))))

    print("KERNEL_OK")
</pallas_src>

<mosaic_0001>
module attributes {stable_mosaic.version = 11 : i64} {
  func.func @_conv_pool_relu_kernel(%arg0: i32, %arg1: memref<1x18x18x4xbf16, #tpu.memory_space<vmem>>, %arg2: memref<36x128xbf16, #tpu.memory_space<vmem>>, %arg3: memref<1x8x8x128xf32, #tpu.memory_space<vmem>>, %arg4: memref<256x36xf32, #tpu.memory_space<vmem>>) attributes {dimension_semantics = [#tpu.dimension_semantics<parallel>], iteration_bounds = array<i64: 2>, scalar_prefetch = 0 : i64, scratch_operands = 1 : i64, tpu.core_type = #tpu.core_type<tc>, window_params = [{transform_indices = @transform_0, window_bounds = array<i64: 1, 18, 18, 4>}, {pipeline_mode = #tpu.pipeline_mode<synchronous>, transform_indices = @transform_1, window_bounds = array<i64: 36, 128>}, {transform_indices = @transform_2, window_bounds = array<i64: 1, 8, 8, 128>}]} {
    %c0 = arith.constant 0 : index
    %c0_0 = arith.constant 0 : index
    %c0_1 = arith.constant 0 : index
    %c0_2 = arith.constant 0 : index
    %0 = vector.load %arg1[%c0, %c0_0, %c0_1, %c0_2] : memref<1x18x18x4xbf16, #tpu.memory_space<vmem>>, vector<1x16x16x4xbf16>
    %1 = vector.shape_cast %0 : vector<1x16x16x4xbf16> to vector<256x4xbf16>
    %2 = arith.extf %1 : vector<256x4xbf16> to vector<256x4xf32>
    %c0_3 = arith.constant 0 : index
    %c0_4 = arith.constant 0 : index
    %3 = vector.load %arg4[%c0_3, %c0_4] : memref<256x36xf32, #tpu.memory_space<vmem>>, vector<256x4xf32>
    tpu.vector_store %arg4[%c0_3, %c0_4], %2 {strides = array<i32>} : memref<256x36xf32, #tpu.memory_space<vmem>>, vector<256x4xf32>,
    %c0_5 = arith.constant 0 : index
    %c0_6 = arith.constant 0 : index
    %c1 = arith.constant 1 : index
    %c0_7 = arith.constant 0 : index
    %4 = vector.load %arg1[%c0_5, %c0_6, %c1, %c0_7] : memref<1x18x18x4xbf16, #tpu.memory_space<vmem>>, vector<1x16x16x4xbf16>
    %5 = vector.shape_cast %4 : vector<1x16x16x4xbf16> to vector<256x4xbf16>
    %6 = arith.extf %5 : vector<256x4xbf16> to vector<256x4xf32>
    %c0_8 = arith.constant 0 : index
    %c4 = arith.constant 4 : index
    %7 = vector.load %arg4[%c0_8, %c4] : memref<256x36xf32, #tpu.memory_space<vmem>>, vector<256x4xf32>
    tpu.vector_store %arg4[%c0_8, %c4], %6 {strides = array<i32>} : memref<256x36xf32, #tpu.memory_space<vmem>>, vector<256x4xf32>,
    %c0_9 = arith.constant 0 : index
    %c0_10 = arith.constant 0 : index
    %c2 = arith.constant 2 : index
    %c0_11 = arith.constant 0 : index
    %8 = vector.load %arg1[%c0_9, %c0_10, %c2, %c0_11] : memref<1x18x18x4xbf16, #tpu.memory_space<vmem>>, vector<1x16x16x4xbf16>
    %9 = vector.shape_cast %8 : vector<1x16x16x4xbf16> to vector<256x4xbf16>
    %10 = arith.extf %9 : vector<256x4xbf16> to vector<256x4xf32>
    %c0_12 = arith.constant 0 : index
    %c8 = arith.constant 8 : index
    %11 = vector.load %arg4[%c0_12, %c8] : memref<256x36xf32, #tpu.memory_space<vmem>>, vector<256x4xf32>
    tpu.vector_store %arg4[%c0_12, %c8], %10 {strides = array<i32>} : memref<256x36xf32, #tpu.memory_space<vmem>>, vector<256x4xf32>,
    %c0_13 = arith.constant 0 : index
    %c1_14 = arith.constant 1 : index
    %c0_15 = arith.constant 0 : index
    %c0_16 = arith.constant 0 : index
    %12 = vector.load %arg1[%c0_13, %c1_14, %c0_15, %c0_16] : memref<1x18x18x4xbf16, #tpu.memory_space<vmem>>, vector<1x16x16x4xbf16>
    %13 = vector.shape_cast %12 : vector<1x16x16x4xbf16> to vector<256x4xbf16>
    %14 = arith.extf %13 : vector<256x4xbf16> to vector<256x4xf32>
    %c0_17 = arith.constant 0 : index
    %c12 = arith.constant 12 : index
    %15 = vector.load %arg4[%c0_17, %c12] : memref<256x36xf32, #tpu.memory_space<vmem>>, vector<256x4xf32>
    tpu.vector_store %arg4[%c0_17, %c12], %14 {strides = array<i32>} : memref<256x36xf32, #tpu.memory_space<vmem>>, vector<256x4xf32>,
    %c0_18 = arith.constant 0 : index
    %c1_19 = arith.constant 1 : index
    %c1_20 = arith.constant 1 : index
    %c0_21 = arith.constant 0 : index
    %16 = vector.load %arg1[%c0_18, %c1_19, %c1_20, %c0_21] : memref<1x18x18x4xbf16, #tpu.memory_space<vmem>>, vector<1x16x16x4xbf16>
    %17 = vector.shape_cast %16 : vector<1x16x16x4xbf16> to vector<256x4xbf16>
    %18 = arith.extf %17 : vector<256x4xbf16> to vector<256x4xf32>
    %c0_22 = arith.constant 0 : index
    %c16 = arith.constant 16 : index
    %19 = vector.load %arg4[%c0_22, %c16] : memref<256x36xf32, #tpu.memory_space<vmem>>, vector<256x4xf32>
    tpu.vector_store %arg4[%c0_22, %c16], %18 {strides = array<i32>} : memref<256x36xf32, #tpu.memory_space<vmem>>, vector<256x4xf32>,
    %c0_23 = arith.constant 0 : index
    %c1_24 = arith.constant 1 : index
    %c2_25 = arith.constant 2 : index
    %c0_26 = arith.constant 0 : index
    %20 = vector.load %arg1[%c0_23, %c1_24, %c2_25, %c0_26] : memref<1x18x18x4xbf16, #tpu.memory_space<vmem>>, vector<1x16x16x4xbf16>
    %21 = vector.shape_cast %20 : vector<1x16x16x4xbf16> to vector<256x4xbf16>
    %22 = arith.extf %21 : vector<256x4xbf16> to vector<256x4xf32>
    %c0_27 = arith.constant 0 : index
    %c20 = arith.constant 20 : index
    %23 = vector.load %arg4[%c0_27, %c20] : memref<256x36xf32, #tpu.memory_space<vmem>>, vector<256x4xf32>
    tpu.vector_store %arg4[%c0_27, %c20], %22 {strides = array<i32>} : memref<256x36xf32, #tpu.memory_space<vmem>>, vector<256x4xf32>,
    %c0_28 = arith.constant 0 : index
    %c2_29 = arith.constant 2 : index
    %c0_30 = arith.constant 0 : index
    %c0_31 = arith.constant 0 : index
    %24 = vector.load %arg1[%c0_28, %c2_29, %c0_30, %c0_31] : memref<1x18x18x4xbf16, #tpu.memory_space<vmem>>, vector<1x16x16x4xbf16>
    %25 = vector.shape_cast %24 : vector<1x16x16x4xbf16> to vector<256x4xbf16>
    %26 = arith.extf %25 : vector<256x4xbf16> to vector<256x4xf32>
    %c0_32 = arith.constant 0 : index
    %c24 = arith.constant 24 : index
    %27 = vector.load %arg4[%c0_32, %c24] : memref<256x36xf32, #tpu.memory_space<vmem>>, vector<256x4xf32>
    tpu.vector_store %arg4[%c0_32, %c24], %26 {strides = array<i32>} : memref<256x36xf32, #tpu.memory_space<vmem>>, vector<256x4xf32>,
    %c0_33 = arith.constant 0 : index
    %c2_34 = arith.constant 2 : index
    %c1_35 = arith.constant 1 : index
    %c0_36 = arith.constant 0 : index
    %28 = vector.load %arg1[%c0_33, %c2_34, %c1_35, %c0_36] : memref<1x18x18x4xbf16, #tpu.memory_space<vmem>>, vector<1x16x16x4xbf16>
    %29 = vector.shape_cast %28 : vector<1x16x16x4xbf16> to vector<256x4xbf16>
    %30 = arith.extf %29 : vector<256x4xbf16> to vector<256x4xf32>
    %c0_37 = arith.constant 0 : index
    %c28 = arith.constant 28 : index
    %31 = vector.load %arg4[%c0_37, %c28] : memref<256x36xf32, #tpu.memory_space<vmem>>, vector<256x4xf32>
    tpu.vector_store %arg4[%c0_37, %c28], %30 {strides = array<i32>} : memref<256x36xf32, #tpu.memory_space<vmem>>, vector<256x4xf32>,
    %c0_38 = arith.constant 0 : index
    %c2_39 = arith.constant 2 : index
    %c2_40 = arith.constant 2 : index
    %c0_41 = arith.constant 0 : index
    %32 = vector.load %arg1[%c0_38, %c2_39, %c2_40, %c0_41] : memref<1x18x18x4xbf16, #tpu.memory_space<vmem>>, vector<1x16x16x4xbf16>
    %33 = vector.shape_cast %32 : vector<1x16x16x4xbf16> to vector<256x4xbf16>
    %34 = arith.extf %33 : vector<256x4xbf16> to vector<256x4xf32>
    %c0_42 = arith.constant 0 : index
    %c32 = arith.constant 32 : index
    %35 = vector.load %arg4[%c0_42, %c32] : memref<256x36xf32, #tpu.memory_space<vmem>>, vector<256x4xf32>
    tpu.vector_store %arg4[%c0_42, %c32], %34 {strides = array<i32>} : memref<256x36xf32, #tpu.memory_space<vmem>>, vector<256x4xf32>,
    %c0_43 = arith.constant 0 : index
    %c0_44 = arith.constant 0 : index
    %36 = vector.load %arg4[%c0_43, %c0_44] : memref<256x36xf32, #tpu.memory_space<vmem>>, vector<256x36xf32>
    %37 = arith.truncf %36 : vector<256x36xf32> to vector<256x36xbf16>
    %c0_45 = arith.constant 0 : index
    %c0_46 = arith.constant 0 : index
    %38 = vector.load %arg2[%c0_45, %c0_46] : memref<36x128xbf16, #tpu.memory_space<vmem>>, vector<36x128xbf16>
    %cst = arith.constant dense<0.000000e+00> : vector<256x128xf32>
    %39 = tpu.matmul %37, %38, %cst {dimension_numbers = #tpu.dot_dimension_numbers<[1], [0], [0], [1], [0, 0, 1, 1], [], []>} : vector<256x36xbf16>, vector<36x128xbf16>, vector<256x128xf32> -> vector<256x128xf32>
    %40 = vector.shape_cast %39 : vector<256x128xf32> to vector<1x8x2x8x2x128xf32>
    %cst_47 = arith.constant dense<0xFF800000> : vector<1x8x8x128xf32>
    %41 = vector.multi_reduction <maximumf>, %40, %cst_47 [2, 4] : vector<1x8x2x8x2x128xf32> to vector<1x8x8x128xf32>
    %cst_48 = arith.constant 0.000000e+00 : f32
    %42 = vector.broadcast %cst_48 : f32 to vector<1x8x8x128xf32>
    %43 = arith.maximumf %41, %42 : vector<1x8x8x128xf32>
    %c0_49 = arith.constant 0 : index
    %c0_50 = arith.constant 0 : index
    %c0_51 = arith.constant 0 : index
    %c0_52 = arith.constant 0 : index
    %44 = vector.load %arg3[%c0_49, %c0_50, %c0_51, %c0_52] : memref<1x8x8x128xf32, #tpu.memory_space<vmem>>, vector<1x8x8x128xf32>
    tpu.vector_store %arg3[%c0_49, %c0_50, %c0_51, %c0_52], %43 {strides = array<i32>} : memref<1x8x8x128xf32, #tpu.memory_space<vmem>>, vector<1x8x8x128xf32>,
    return
  }
  func.func @transform_0(%arg0: i32) -> (i32, i32, i32, i32) {
    %c0_i32 = arith.constant 0 : i32
    %c0_i32_0 = arith.constant 0 : i32
    %c0_i32_1 = arith.constant 0 : i32
    %c0_i32_2 = arith.constant 0 : i32
    return %arg0, %c0_i32, %c0_i32_0, %c0_i32_1 : i32, i32, i32, i32
  }
  func.func @transform_1(%arg0: i32) -> (i32, i32) {
    %c0_i32 = arith.constant 0 : i32
    %c0_i32_0 = arith.constant 0 : i32
    %c0_i32_1 = arith.constant 0 : i32
    return %c0_i32, %c0_i32_0 : i32, i32
  }
  func.func @transform_2(%arg0: i32) -> (i32, i32, i32, i32) {
    %c0_i32 = arith.constant 0 : i32
    %c0_i32_0 = arith.constant 0 : i32
    %c0_i32_1 = arith.constant 0 : i32
    %c0_i32_2 = arith.constant 0 : i32
    return %arg0, %c0_i32, %c0_i32_0, %c0_i32_1 : i32, i32, i32, i32
  }
}

</mosaic_0001>

<bundles_post_ra>
// kernel: tpu_custom_call.1
= control target key start
LH: loop header
LB: loop body
LE: loop exit
PB: predicated region body
PF: predicated region fallthrough
CT: control target
= control target key end

     0   :  { %7 = vsyncpa [#allocation4], 0  ;;  %s9297_s0 = inlined_call_operand.vmem [shape: bf16[2,18,18,4], index: 0, kind: input, shape index: {}]   ;;  %s9298_s1 = inlined_call_operand.vmem [shape: bf16[36,128], index: 1, kind: input, shape index: {}]   ;;  %s9299_s2 = inlined_call_operand.hbm [shape: f32[2,8,8,128], index: 2, kind: output, shape index: {}]  }
   0x1   :  { %9 = vsyncpa [#allocation4 + $0x1], 0  ;;  %s7115_s9 = smov 0   ;;  %s7117_s10 = smov 0  }
   0x2   :  { %s7119_s11 = smov 0   ;;  %s7121_s12 = smov 0  }
   0x3 LB: > { %s7136_s13 = sadd.s32 4294967295, %s7087_s12   ;;  %s5813_s14 = sadd.s32 4294967294, %s7087_s12   ;;  %s7087_s12 = sphi %s7121_s12, %s9309_s12   ;;  %s7083_s11 = sphi %s7119_s11, %s9308_s11   ;;  %s7079_s10 = sphi %s7117_s10, %s9307_s10   ;;  %s7075_s9 = sphi %s7115_s9, %s9306_s9  }
   0x4   : > { %s7140_s15 = sadd.s32 1, %s7087_s12   ;;  %s69_s16 = sadd.s32 1, %s7083_s11 }
   0x5   : > { %s66_s17 = ssub.s32 %s7087_s12, %s7140_s15  ;;  %p79_p0 = scmp.ne.s32.totalorder %s7083_s11, %s7079_s10 }
   0x6   : > { %p67_p1 = scmp.eq.s32.totalorder %s66_s17, 0  ;;  %p80_p2 = scmp.eq.s32.totalorder %s7136_s13, 1 }
   0x7   : > { %p85_p3 = scmp.ne.s32.totalorder %s7079_s10, %s7075_s9  ;;  %p86_p4 = scmp.eq.s32.totalorder %s5813_s14, 1 }
   0x8   : > { %s7151_s18 = scalar_select %p67_p1, %s7083_s11, %s69_s16  }
   0x9   : > { %p7153_p5 = por %p80_p2, %p79_p0  ;;  %p7157_p6 = por %p86_p4, %p85_p3 }
   0xa   : > { %p5816_p7 = scmp.ge.s32.totalorder %s7087_s12, 1  ;;  %p115_p8 = scmp.lt.s32.totalorder %s7087_s12, 3 }
   0xc   : > { %p116_p9 = pnand %p5816_p7, %p115_p8 }
   0xd   : > { %p137_p10 = scmp.lt.s32.totalorder (!%p116_p9), %s7136_s13, 1  ;;  %vm288_vm0 = vsmask.f32 (!%p116_p9), 3328  ;;  %vm289_vm1 = vsmask.f32 (!%p116_p9), 7440  ;;  %s7089_s26 = smov (!%p116_p9), 4  }
   0xe   : > { %119 = sbr.rel (%p116_p9) target bundleno = 868 (0x364), region = 28  ;;  %vm7180_vm2 = vmor (!%p116_p9), %vm288_vm0, %vm289_vm1  ;;  %vm996_vm3 = vcmask (!%p116_p9), 1042432   ;;  %vm997_vm4 = vcmask (!%p116_p9), 1046532   ;;  %s7090_s27 = smov (!%p116_p9), 8   ;;  %vm207_vm6 = vcmask (!%p116_p9), 31744   ;;  %vm867_vm7 = vcmask (!%p116_p9), 64544  }
   0xf   : > { %vm7298_vm5 = vmor (!%p116_p9), %vm996_vm3, %vm997_vm4  ;;  %s7091_s28 = smov (!%p116_p9), 12   ;;  %s7092_s29 = smov (!%p116_p9), 16   ;;  %vm1303_vm8 = vcmask (!%p116_p9), 97344   ;;  %vm1529_vm9 = vcmask (!%p116_p9), 130144   ;;  %vm2186_vm10 = vcmask (!%p116_p9), 162944   ;;  %vm2619_vm11 = vcmask (!%p116_p9), 195744  }
  0x10   : > { %s7093_s30 = smov (!%p116_p9), 20   ;;  %s7094_s3 = smov (!%p116_p9), 24   ;;  %vm2845_vm12 = vcmask (!%p116_p9), 228544   ;;  %vm3502_vm13 = vcmask (!%p116_p9), 261344   ;;  %vm3935_vm14 = vcmask (!%p116_p9), 294144   ;;  %vm4085_vm15 = vcmask (!%p116_p9), 1041408  }
  0x11   : > { %s7095_s4 = smov (!%p116_p9), 28   ;;  %s7096_s5 = smov (!%p116_p9), 32   ;;  %vm4036_vm0 = vcmask (!%p116_p9), 293888   ;;  %vm5658_vm1 = vcmask (!%p116_p9), 1041409   ;;  %vm5662_vm3 = vcmask (!%p116_p9), 1043459   ;;  %vm5664_vm4 = vcmask (!%p116_p9), 1044484  }
  0x12   : > { %s6147_s24 = sshll.u32 (!%p116_p9), %s7136_s13, 10 }
  0x15   : > { %s138_s21 = scalar_select %p137_p10, %s7136_s13, 1 }
  0x17   : > { %s6332_s22 = smul.u32 216, %s138_s21  ;;  %s134_s21 = sand.u32 1, %s7079_s10  }
  0x18   : > { %s9255_s13 = scalar_lea.sflag [#allocation4], %s134_s21 }
  0x19   : > { %s7168_s25 = scalar_lea.vmem %s9297_s0, %s6332_s22  ;;  %s5817_s22 = sshll.u32 %s134_s21, 6 }
  0x1a   : > { %v246_v0 = vld [vmem:[%s7168_s25 + $0x18] sm:$0xf]  ;;  %v247_v1 = vld [vmem:[%s7168_s25 + $0x1c] sm:$0xf]  ;;  %v248_v2 = vld [vmem:[%s7168_s25 + $0x20] sm:$0x1] }
  0x1b   : > { %v340_v3 = vshrl.u32 %v246_v0, 16  ;;  %v343_v4 = vshll.u32 %v246_v0, 16  ;;  %v349_v5 = vshll.u32 %v247_v1, 16  ;;  %v353_v6 = vshrl.u32 %v247_v1, 16  ;;  %v240_v7 = vld [vmem:[%s7168_s25] sm:$0xf] }
  0x1c   : > { %v359_v8 = vshll.u32 %v248_v2, 16  ;;  %v241_v9 = vld [vmem:[%s7168_s25 + $0x4] sm:$0xf]  ;;  %v242_v10 = vld [vmem:[%s7168_s25 + $0x8] sm:$0x1]  ;;  %v292_v11 = vshrl.u32 %v240_v7, 16 }
  0x1d   : > { %v342_v12 = vrot.slane %v340_v3, 4  ;;  %v345_v13 = vrot.slane %v343_v4, 5  ;;  %v351_v14 = vrot.slane %v349_v5, 5  ;;  %v355_v15 = vrot.slane %v353_v6, 4  ;;  %v249_v16 = vld [vmem:[%s7168_s25 + $0x24] sm:$0xf] }
  0x1e   : > { %v361_v17 = vrot.slane %v359_v8, 5  ;;  %v294_v18 = vrot.slane %v292_v11, 4  ;;  %v295_v19 = vshll.u32 %v240_v7, 16  ;;  %v301_v20 = vshll.u32 %v241_v9, 16  ;;  %v250_v25 = vld [vmem:[%s7168_s25 + $0x28] sm:$0xf] }
  0x1f   : > { %v346_v21 = vor.u32 %v345_v13, %v342_v12  ;;  %v356_v22 = vor.u32 %v355_v15, %v351_v14  ;;  %v305_v23 = vshrl.u32 %v241_v9, 16  ;;  %v311_v24 = vshll.u32 %v242_v10, 16  ;;  %v251_v36 = vld [vmem:[%s7168_s25 + $0x2c] sm:$0x1]  ;;  %v244_v56 = vld [vmem:[%s7168_s25 + $0x10] sm:$0xf] }
  0x20   : > { %v297_v27 = vrot.slane %v295_v19, 5  ;;  %v303_v28 = vrot.slane %v301_v20, 5  ;;  %v364_v29 = vshrl.u32 %v249_v16, 16  ;;  %v367_v30 = vshll.u32 %v249_v16, 16  ;;  %v243_v44 = vld [vmem:[%s7168_s25 + $0xc] sm:$0xf] }
  0x21   : > { %v347_v31 = vrot.slane %v346_v21, 4  ;;  %v357_v32 = vrot.slane %v356_v22, 4  ;;  %v307_v33 = vrot.slane %v305_v23, 4  ;;  %v313_v34 = vrot.slane %v311_v24, 5  ;;  %v245_v62 = vld [vmem:[%s7168_s25 + $0x14] sm:$0x1] }
  0x22   : > { %v298_v35 = vor.u32 %v297_v27, %v294_v18  ;;  %v366_v37 = vrot.slane %v364_v29, 4  ;;  %v369_v38 = vrot.slane %v367_v30, 5  ;;  %v373_v39 = vshll.u32 %v250_v25, 16  ;;  %v255_v63 = vld [vmem:[%s7168_s25 + $0x3c] sm:$0xf]  ;;  %s8924_s23 = scalar_lea.vmem [#allocation3], %s5817_s22 }
  0x23   : > { %v352_v40 = vsel %vm7180_vm2, %v347_v31, %v351_v14  ;;  %v362_v41 = vsel %vm7180_vm2, %v357_v32, %v361_v17  ;;  %v308_v42 = vor.u32 %v307_v33, %v303_v28  ;;  %v377_v43 = vshrl.u32 %v250_v25, 16  ;;  %v256_v8 = vld [vmem:[%s7168_s25 + $0x40] sm:$0xf]  ;;  %v257_v12 = vld [vmem:[%s7168_s25 + $0x44] sm:$0x1] }
  0x24   : > { %v711_v45 = vunpack.c.l.bf16 %v352_v40  ;;  %v712_v46 = vunpack.c.l.bf16 %v362_v41  ;;  %v299_v47 = vrot.slane %v298_v35, 4  ;;  %v370_v48 = vor.u32 %v369_v38, %v366_v37  ;;  %v252_v18 = vld [vmem:[%s7168_s25 + $0x30] sm:$0xf]  ;;  %v253_v31 = vld [vmem:[%s7168_s25 + $0x34] sm:$0xf] }
  0x25   : > { %v309_v49 = vrot.slane %v308_v42, 4  ;;  %v375_v50 = vrot.slane %v373_v39, 5  ;;  %v379_v51 = vrot.slane %v377_v43, 4  ;;  %v383_v52 = vshll.u32 %v251_v36, 16  ;;  %v254_v37 = vld [vmem:[%s7168_s25 + $0x38] sm:$0x1] }
  0x26   : > { %v6392_v53 = vpack.i.bf16 %v712_v46, %v711_v45  ;;  %v304_v54 = vsel %vm7180_vm2, %v299_v47, %v303_v28  ;;  %v371_v55 = vrot.slane %v370_v48, 4  ;;  %v316_v57 = vshrl.u32 %v243_v44, 16  ;;  %v261_v42 = vld [vmem:[%s7168_s25 + $0x54] sm:$0xf] }
  0x27   : > { %v314_v58 = vsel %vm7180_vm2, %v309_v49, %v313_v34  ;;  %v707_v59 = vunpack.c.l.bf16 %v304_v54  ;;  %v380_v60 = vor.u32 %v379_v51, %v375_v50  ;;  %v385_v61 = vrot.slane %v383_v52, 5  ;;  %v262_v54 = vld [vmem:[%s7168_s25 + $0x58] sm:$0xf] }
  0x28   : > { %6393 = vrot.lane.b32.xlu1 %v6392_v53, %s7089_s26  ;;  %v708_v0 = vunpack.c.l.bf16 %v314_v58  ;;  %v376_v1 = vsel %vm7180_vm2, %v371_v55, %v375_v50  ;;  %v318_v2 = vrot.slane %v316_v57, 4  ;;  %v319_v3 = vshll.u32 %v243_v44, 16 }
  0x29   : > { %v381_v4 = vrot.slane %v380_v60, 4  ;;  %v713_v5 = vunpack.c.l.bf16 %v376_v1  ;;  %v325_v6 = vshll.u32 %v244_v56, 16  ;;  %v329_v7 = vshrl.u32 %v244_v56, 16  ;;  %v263_v60 = vld [vmem:[%s7168_s25 + $0x5c] sm:$0x1] }
  0x2a   : > { %v6382_v9 = vpack.i.bf16 %v708_v0, %v707_v59  ;;  %v321_v10 = vrot.slane %v319_v3, 5  ;;  %v335_v11 = vshll.u32 %v245_v62, 16  ;;  %v412_v13 = vshrl.u32 %v255_v63, 16 }
  0x2b   : > { %v386_v14 = vsel %vm7180_vm2, %v381_v4, %v385_v61  ;;  %v327_v15 = vrot.slane %v325_v6, 5  ;;  %v331_v16 = vrot.slane %v329_v7, 4  ;;  %v415_v17 = vshll.u32 %v255_v63, 16  ;;  %v258_v61 = vld [vmem:[%s7168_s25 + $0x48] sm:$0xf] }
  0x2c   : > { %6383 = vrot.lane.b32.xlu0 %v6382_v9, %s7089_s26  ;;  %v714_v19 = vunpack.c.l.bf16 %v386_v14  ;;  %v322_v20 = vor.u32 %v321_v10, %v318_v2  ;;  %v337_v21 = vrot.slane %v335_v11, 5  ;;  %v414_v22 = vrot.slane %v412_v13, 4  ;;  %v259_v9 = vld [vmem:[%s7168_s25 + $0x4c] sm:$0xf] }
  0x2d   : > { %v332_v23 = vor.u32 %v331_v16, %v327_v15  ;;  %v417_v24 = vrot.slane %v415_v17, 5  ;;  %v421_v25 = vshll.u32 %v256_v8, 16  ;;  %v425_v27 = vshrl.u32 %v256_v8, 16 }
  0x2e   : > { %v6397_v28 = vpack.i.bf16 %v714_v19, %v713_v5  ;;  %v323_v29 = vrot.slane %v322_v20, 4  ;;  %v431_v30 = vshll.u32 %v257_v12, 16  ;;  %v388_v32 = vshrl.u32 %v252_v18, 16 }
  0x2f   : > { %v333_v33 = vrot.slane %v332_v23, 4  ;;  %v418_v34 = vor.u32 %v417_v24, %v414_v22  ;;  %v423_v35 = vrot.slane %v421_v25, 5  ;;  %v427_v36 = vrot.slane %v425_v27, 4  ;;  %v267_v24 = vld [vmem:[%s7168_s25 + $0x6c] sm:$0xf] }
  0x30   : > { %6398 = vrot.lane.b32.xlu1 %v6397_v28, %s7089_s26  ;;  %v328_v38 = vsel %vm7180_vm2, %v323_v29, %v327_v15  ;;  %v433_v39 = vrot.slane %v431_v30, 5  ;;  %v390_v40 = vrot.slane %v388_v32, 4  ;;  %v391_v41 = vshll.u32 %v252_v18, 16  ;;  %v260_v15 = vld [vmem:[%s7168_s25 + $0x50] sm:$0x1] }
  0x31   : > { %v338_v43 = vsel %vm7180_vm2, %v333_v33, %v337_v21  ;;  %v709_v44 = vunpack.c.l.bf16 %v328_v38  ;;  %v419_v45 = vrot.slane %v418_v34, 4  ;;  %v428_v46 = vor.u32 %v427_v36, %v423_v35 }
  0x32   : > { %v710_v47 = vunpack.c.l.bf16 %v338_v43  ;;  %v393_v48 = vrot.slane %v391_v41, 5  ;;  %v397_v49 = vshll.u32 %v253_v31, 16  ;;  %v401_v50 = vshrl.u32 %v253_v31, 16 }
  0x33   : > { %v424_v51 = vsel %vm7180_vm2, %v419_v45, %v423_v35  ;;  %v429_v52 = vrot.slane %v428_v46, 4  ;;  %v407_v53 = vshll.u32 %v254_v37, 16  ;;  %v460_v55 = vshrl.u32 %v261_v42, 16  ;;  %v268_v37 = vld [vmem:[%s7168_s25 + $0x70] sm:$0xf] }
  0x34   : > { %v6387_v56 = vpack.i.bf16 %v710_v47, %v709_v44  ;;  %v717_v57 = vunpack.c.l.bf16 %v424_v51  ;;  %v394_v58 = vor.u32 %v393_v48, %v390_v40  ;;  %v399_v59 = vrot.slane %v397_v49, 5  ;;  %v264_v44 = vld [vmem:[%s7168_s25 + $0x60] sm:$0xf] }
  0x35   : > { %v434_v62 = vsel %vm7180_vm2, %v429_v52, %v433_v39  ;;  %v403_v63 = vrot.slane %v401_v50, 4  ;;  %v409_v0 = vrot.slane %v407_v53, 5  ;;  %v462_v1 = vrot.slane %v460_v55, 4 }
  0x36   : > { %6388 = vrot.lane.b32.xlu0 %v6387_v56, %s7089_s26  ;;  %v718_v2 = vunpack.c.l.bf16 %v434_v62  ;;  %v395_v3 = vrot.slane %v394_v58, 4  ;;  %v463_v4 = vshll.u32 %v261_v42, 16  ;;  %v469_v5 = vshll.u32 %v262_v54, 16  ;;  %v269_v42 = vld [vmem:[%s7168_s25 + $0x74] sm:$0x1] }
  0x37   : > { %v404_v6 = vor.u32 %v403_v63, %v399_v59  ;;  %v473_v7 = vshrl.u32 %v262_v54, 16  ;;  %v479_v8 = vshll.u32 %v263_v60, 16  ;;  %v436_v10 = vshrl.u32 %v258_v61, 16  ;;  %v266_v62 = vld [vmem:[%s7168_s25 + $0x68] sm:$0x1] }
  0x38   : > { %v6407_v11 = vpack.i.bf16 %v718_v2, %v717_v57  ;;  %v400_v12 = vsel %vm7180_vm2, %v395_v3, %v399_v59  ;;  %v465_v13 = vrot.slane %v463_v4, 5  ;;  %v471_v14 = vrot.slane %v469_v5, 5  ;;  %v273_v3 = vld [vmem:[%s7168_s25 + $0x84] sm:$0xf] }
  0x39   : > { %v405_v16 = vrot.slane %v404_v6, 4  ;;  %v715_v17 = vunpack.c.l.bf16 %v400_v12  ;;  %v475_v18 = vrot.slane %v473_v7, 4  ;;  %v481_v19 = vrot.slane %v479_v8, 5 }
  0x3a   : > { %6408 = vrot.lane.b32.xlu1 %v6407_v11, %s7089_s26  ;;  %v466_v20 = vor.u32 %v465_v13, %v462_v1  ;;  %v438_v21 = vrot.slane %v436_v10, 4  ;;  %v439_v22 = vshll.u32 %v258_v61, 16  ;;  %v445_v23 = vshll.u32 %v259_v9, 16  ;;  %v265_v61 = vld [vmem:[%s7168_s25 + $0x64] sm:$0xf] }
  0x3b   : > { %v410_v25 = vsel %vm7180_vm2, %v405_v16, %v409_v0  ;;  %v476_v27 = vor.u32 %v475_v18, %v471_v14  ;;  %v449_v28 = vshrl.u32 %v259_v9, 16  ;;  %v455_v29 = vshll.u32 %v260_v15, 16  ;;  %v274_v15 = vld [vmem:[%s7168_s25 + $0x88] sm:$0xf] }
  0x3c   : > { %v716_v30 = vunpack.c.l.bf16 %v410_v25  ;;  %v467_v31 = vrot.slane %v466_v20, 4  ;;  %v441_v32 = vrot.slane %v439_v22, 5  ;;  %v447_v33 = vrot.slane %v445_v23, 5 }
  0x3d   : > { %v477_v34 = vrot.slane %v476_v27, 4  ;;  %v451_v35 = vrot.slane %v449_v28, 4  ;;  %v457_v36 = vrot.slane %v455_v29, 5  ;;  %v508_v38 = vshrl.u32 %v267_v24, 16  ;;  %v270_v27 = vld [vmem:[%s7168_s25 + $0x78] sm:$0xf] }
  0x3e   : > { %v6402_v39 = vpack.i.bf16 %v716_v30, %v715_v17  ;;  %v472_v40 = vsel %vm7180_vm2, %v467_v31, %v471_v14  ;;  %v442_v41 = vor.u32 %v441_v32, %v438_v21  ;;  %v511_v43 = vshll.u32 %v267_v24, 16  ;;  %v275_v21 = vld [vmem:[%s7168_s25 + $0x8c] sm:$0x1] }
  0x3f   : > { %v482_v45 = vsel %vm7180_vm2, %v477_v34, %v481_v19  ;;  %v721_v46 = vunpack.c.l.bf16 %v472_v40  ;;  %v452_v47 = vor.u32 %v451_v35, %v447_v33  ;;  %v510_v48 = vrot.slane %v508_v38, 4 }
  0x40   : > { %6403 = vrot.lane.b32.xlu0 %v6402_v39, %s7089_s26  ;;  %v722_v49 = vunpack.c.l.bf16 %v482_v45  ;;  %v443_v50 = vrot.slane %v442_v41, 4  ;;  %v513_v51 = vrot.slane %v511_v43, 5  ;;  %v517_v52 = vshll.u32 %v268_v37, 16  ;;  %v271_v39 = vld [vmem:[%s7168_s25 + $0x7c] sm:$0xf] }
  0x41   : > { %v453_v53 = vrot.slane %v452_v47, 4  ;;  %v521_v54 = vshrl.u32 %v268_v37, 16  ;;  %v527_v55 = vshll.u32 %v269_v42, 16  ;;  %v484_v56 = vshrl.u32 %v264_v44, 16  ;;  %v272_v45 = vld [vmem:[%s7168_s25 + $0x80] sm:$0x1] }
  0x42   : > { %v6417_v57 = vpack.i.bf16 %v722_v49, %v721_v46  ;;  %v448_v58 = vsel %vm7180_vm2, %v443_v50, %v447_v33  ;;  %v514_v59 = vor.u32 %v513_v51, %v510_v48  ;;  %v519_v60 = vrot.slane %v517_v52, 5  ;;  %v279_v46 = vld [vmem:[%s7168_s25 + $0x9c] sm:$0xf] }
  0x43   : > { %v458_v63 = vsel %vm7180_vm2, %v453_v53, %v457_v36  ;;  %v719_v0 = vunpack.c.l.bf16 %v448_v58  ;;  %v523_v1 = vrot.slane %v521_v54, 4  ;;  %v529_v2 = vrot.slane %v527_v55, 5 }
  0x44   : > { %6418 = vrot.lane.b32.xlu1 %v6417_v57, %s7089_s26  ;;  %v720_v4 = vunpack.c.l.bf16 %v458_v63  ;;  %v515_v5 = vrot.slane %v514_v59, 4  ;;  %v486_v6 = vrot.slane %v484_v56, 4  ;;  %v487_v7 = vshll.u32 %v264_v44, 16  ;;  %v280_v63 = vld [vmem:[%s7168_s25 + $0xa0] sm:$0xf] }
  0x45   : > { %v524_v8 = vor.u32 %v523_v1, %v519_v60  ;;  %v493_v9 = vshll.u32 %v265_v61, 16  ;;  %v497_v10 = vshrl.u32 %v265_v61, 16  ;;  %v503_v11 = vshll.u32 %v266_v62, 16 }
  0x46   : > { %v6412_v12 = vpack.i.bf16 %v720_v4, %v719_v0  ;;  %v520_v13 = vsel %vm7180_vm2, %v515_v5, %v519_v60  ;;  %v489_v14 = vrot.slane %v487_v7, 5  ;;  %v556_v16 = vshrl.u32 %v273_v3, 16  ;;  %v281_v0 = vld [vmem:[%s7168_s25 + $0xa4] sm:$0x1]  ;;  %v276_v5 = vld [vmem:[%s7168_s25 + $0x90] sm:$0xf] }
  0x47   : > { %v525_v17 = vrot.slane %v524_v8, 4  ;;  %v725_v18 = vunpack.c.l.bf16 %v520_v13  ;;  %v495_v19 = vrot.slane %v493_v9, 5  ;;  %v499_v20 = vrot.slane %v497_v10, 4 }
  0x48   : > { %6413 = vrot.lane.b32.xlu0 %v6412_v12, %s7089_s26  ;;  %v490_v22 = vor.u32 %v489_v14, %v486_v6  ;;  %v505_v23 = vrot.slane %v503_v11, 5  ;;  %v558_v24 = vrot.slane %v556_v16, 4  ;;  %v559_v25 = vshll.u32 %v273_v3, 16 }
  0x49   : > { %v530_v28 = vsel %vm7180_vm2, %v525_v17, %v529_v2  ;;  %v500_v29 = vor.u32 %v499_v20, %v495_v19  ;;  %v565_v30 = vshll.u32 %v274_v15, 16  ;;  %v569_v31 = vshrl.u32 %v274_v15, 16  ;;  %v277_v17 = vld [vmem:[%s7168_s25 + $0x94] sm:$0xf] }
  0x4a   : > { %v726_v32 = vunpack.c.l.bf16 %v530_v28  ;;  %v491_v33 = vrot.slane %v490_v22, 4  ;;  %v561_v34 = vrot.slane %v559_v25, 5  ;;  %v575_v35 = vshll.u32 %v275_v21, 16  ;;  %v278_v25 = vld [vmem:[%s7168_s25 + $0x98] sm:$0x1] }
  0x4b   : > { %v501_v36 = vrot.slane %v500_v29, 4  ;;  %v567_v37 = vrot.slane %v565_v30, 5  ;;  %v571_v38 = vrot.slane %v569_v31, 4  ;;  %v532_v40 = vshrl.u32 %v270_v27, 16  ;;  %v285_v29 = vld [vmem:[%s7168_s25 + $0xb4] sm:$0xf] }
  0x4c   : > { %v6427_v41 = vpack.i.bf16 %v726_v32, %v725_v18  ;;  %v496_v42 = vsel %vm7180_vm2, %v491_v33, %v495_v19  ;;  %v562_v43 = vor.u32 %v561_v34, %v558_v24  ;;  %v577_v44 = vrot.slane %v575_v35, 5 }
  0x4d   : > { %v506_v47 = vsel %vm7180_vm2, %v501_v36, %v505_v23  ;;  %v723_v48 = vunpack.c.l.bf16 %v496_v42  ;;  %v572_v49 = vor.u32 %v571_v38, %v567_v37  ;;  %v534_v50 = vrot.slane %v532_v40, 4 }
  0x4e   : > { %6428 = vrot.lane.b32.xlu1 %v6427_v41, %s7089_s26  ;;  %v724_v51 = vunpack.c.l.bf16 %v506_v47  ;;  %v563_v52 = vrot.slane %v562_v43, 4  ;;  %v535_v53 = vshll.u32 %v270_v27, 16  ;;  %v541_v54 = vshll.u32 %v271_v39, 16  ;;  %v286_v41 = vld [vmem:[%s7168_s25 + $0xb8] sm:$0xf] }
  0x4f   : > { %v573_v55 = vrot.slane %v572_v49, 4  ;;  %v545_v56 = vshrl.u32 %v271_v39, 16  ;;  %v551_v57 = vshll.u32 %v272_v45, 16  ;;  %v604_v58 = vshrl.u32 %v279_v46, 16  ;;  %v287_v47 = vld [vmem:[%s7168_s25 + $0xbc] sm:$0x1] }
  0x50   : > { %v6422_v59 = vpack.i.bf16 %v724_v51, %v723_v48  ;;  %v568_v60 = vsel %vm7180_vm2, %v563_v52, %v567_v37  ;;  %v537_v61 = vrot.slane %v535_v53, 5  ;;  %v543_v62 = vrot.slane %v541_v54, 5  ;;  %v282_v48 = vld [vmem:[%s7168_s25 + $0xa8] sm:$0xf] }
  0x51   : > { %v578_v1 = vsel %vm7180_vm2, %v573_v55, %v577_v44  ;;  %v729_v2 = vunpack.c.l.bf16 %v568_v60  ;;  %v547_v3 = vrot.slane %v545_v56, 4  ;;  %v553_v4 = vrot.slane %v551_v57, 5 }
  0x52   : > { %6423 = vrot.lane.b32.xlu0 %v6422_v59, %s7089_s26  ;;  %v730_v6 = vunpack.c.l.bf16 %v578_v1  ;;  %v538_v7 = vor.u32 %v537_v61, %v534_v50  ;;  %v606_v8 = vrot.slane %v604_v58, 4  ;;  %v607_v9 = vshll.u32 %v279_v46, 16  ;;  %v283_v1 = vld [vmem:[%s7168_s25 + $0xac] sm:$0xf] }
  0x53   : > { %v548_v10 = vor.u32 %v547_v3, %v543_v62  ;;  %v613_v11 = vshll.u32 %v280_v63, 16  ;;  %v617_v12 = vshrl.u32 %v280_v63, 16  ;;  %v623_v13 = vshll.u32 %v281_v0, 16 }
  0x54   : > { %v6437_v14 = vpack.i.bf16 %v730_v6, %v729_v2  ;;  %v539_v15 = vrot.slane %v538_v7, 4  ;;  %v609_v16 = vrot.slane %v607_v9, 5  ;;  %v580_v18 = vshrl.u32 %v276_v5, 16  ;;  %v284_v2 = vld [vmem:[%s7168_s25 + $0xb0] sm:$0x1] }
  0x55   : > { %v549_v19 = vrot.slane %v548_v10, 4  ;;  %v615_v20 = vrot.slane %v613_v11, 5  ;;  %v619_v21 = vrot.slane %v617_v12, 4  ;;  %v625_v22 = vrot.slane %v623_v13, 5  ;;  %v903_v7 = vld [vmem:[%s7168_s25 + $0xc] sm:$0xe] }
  0x56   : > { %6438 = vrot.lane.b32.xlu1 %v6437_v14, %s7089_s26  ;;  %v544_v23 = vsel %vm7180_vm2, %v539_v15, %v543_v62  ;;  %v610_v24 = vor.u32 %v609_v16, %v606_v8  ;;  %v582_v27 = vrot.slane %v580_v18, 4  ;;  %v583_v28 = vshll.u32 %v276_v5, 16  ;;  %v904_v16 = vld [vmem:[%s7168_s25 + $0x10] sm:$0xf] }
  0x57   : > { %v554_v30 = vsel %vm7180_vm2, %v549_v19, %v553_v4  ;;  %v727_v31 = vunpack.c.l.bf16 %v544_v23  ;;  %v620_v32 = vor.u32 %v619_v21, %v615_v20  ;;  %v589_v33 = vshll.u32 %v277_v17, 16 }
  0x58   : > { %v728_v34 = vunpack.c.l.bf16 %v554_v30  ;;  %v611_v35 = vrot.slane %v610_v24, 4  ;;  %v585_v36 = vrot.slane %v583_v28, 5  ;;  %v593_v37 = vshrl.u32 %v277_v17, 16 }
  0x59   : > { %v621_v38 = vrot.slane %v620_v32, 4  ;;  %v591_v39 = vrot.slane %v589_v33, 5  ;;  %v599_v40 = vshll.u32 %v278_v25, 16  ;;  %v652_v42 = vshrl.u32 %v285_v29, 16  ;;  %v900_v32 = vld [vmem:[%s7168_s25] sm:$0xe] }
  0x5a   : > { %v6432_v43 = vpack.i.bf16 %v728_v34, %v727_v31  ;;  %v616_v44 = vsel %vm7180_vm2, %v611_v35, %v615_v20  ;;  %v586_v45 = vor.u32 %v585_v36, %v582_v27  ;;  %v595_v46 = vrot.slane %v593_v37, 4  ;;  %v905_v20 = vld [vmem:[%s7168_s25 + $0x14] sm:$0x1]  ;;  %v901_v33 = vld [vmem:[%s7168_s25 + $0x4] sm:$0xf] }
  0x5b   : > { %v626_v49 = vsel %vm7180_vm2, %v621_v38, %v625_v22  ;;  %v733_v50 = vunpack.c.l.bf16 %v616_v44  ;;  %v601_v51 = vrot.slane %v599_v40, 5  ;;  %v654_v52 = vrot.slane %v652_v42, 4  ;;  %v902_v38 = vld [vmem:[%s7168_s25 + $0x8] sm:$0x1] }
  0x5c   : > { %6433 = vrot.lane.b32.xlu0 %v6432_v43, %s7089_s26  ;;  %v734_v53 = vunpack.c.l.bf16 %v626_v49  ;;  %v587_v54 = vrot.slane %v586_v45, 4  ;;  %v596_v55 = vor.u32 %v595_v46, %v591_v39  ;;  %v655_v56 = vshll.u32 %v285_v29, 16  ;;  %v909_v43 = vld [vmem:[%s7168_s25 + $0x24] sm:$0xe] }
  0x5d   : > { %v661_v57 = vshll.u32 %v286_v41, 16  ;;  %v665_v58 = vshrl.u32 %v286_v41, 16  ;;  %v671_v59 = vshll.u32 %v287_v47, 16  ;;  %v628_v60 = vshrl.u32 %v282_v48, 16 }
  0x5e   : > { %v6447_v61 = vpack.i.bf16 %v734_v53, %v733_v50  ;;  %v592_v62 = vsel %vm7180_vm2, %v587_v54, %v591_v39  ;;  %v597_v63 = vrot.slane %v596_v55, 4  ;;  %v657_v0 = vrot.slane %v655_v56, 5  ;;  %v911_v53 = vld [vmem:[%s7168_s25 + $0x2c] sm:$0x1]  ;;  %v906_v54 = vld [vmem:[%s7168_s25 + $0x18] sm:$0xe] }
  0x5f   : > { %v731_v3 = vunpack.c.l.bf16 %v592_v62  ;;  %v663_v4 = vrot.slane %v661_v57, 5  ;;  %v667_v5 = vrot.slane %v665_v58, 4  ;;  %v673_v6 = vrot.slane %v671_v59, 5  ;;  %v907_v59 = vld [vmem:[%s7168_s25 + $0x1c] sm:$0xf] }
  0x60   : > { %6448 = vrot.lane.b32.xlu1 %v6447_v61, %s7089_s26  ;;  %v602_v8 = vsel %vm7180_vm2, %v597_v63, %v601_v51  ;;  %v658_v9 = vor.u32 %v657_v0, %v654_v52  ;;  %v630_v10 = vrot.slane %v628_v60, 4  ;;  %v631_v11 = vshll.u32 %v282_v48, 16  ;;  %v910_v48 = vld [vmem:[%s7168_s25 + $0x28] sm:$0xf]  ;;  %v908_v60 = vld [vmem:[%s7168_s25 + $0x20] sm:$0x1] }
  0x61   : > { %v732_v12 = vunpack.c.l.bf16 %v602_v8  ;;  %v668_v13 = vor.u32 %v667_v5, %v663_v4  ;;  %v637_v14 = vshll.u32 %v283_v1, 16  ;;  %v641_v15 = vshrl.u32 %v283_v1, 16  ;;  %v915_v1 = vld [vmem:[%s7168_s25 + $0x3c] sm:$0xe] }
  0x62   : > { %v659_v17 = vrot.slane %v658_v9, 4  ;;  %v633_v18 = vrot.slane %v631_v11, 5  ;;  %v647_v19 = vshll.u32 %v284_v2, 16  ;;  %v5820_v21 = vrot.slane %v903_v7, 9  ;;  %v917_v11 = vld [vmem:[%s7168_s25 + $0x44] sm:$0x1] }
  0x63   : > { %v6442_v22 = vpack.i.bf16 %v732_v12, %v731_v3  ;;  %v669_v23 = vrot.slane %v668_v13, 4  ;;  %v639_v24 = vrot.slane %v637_v14, 5  ;;  %v643_v25 = vrot.slane %v641_v15, 4 }
  0x64   : > { %v664_v28 = vsel %vm7180_vm2, %v659_v17, %v663_v4  ;;  %v634_v29 = vor.u32 %v633_v18, %v630_v10  ;;  %v649_v30 = vrot.slane %v647_v19, 5  ;;  %v1008_v31 = vrot.slane %v904_v16, 5 }
  0x65   : > { %6443 = vrot.lane.b32.xlu0 %v6442_v22, %s7089_s26  ;;  %v674_v34 = vsel %vm7180_vm2, %v669_v23, %v673_v6  ;;  %v737_v35 = vunpack.c.l.bf16 %v664_v28  ;;  %v644_v36 = vor.u32 %v643_v25, %v639_v24  ;;  %v1011_v37 = vrot.slane %v905_v20, 5  ;;  %v916_v6 = vld [vmem:[%s7168_s25 + $0x40] sm:$0xf]  ;;  %v912_v20 = vld [vmem:[%s7168_s25 + $0x30] sm:$0xe] }
  0x66   : > { %v738_v39 = vunpack.c.l.bf16 %v674_v34  ;;  %v635_v40 = vrot.slane %v634_v29, 4  ;;  %v1009_v41 = vsel %vm7298_vm5, %v5820_v21, %v1008_v31  ;;  %v1010_v42 = vrot.slane %v1008_v31, 4  ;;  %v913_v21 = vld [vmem:[%s7168_s25 + $0x34] sm:$0xf]  ;;  %v914_v28 = vld [vmem:[%s7168_s25 + $0x38] sm:$0x1] }
  0x67   : > { %v645_v44 = vrot.slane %v644_v36, 4  ;;  %v1145_v45 = vunpack.c.l.bf16 %v1009_v41  ;;  %v5819_v46 = vrot.slane %v900_v32, 9  ;;  %v1001_v47 = vrot.slane %v901_v33, 5  ;;  %v921_v29 = vld [vmem:[%s7168_s25 + $0x54] sm:$0xe] }
  0x68   : > { %v6457_v49 = vpack.i.bf16 %v738_v39, %v737_v35  ;;  %v640_v50 = vsel %vm7180_vm2, %v635_v40, %v639_v24  ;;  %v1012_v51 = vsel %vm7298_vm5, %v1010_v42, %v1011_v37  ;;  %v1004_v52 = vrot.slane %v902_v38, 5  ;;  %v922_v34 = vld [vmem:[%s7168_s25 + $0x58] sm:$0xf]  ;;  %v923_v39 = vld [vmem:[%s7168_s25 + $0x5c] sm:$0x1] }
  0x69   : > { %v650_v55 = vsel %vm7180_vm2, %v645_v44, %v649_v30  ;;  %v735_v56 = vunpack.c.l.bf16 %v640_v50  ;;  %v1146_v57 = vunpack.c.l.bf16 %v1012_v51  ;;  %v1002_v58 = vsel %vm7298_vm5, %v5819_v46, %v1001_v47  ;;  %v918_v40 = vld [vmem:[%s7168_s25 + $0x48] sm:$0xe]  ;;  %v920_v46 = vld [vmem:[%s7168_s25 + $0x50] sm:$0x1]  ;;  %v927_v51 = vld [vmem:[%s7168_s25 + $0x6c] sm:$0xe] }
  0x6a   : > { %6458 = vrot.lane.b32.xlu1 %v6457_v49, %s7089_s26  ;;  %v736_v61 = vunpack.c.l.bf16 %v650_v55  ;;  %v1003_v62 = vrot.slane %v1001_v47, 4  ;;  %v1143_v63 = vunpack.c.l.bf16 %v1002_v58  ;;  %v5822_v0 = vrot.slane %v909_v43, 9 }
  0x6b   : > { %v6467_v2 = vpack.i.bf16 %v1146_v57, %v1145_v45  ;;  %v1022_v3 = vrot.slane %v910_v48, 5  ;;  %v1025_v4 = vrot.slane %v911_v53, 5  ;;  %v5821_v5 = vrot.slane %v906_v54, 9  ;;  %v919_v45 = vld [vmem:[%s7168_s25 + $0x4c] sm:$0xf] }
  0x6c   : > { %v6452_v7 = vpack.i.bf16 %v736_v61, %v735_v56  ;;  %v1005_v8 = vsel %vm7298_vm5, %v1003_v62, %v1004_v52  ;;  %v1015_v9 = vrot.slane %v907_v59, 5  ;;  %v1018_v10 = vrot.slane %v908_v60, 5  ;;  %v928_v56 = vld [vmem:[%s7168_s25 + $0x70] sm:$0xf]  ;;  %v929_v61 = vld [vmem:[%s7168_s25 + $0x74] sm:$0x1] }
  0x6d   : > { %v1144_v12 = vunpack.c.l.bf16 %v1005_v8  ;;  %v1023_v13 = vsel %vm7298_vm5, %v5822_v0, %v1022_v3  ;;  %v1024_v14 = vrot.slane %v1022_v3, 4  ;;  %v5824_v15 = vrot.slane %v915_v1, 9 }
  0x6e   : > { %6453 = vrot.lane.b32.xlu0 %v6452_v7, %s7089_s26  ;;  %6468 = vrot.lane.b32.xlu1 %v6467_v2, %s7090_s27  ;;  %v1149_v16 = vunpack.c.l.bf16 %v1023_v13  ;;  %v1016_v17 = vsel %vm7298_vm5, %v5821_v5, %v1015_v9  ;;  %v1017_v18 = vrot.slane %v1015_v9, 4  ;;  %v1036_v19 = vrot.slane %v916_v6, 5  ;;  %v924_v6 = vld [vmem:[%s7168_s25 + $0x60] sm:$0xe]  ;;  %v925_v7 = vld [vmem:[%s7168_s25 + $0x64] sm:$0xf] }
  0x6f   : > { %v6462_v22 = vpack.i.bf16 %v1144_v12, %v1143_v63  ;;  %v1026_v23 = vsel %vm7298_vm5, %v1024_v14, %v1025_v4  ;;  %v1147_v24 = vunpack.c.l.bf16 %v1016_v17  ;;  %v1039_v25 = vrot.slane %v917_v11, 5  ;;  %v926_v12 = vld [vmem:[%s7168_s25 + $0x68] sm:$0x1]  ;;  %v933_v13 = vld [vmem:[%s7168_s25 + $0x84] sm:$0xe] }
  0x70   : > { %v1150_v30 = vunpack.c.l.bf16 %v1026_v23  ;;  %v1019_v31 = vsel %vm7298_vm5, %v1017_v18, %v1018_v10  ;;  %v1037_v32 = vsel %vm7298_vm5, %v5824_v15, %v1036_v19  ;;  %v1038_v33 = vrot.slane %v1036_v19, 4  ;;  %v934_v18 = vld [vmem:[%s7168_s25 + $0x88] sm:$0xf]  ;;  %v935_v23 = vld [vmem:[%s7168_s25 + $0x8c] sm:$0x1] }
  0x71   : > { %v1148_v35 = vunpack.c.l.bf16 %v1019_v31  ;;  %v1153_v36 = vunpack.c.l.bf16 %v1037_v32  ;;  %v5823_v37 = vrot.slane %v912_v20, 9  ;;  %v1029_v38 = vrot.slane %v913_v21, 5  ;;  %v931_v31 = vld [vmem:[%s7168_s25 + $0x7c] sm:$0xf]  ;;  %v932_v32 = vld [vmem:[%s7168_s25 + $0x80] sm:$0x1] }
  0x72   : > { %6463 = vrot.lane.b32.xlu0 %v6462_v22, %s7090_s27  ;;  %v6477_v41 = vpack.i.bf16 %v1150_v30, %v1149_v16  ;;  %v1040_v42 = vsel %vm7298_vm5, %v1038_v33, %v1039_v25  ;;  %v1032_v43 = vrot.slane %v914_v28, 5  ;;  %v5826_v44 = vrot.slane %v921_v29, 9 }
  0x73   : > { %v6472_v47 = vpack.i.bf16 %v1148_v35, %v1147_v24  ;;  %v1154_v48 = vunpack.c.l.bf16 %v1040_v42  ;;  %v1030_v49 = vsel %vm7298_vm5, %v5823_v37, %v1029_v38  ;;  %v1031_v50 = vrot.slane %v1029_v38, 4  ;;  %v930_v24 = vld [vmem:[%s7168_s25 + $0x78] sm:$0xe]  ;;  %v939_v37 = vld [vmem:[%s7168_s25 + $0x9c] sm:$0xe] }
  0x74   : > { %6478 = vrot.lane.b32.xlu1 %v6477_v41, %s7090_s27  ;;  %v1151_v52 = vunpack.c.l.bf16 %v1030_v49  ;;  %v1050_v53 = vrot.slane %v922_v34, 5  ;;  %v1053_v54 = vrot.slane %v923_v39, 5  ;;  %v5825_v55 = vrot.slane %v918_v40, 9  ;;  %v940_v42 = vld [vmem:[%s7168_s25 + $0xa0] sm:$0xf] }
  0x75   : > { %v6487_v57 = vpack.i.bf16 %v1154_v48, %v1153_v36  ;;  %v1033_v58 = vsel %vm7298_vm5, %v1031_v50, %v1032_v43  ;;  %v1043_v59 = vrot.slane %v919_v45, 5  ;;  %v1046_v60 = vrot.slane %v920_v46, 5 }
  0x76   : > { %6473 = vrot.lane.b32.xlu0 %v6472_v47, %s7090_s27  ;;  %v1152_v62 = vunpack.c.l.bf16 %v1033_v58  ;;  %v1051_v63 = vsel %vm7298_vm5, %v5826_v44, %v1050_v53  ;;  %v1052_v0 = vrot.slane %v1050_v53, 4  ;;  %v5828_v1 = vrot.slane %v927_v51, 9  ;;  %v941_v47 = vld [vmem:[%s7168_s25 + $0xa4] sm:$0x1] }
  0x77   : > { %v1157_v2 = vunpack.c.l.bf16 %v1051_v63  ;;  %v1044_v3 = vsel %vm7298_vm5, %v5825_v55, %v1043_v59  ;;  %v1045_v4 = vrot.slane %v1043_v59, 4  ;;  %v1064_v5 = vrot.slane %v928_v56, 5  ;;  %v936_v56 = vld [vmem:[%s7168_s25 + $0x90] sm:$0xe]  ;;  %v945_v63 = vld [vmem:[%s7168_s25 + $0xb4] sm:$0xe] }
  0x78   : > { %6488 = vrot.lane.b32.xlu1 %v6487_v57, %s7090_s27  ;;  %v6482_v8 = vpack.i.bf16 %v1152_v62, %v1151_v52  ;;  %v1054_v9 = vsel %vm7298_vm5, %v1052_v0, %v1053_v54  ;;  %v1155_v10 = vunpack.c.l.bf16 %v1044_v3  ;;  %v1067_v11 = vrot.slane %v929_v61, 5  ;;  %v937_v57 = vld [vmem:[%s7168_s25 + $0x94] sm:$0xf]  ;;  %v938_v62 = vld [vmem:[%s7168_s25 + $0x98] sm:$0x1] }
  0x79   : > { %v1158_v14 = vunpack.c.l.bf16 %v1054_v9  ;;  %v1047_v15 = vsel %vm7298_vm5, %v1045_v4, %v1046_v60  ;;  %v1065_v16 = vsel %vm7298_vm5, %v5828_v1, %v1064_v5  ;;  %v1066_v17 = vrot.slane %v1064_v5, 4  ;;  %v946_v4 = vld [vmem:[%s7168_s25 + $0xb8] sm:$0xf]  ;;  %v947_v9 = vld [vmem:[%s7168_s25 + $0xbc] sm:$0x1] }
  0x7a   : > { %6483 = vrot.lane.b32.xlu0 %v6482_v8, %s7090_s27  ;;  %v1156_v19 = vunpack.c.l.bf16 %v1047_v15  ;;  %v1161_v20 = vunpack.c.l.bf16 %v1065_v16  ;;  %v5827_v21 = vrot.slane %v924_v6, 9  ;;  %v1057_v22 = vrot.slane %v925_v7, 5  ;;  %v943_v15 = vld [vmem:[%s7168_s25 + $0xac] sm:$0xf]  ;;  %v944_v16 = vld [vmem:[%s7168_s25 + $0xb0] sm:$0x1] }
  0x7b   : > { %v6497_v25 = vpack.i.bf16 %v1158_v14, %v1157_v2  ;;  %v1068_v28 = vsel %vm7298_vm5, %v1066_v17, %v1067_v11  ;;  %v1060_v29 = vrot.slane %v926_v12, 5  ;;  %v5830_v30 = vrot.slane %v933_v13, 9 }
  0x7c   : > { %v6492_v33 = vpack.i.bf16 %v1156_v19, %v1155_v10  ;;  %v1162_v34 = vunpack.c.l.bf16 %v1068_v28  ;;  %v1058_v35 = vsel %vm7298_vm5, %v5827_v21, %v1057_v22  ;;  %v1059_v36 = vrot.slane %v1057_v22, 4  ;;  %v942_v10 = vld [vmem:[%s7168_s25 + $0xa8] sm:$0xe]  ;;  %v7423_v21 = vld [vmem:[%s7168_s25 + $0x18] sm:$0xff]  }
  0x7d   : > { %6498 = vrot.lane.b32.xlu1 %v6497_v25, %s7090_s27  ;;  %v1159_v38 = vunpack.c.l.bf16 %v1058_v35  ;;  %v1078_v39 = vrot.slane %v934_v18, 5  ;;  %v1081_v40 = vrot.slane %v935_v23, 5  ;;  %v5829_v41 = vrot.slane %v930_v24, 9 }
  0x7e   : > { %6493 = vrot.lane.b32.xlu0 %v6492_v33, %s7090_s27  ;;  %v6507_v43 = vpack.i.bf16 %v1162_v34, %v1161_v20  ;;  %v1061_v44 = vsel %vm7298_vm5, %v1059_v36, %v1060_v29  ;;  %v1071_v45 = vrot.slane %v931_v31, 5  ;;  %v1074_v46 = vrot.slane %v932_v32, 5  ;;  %v5835_v32 = vld [vmem:[%s7168_s25 + $0xc] sm:$0xff]  }
  0x7f   : > { %v1160_v48 = vunpack.c.l.bf16 %v1061_v44  ;;  %v1079_v49 = vsel %vm7298_vm5, %v5830_v30, %v1078_v39  ;;  %v1080_v50 = vrot.slane %v1078_v39, 4  ;;  %v5832_v51 = vrot.slane %v939_v37, 9 }
  0x80   : > { %v1165_v52 = vunpack.c.l.bf16 %v1079_v49  ;;  %v1072_v53 = vsel %vm7298_vm5, %v5829_v41, %v1071_v45  ;;  %v1073_v54 = vrot.slane %v1071_v45, 4  ;;  %v1092_v55 = vrot.slane %v940_v42, 5  ;;  %v7437_v41 = vld [vmem:[%s7168_s25 + $0x30] sm:$0xff]   ;;  %v5839_v42 = vld [vmem:[%s7168_s25 + $0x24] sm:$0xff]  }
  0x81   : > { %6508 = vrot.lane.b32.xlu1 %v6507_v43, %s7090_s27  ;;  %v6502_v58 = vpack.i.bf16 %v1160_v48, %v1159_v38  ;;  %v1082_v59 = vsel %vm7298_vm5, %v1080_v50, %v1081_v40  ;;  %v1163_v60 = vunpack.c.l.bf16 %v1072_v53  ;;  %v1095_v61 = vrot.slane %v941_v47, 5  ;;  %v7444_v47 = vld [vmem:[%s7168_s25 + $0x48] sm:$0xff]  }
  0x82   : > { %v1166_v0 = vunpack.c.l.bf16 %v1082_v59  ;;  %v1075_v1 = vsel %vm7298_vm5, %v1073_v54, %v1074_v46  ;;  %v1093_v2 = vsel %vm7298_vm5, %v5832_v51, %v1092_v55  ;;  %v1094_v3 = vrot.slane %v1092_v55, 4 }
  0x83   : > { %6503 = vrot.lane.b32.xlu0 %v6502_v58, %s7090_s27  ;;  %v1164_v5 = vunpack.c.l.bf16 %v1075_v1  ;;  %v1169_v6 = vunpack.c.l.bf16 %v1093_v2  ;;  %v5831_v7 = vrot.slane %v936_v56, 9  ;;  %v1085_v8 = vrot.slane %v937_v57, 5  ;;  %v7459_v57 = vld [vmem:[%s7168_s25 + $0x60] sm:$0xff]  }
  0x84   : > { %v6517_v11 = vpack.i.bf16 %v1166_v0, %v1165_v52  ;;  %v1096_v12 = vsel %vm7298_vm5, %v1094_v3, %v1095_v61  ;;  %v1088_v13 = vrot.slane %v938_v62, 5  ;;  %v5834_v14 = vrot.slane %v945_v63, 9  ;;  %v5843_v52 = vld [vmem:[%s7168_s25 + $0x3c] sm:$0xff]   ;;  %v5847_v62 = vld [vmem:[%s7168_s25 + $0x54] sm:$0xff]  }
  0x85   : > { %v6512_v17 = vpack.i.bf16 %v1164_v5, %v1163_v60  ;;  %v1170_v18 = vunpack.c.l.bf16 %v1096_v12  ;;  %v1086_v19 = vsel %vm7298_vm5, %v5831_v7, %v1085_v8  ;;  %v1087_v20 = vrot.slane %v1085_v8, 4  ;;  %v6255_v63 = vld [vmem:[%s7168_s25 + $0x78] sm:$0xff]  }
  0x86   : > { %6518 = vrot.lane.b32.xlu1 %v6517_v11, %s7090_s27  ;;  %v1167_v22 = vunpack.c.l.bf16 %v1086_v19  ;;  %v1106_v23 = vrot.slane %v946_v4, 5  ;;  %v1109_v24 = vrot.slane %v947_v9, 5  ;;  %v5833_v25 = vrot.slane %v942_v10, 9  ;;  %v5851_v4 = vld [vmem:[%s7168_s25 + $0x6c] sm:$0xff]  }
  0x87   : > { %6513 = vrot.lane.b32.xlu0 %v6512_v17, %s7090_s27  ;;  %v6527_v28 = vpack.i.bf16 %v1170_v18, %v1169_v6  ;;  %v1089_v29 = vsel %vm7298_vm5, %v1087_v20, %v1088_v13  ;;  %v1099_v30 = vrot.slane %v943_v15, 5  ;;  %v1102_v31 = vrot.slane %v944_v16, 5  ;;  %v6256_v9 = vld [vmem:[%s7168_s25 + $0x90] sm:$0xff]   ;;  %v5891_v15 = vld [vmem:[%s7168_s25 + $0x6c] sm:$0xf] }
  0x88   : > { %v1168_v33 = vunpack.c.l.bf16 %v1089_v29  ;;  %v1107_v34 = vsel %vm7298_vm5, %v5834_v14, %v1106_v23  ;;  %v1108_v35 = vrot.slane %v1106_v23, 4  ;;  %v6182_v36 = vunpack.c.l.bf16 %v7423_v21  ;;  %v5855_v14 = vld [vmem:[%s7168_s25 + $0x84] sm:$0xff]   ;;  %v5892_v20 = vld [vmem:[%s7168_s25 + $0x70] sm:$0xf] }
  0x89   : > { %v1173_v37 = vunpack.c.l.bf16 %v1107_v34  ;;  %v1100_v38 = vsel %vm7298_vm5, %v5833_v25, %v1099_v30  ;;  %v1101_v39 = vrot.slane %v1099_v30, 4  ;;  %v6183_v40 = vunpack.c.h.bf16 %v7423_v21 }
  0x8a   : > { %6528 = vrot.lane.b32.xlu1 %v6527_v28, %s7090_s27  ;;  %v6522_v43 = vpack.i.bf16 %v1168_v33, %v1167_v22  ;;  %v1110_v44 = vsel %vm7298_vm5, %v1108_v35, %v1109_v24  ;;  %v1171_v45 = vunpack.c.l.bf16 %v1100_v38  ;;  %v1369_v46 = vunpack.c.l.bf16 %v5835_v32  ;;  %v5893_v28 = vld [vmem:[%s7168_s25 + $0x74] sm:$0x1]  ;;  %v5867_v33 = vld [vmem:[%s7168_s25 + $0xc] sm:$0xf]  ;;  %212 = vst.msk [vmem:[#allocation2 + $0x20] sm:$0xff] %vm207_vm6, %v6182_v36 }
  0x8b   : > { %v1174_v48 = vunpack.c.l.bf16 %v1110_v44  ;;  %v1103_v49 = vsel %vm7298_vm5, %v1101_v39, %v1102_v31  ;;  %v7452_v50 = vpack.i.bf16 %v6183_v40, %v6182_v36  ;;  %v1370_v51 = vunpack.c.h.bf16 %v5835_v32  ;;  %v5868_v39 = vld [vmem:[%s7168_s25 + $0x10] sm:$0xf]  ;;  %213 = vst.msk [vmem:[#allocation2 + $0x28] sm:$0xff] %vm207_vm6, %v6183_v40 }
  0x8c   : > { %6523 = vrot.lane.b32.xlu0 %v6522_v43, %s7090_s27  ;;  %v1172_v53 = vunpack.c.l.bf16 %v1103_v49  ;;  %v6186_v54 = vunpack.c.l.bf16 %v7437_v41  ;;  %v6187_v55 = vunpack.c.h.bf16 %v7437_v41  ;;  %v1373_v56 = vunpack.c.l.bf16 %v5839_v42 }
  0x8d   : > { %v6537_v58 = vpack.i.bf16 %v1174_v48, %v1173_v37  ;;  %v6542_v59 = vpack.i.bf16 %v1370_v51, %v1369_v46  ;;  %v1374_v60 = vunpack.c.h.bf16 %v5839_v42  ;;  %v6190_v61 = vunpack.c.l.bf16 %v7444_v47  ;;  %v5869_v46 = vld [vmem:[%s7168_s25 + $0x14] sm:$0x1] }
  0x8e   : > { %v6532_v0 = vpack.i.bf16 %v1172_v53, %v1171_v45  ;;  %v6557_v1 = vpack.i.bf16 %v6187_v55, %v6186_v54  ;;  %v6191_v2 = vunpack.c.h.bf16 %v7444_v47  ;;  %v1377_v3 = vunpack.c.l.bf16 %v5843_v52  ;;  %v5894_v53 = vld [vmem:[%s7168_s25 + $0x78] sm:$0xf]  ;;  %216 = vst.msk [vmem:[#allocation2 + $0x40] sm:$0xff] %vm207_vm6, %v6186_v54  ;;  %217 = vst.msk [vmem:[#allocation2 + $0x48] sm:$0xff] %vm207_vm6, %v6187_v55  ;;  %v6038_v54 = vld [vmem:[%s7168_s25 + $0x84] sm:$0xf] }
  0x8f   : > { %6538 = vrot.lane.b32.xlu1 %v6537_v58, %s7090_s27  ;;  %v6552_v5 = vpack.i.bf16 %v1374_v60, %v1373_v56  ;;  %v1378_v6 = vunpack.c.h.bf16 %v5843_v52  ;;  %v6194_v7 = vunpack.c.l.bf16 %v7459_v57  ;;  %v6195_v8 = vunpack.c.h.bf16 %v7459_v57  ;;  %220 = vst.msk [vmem:[#allocation2 + $0x60] sm:$0xff] %vm207_vm6, %v6190_v61  ;;  %v6039_v55 = vld [vmem:[%s7168_s25 + $0x88] sm:$0xf] }
  0x90   : > { %6533 = vrot.lane.b32.xlu0 %v6532_v0, %s7090_s27  ;;  %v6567_v10 = vpack.i.bf16 %v6191_v2, %v6190_v61  ;;  %v1381_v11 = vunpack.c.l.bf16 %v5847_v62  ;;  %v1382_v12 = vunpack.c.h.bf16 %v5847_v62  ;;  %v6198_v13 = vunpack.c.l.bf16 %v6255_v63  ;;  %221 = vst.msk [vmem:[#allocation2 + $0x68] sm:$0xff] %vm207_vm6, %v6191_v2 }
  0x91   : > { %v6562_v16 = vpack.i.bf16 %v1378_v6, %v1377_v3  ;;  %v7485_v17 = vpack.i.bf16 %v6195_v8, %v6194_v7  ;;  %v6199_v18 = vunpack.c.h.bf16 %v6255_v63  ;;  %v1385_v19 = vunpack.c.l.bf16 %v5851_v4  ;;  %224 = vst.msk [vmem:[#allocation2 + $0x80] sm:$0xff] %vm207_vm6, %v6194_v7  ;;  %225 = vst.msk [vmem:[#allocation2 + $0x88] sm:$0xff] %vm207_vm6, %v6195_v8 }
  0x92   : > { %v7488_v22 = vpack.i.bf16 %v1382_v12, %v1381_v11  ;;  %v1386_v23 = vunpack.c.h.bf16 %v5851_v4  ;;  %v6202_v24 = vunpack.c.l.bf16 %v6256_v9  ;;  %v6203_v25 = vunpack.c.h.bf16 %v6256_v9  ;;  %v5895_v4 = vld [vmem:[%s7168_s25 + $0x7c] sm:$0xf] }
  0x93   : > { %6548 = vrot.lane.b32.xlu1 %v7452_v50, %s7091_s28  ;;  %v7493_v29 = vpack.i.bf16 %v6199_v18, %v6198_v13  ;;  %v1389_v30 = vunpack.c.l.bf16 %v5855_v14  ;;  %v1390_v31 = vunpack.c.h.bf16 %v5855_v14  ;;  %v1803_v32 = vshrl.u32 %v5891_v15, 16 }
  0x94   : > { %6543 = vrot.lane.b32.xlu0 %v6542_v59, %s7091_s28  ;;  %v7497_v34 = vpack.i.bf16 %v1386_v23, %v1385_v19  ;;  %v7499_v35 = vpack.i.bf16 %v6203_v25, %v6202_v24  ;;  %v1806_v37 = vshll.u32 %v5891_v15, 16  ;;  %v1812_v38 = vshll.u32 %v5892_v20, 16 }
  0x95   : > { %v7502_v42 = vpack.i.bf16 %v1390_v31, %v1389_v30  ;;  %v1805_v43 = vrot.slane %v1803_v32, 4  ;;  %v1816_v44 = vshrl.u32 %v5892_v20, 16  ;;  %v1822_v45 = vshll.u32 %v5893_v28, 16  ;;  %v5870_v31 = vld [vmem:[%s7168_s25 + $0x18] sm:$0xf] }
  0x96   : > { %v1808_v48 = vrot.slane %v1806_v37, 5  ;;  %v1814_v49 = vrot.slane %v1812_v38, 5  ;;  %v1611_v51 = vshrl.u32 %v5867_v33, 16  ;;  %v1614_v52 = vshll.u32 %v5867_v33, 16 }
  0x97   : > { %6558 = vrot.lane.b32.xlu1 %v6557_v1, %s7091_s28  ;;  %v1818_v56 = vrot.slane %v1816_v44, 4  ;;  %v1824_v58 = vrot.slane %v1822_v45, 5  ;;  %v1620_v59 = vshll.u32 %v5868_v39, 16  ;;  %v1624_v60 = vshrl.u32 %v5868_v39, 16  ;;  %v5871_v44 = vld [vmem:[%s7168_s25 + $0x1c] sm:$0xf] }
  0x98   : > { %6553 = vrot.lane.b32.xlu0 %v6552_v5, %s7091_s28  ;;  %v1809_v62 = vor.u32 %v1808_v48, %v1805_v43  ;;  %v1613_v63 = vrot.slane %v1611_v51, 4  ;;  %v1616_v0 = vrot.slane %v1614_v52, 5  ;;  %v1630_v3 = vshll.u32 %v5869_v46, 16  ;;  %v5896_v5 = vld [vmem:[%s7168_s25 + $0x80] sm:$0x1] }
  0x99   : > { %v1819_v6 = vor.u32 %v1818_v56, %v1814_v49  ;;  %v1622_v9 = vrot.slane %v1620_v59, 5  ;;  %v1626_v11 = vrot.slane %v1624_v60, 4  ;;  %v1827_v12 = vshrl.u32 %v5894_v53, 16 }
  0x9a   : > { %v1810_v13 = vrot.slane %v1809_v62, 4  ;;  %v1617_v14 = vor.u32 %v1616_v0, %v1613_v63  ;;  %v1632_v1 = vrot.slane %v1630_v3, 5  ;;  %v1830_v15 = vshll.u32 %v5894_v53, 16  ;;  %v5940_v0 = vld [vmem:[%s7168_s25 + $0x70] sm:$0xf] }
  0x9b   : > { %6568 = vrot.lane.b32.xlu1 %v6567_v10, %s7091_s28  ;;  %v1820_v18 = vrot.slane %v1819_v6, 4  ;;  %v1627_v19 = vor.u32 %v1626_v11, %v1622_v9  ;;  %v1829_v20 = vrot.slane %v1827_v12, 4  ;;  %v1836_v23 = vshll.u32 %v5895_v4, 16 }
  0x9c   : > { %6563 = vrot.lane.b32.xlu0 %v6562_v16, %s7091_s28  ;;  %v1815_v24 = vsel %vm7180_vm2, %v1810_v13, %v1814_v49  ;;  %v1618_v25 = vrot.slane %v1617_v14, 4  ;;  %v1832_v28 = vrot.slane %v1830_v15, 5  ;;  %v1840_v30 = vshrl.u32 %v5895_v4, 16 }
  0x9d   : > { %v1825_v32 = vsel %vm7180_vm2, %v1820_v18, %v1824_v58  ;;  %v7517_v33 = vunpack.c.l.bf16 %v1815_v24  ;;  %v1628_v10 = vrot.slane %v1627_v19, 4  ;;  %v1838_v37 = vrot.slane %v1836_v23, 5  ;;  %v5939_v58 = vld [vmem:[%s7168_s25 + $0x6c] sm:$0xe] }
  0x9e   : > { %v7519_v38 = vunpack.c.l.bf16 %v1825_v32  ;;  %v1623_v16 = vsel %vm7180_vm2, %v1618_v25, %v1622_v9  ;;  %v1833_v39 = vor.u32 %v1832_v28, %v1829_v20  ;;  %v1842_v43 = vrot.slane %v1840_v30, 4  ;;  %v5941_v9 = vld [vmem:[%s7168_s25 + $0x74] sm:$0x1]  ;;  %v5916_v20 = vld [vmem:[%s7168_s25 + $0x10] sm:$0xf] }
  0x9f   : > { %6578 = vrot.lane.b32.xlu1 %v7485_v17, %s7091_s28  ;;  %v1633_v45 = vsel %vm7180_vm2, %v1628_v10, %v1632_v1  ;;  %v7528_v46 = vunpack.c.l.bf16 %v1623_v16  ;;  %v1846_v48 = vshll.u32 %v5896_v5, 16  ;;  %v1635_v49 = vshrl.u32 %v5870_v31, 16  ;;  %v5872_v17 = vld [vmem:[%s7168_s25 + $0x20] sm:$0x1]  ;;  %v5915_v1 = vld [vmem:[%s7168_s25 + $0xc] sm:$0xe] }
  0xa0   : > { %6573 = vrot.lane.b32.xlu0 %v7488_v22, %s7091_s28  ;;  %v6607_v51 = vpack.i.bf16 %v7519_v38, %v7517_v33  ;;  %v7534_v52 = vunpack.c.l.bf16 %v1633_v45  ;;  %v1834_v53 = vrot.slane %v1833_v39, 4  ;;  %v1843_v56 = vor.u32 %v1842_v43, %v1838_v37  ;;  %v5917_v30 = vld [vmem:[%s7168_s25 + $0x14] sm:$0x1]  ;;  %v5943_v43 = vld [vmem:[%s7168_s25 + $0x7c] sm:$0xf] }
  0xa1   : > { %v1848_v59 = vrot.slane %v1846_v48, 5  ;;  %v1637_v60 = vrot.slane %v1635_v49, 4  ;;  %v1638_v62 = vshll.u32 %v5870_v31, 16  ;;  %v1644_v63 = vshll.u32 %v5871_v44, 16  ;;  %v5942_v31 = vld [vmem:[%s7168_s25 + $0x78] sm:$0xe] }
  0xa2   : > { %v6602_v3 = vpack.i.bf16 %v7534_v52, %v7528_v46  ;;  %v1839_v22 = vsel %vm7180_vm2, %v1834_v53, %v1838_v37  ;;  %v1844_v4 = vrot.slane %v1843_v56, 4  ;;  %v1648_v6 = vshrl.u32 %v5871_v44, 16  ;;  %v5944_v48 = vld [vmem:[%s7168_s25 + $0x80] sm:$0x1] }
  0xa3   : > { %6588 = vrot.lane.b32.xlu1 %v7493_v29, %s7091_s28  ;;  %v7546_v11 = vunpack.c.l.bf16 %v1839_v22  ;;  %v1640_v12 = vrot.slane %v1638_v62, 5  ;;  %v1646_v13 = vrot.slane %v1644_v63, 5  ;;  %v1654_v14 = vshll.u32 %v5872_v17, 16  ;;  %v5918_v17 = vld [vmem:[%s7168_s25 + $0x18] sm:$0xe] }
  0xa4   : > { %6583 = vrot.lane.b32.xlu0 %v7497_v34, %s7091_s28  ;;  %v1849_v15 = vsel %vm7180_vm2, %v1844_v4, %v1848_v59  ;;  %v1650_v18 = vrot.slane %v1648_v6, 4  ;;  %v5971_v19 = vrot.slane %v5939_v58, 9  ;;  %v2373_v5 = vrot.slane %v5940_v0, 5  ;;  %v5919_v62 = vld [vmem:[%s7168_s25 + $0x1c] sm:$0xf] }
  0xa5   : > { %v2045_v23 = vunpack.c.l.bf16 %v1849_v15  ;;  %v1641_v24 = vor.u32 %v1640_v12, %v1637_v60  ;;  %v1656_v25 = vrot.slane %v1654_v14, 5  ;;  %v2376_v28 = vrot.slane %v5941_v9, 5  ;;  %v5920_v63 = vld [vmem:[%s7168_s25 + $0x20] sm:$0x1]  ;;  %v5997_v9 = vld [vmem:[%s7168_s25 + $0x84] sm:$0xff]  }
  0xa6   : > { %v1651_v32 = vor.u32 %v1650_v18, %v1646_v13  ;;  %v2374_v33 = vsel %vm7298_vm5, %v5971_v19, %v2373_v5  ;;  %v2375_v34 = vrot.slane %v2373_v5, 4  ;;  %v5963_v10 = vrot.slane %v5915_v1, 9  ;;  %v5981_v1 = vld [vmem:[%s7168_s25 + $0x24] sm:$0xff]   ;;  %v6035_v5 = vld [vmem:[%s7168_s25 + $0x78] sm:$0xf] }
  0xa7   : > { %6598 = vrot.lane.b32.xlu1 %v7499_v35, %s7091_s28  ;;  %v6617_v37 = vpack.i.bf16 %v2045_v23, %v7546_v11  ;;  %v1642_v38 = vrot.slane %v1641_v24, 4  ;;  %v2475_v16 = vunpack.c.l.bf16 %v2374_v33  ;;  %v2317_v39 = vrot.slane %v5916_v20, 5 }
  0xa8   : > { %6593 = vrot.lane.b32.xlu0 %v7502_v42, %s7091_s28  ;;  %v1652_v44 = vrot.slane %v1651_v32, 4  ;;  %v2377_v45 = vsel %vm7298_vm5, %v2375_v34, %v2376_v28  ;;  %v2320_v46 = vrot.slane %v5917_v30, 5  ;;  %v5972_v49 = vrot.slane %v5942_v31, 9 }
  0xa9   : > { %v1647_v35 = vsel %vm7180_vm2, %v1642_v38, %v1646_v13  ;;  %v2476_v52 = vunpack.c.l.bf16 %v2377_v45  ;;  %v2318_v53 = vsel %vm7298_vm5, %v5963_v10, %v2317_v39  ;;  %v2319_v56 = vrot.slane %v2317_v39, 4  ;;  %v6037_v38 = vld [vmem:[%s7168_s25 + $0x80] sm:$0x1]  ;;  %v6011_v39 = vld [vmem:[%s7168_s25 + $0x18] sm:$0xf] }
  0xaa   : > { %v1657_v42 = vsel %vm7180_vm2, %v1652_v44, %v1656_v25  ;;  %v2028_v58 = vunpack.c.l.bf16 %v1647_v35  ;;  %v2459_v59 = vunpack.c.l.bf16 %v2318_v53  ;;  %v2380_v60 = vrot.slane %v5943_v43, 5  ;;  %v6036_v25 = vld [vmem:[%s7168_s25 + $0x7c] sm:$0xf]  ;;  %v6394_v53 = vpop.permute.xlu1 %6393 }
  0xab   : > { %6608 = vrot.lane.b32.xlu1 %v6607_v51, %s7092_s29  ;;  %v2029_v0 = vunpack.c.l.bf16 %v1657_v42  ;;  %v6627_v22 = vpack.i.bf16 %v2476_v52, %v2475_v16  ;;  %v2321_v4 = vsel %vm7298_vm5, %v2319_v56, %v2320_v46  ;;  %v2383_v6 = vrot.slane %v5944_v48, 5  ;;  %v6012_v46 = vld [vmem:[%s7168_s25 + $0x1c] sm:$0xf] }
  0xac   : > { %6603 = vrot.lane.b32.xlu0 %v6602_v3, %s7092_s29  ;;  %v2460_v11 = vunpack.c.l.bf16 %v2321_v4  ;;  %v2381_v12 = vsel %vm7298_vm5, %v5972_v49, %v2380_v60  ;;  %v2382_v13 = vrot.slane %v2380_v60, 4  ;;  %v5964_v14 = vrot.slane %v5918_v17, 9 }
  0xad   : > { %v6612_v15 = vpack.i.bf16 %v2029_v0, %v2028_v58  ;;  %v2477_v51 = vunpack.c.l.bf16 %v2381_v12  ;;  %v2324_v18 = vrot.slane %v5919_v62, 5  ;;  %v2327_v19 = vrot.slane %v5920_v63, 5  ;;  %v6013_v58 = vld [vmem:[%s7168_s25 + $0x20] sm:$0x1] }
  0xae   : > { %v6622_v20 = vpack.i.bf16 %v2460_v11, %v2459_v59  ;;  %v2384_v23 = vsel %vm7298_vm5, %v2382_v13, %v2383_v6  ;;  %v2703_v24 = vunpack.c.l.bf16 %v5997_v9  ;;  %v2704_v3 = vunpack.c.h.bf16 %v5997_v9 }
  0xaf   : > { %6618 = vrot.lane.b32.xlu1 %v6617_v37, %s7092_s29  ;;  %v2478_v28 = vunpack.c.l.bf16 %v2384_v23  ;;  %v2325_v30 = vsel %vm7298_vm5, %v5964_v14, %v2324_v18  ;;  %v2326_v31 = vrot.slane %v2324_v18, 4  ;;  %v2687_v32 = vunpack.c.l.bf16 %v5981_v1  ;;  %v6149_v23 = vld [vmem:[%s7168_s25] sm:$0xff]  }
  0xb0   : > { %6613 = vrot.lane.b32.xlu0 %v6612_v15, %s7092_s29  ;;  %v2461_v33 = vunpack.c.l.bf16 %v2325_v30  ;;  %v7592_v34 = vpack.i.bf16 %v2704_v3, %v2703_v24  ;;  %v2688_v10 = vunpack.c.h.bf16 %v5981_v1  ;;  %v3119_v16 = vshrl.u32 %v6035_v5, 16  ;;  %v6384_v1 = vpop.permute.xlu0 %6383  ;;  %v7613_v24 = vpop.permute.xlu1 %6398 }
  0xb1   : > { %v6637_v43 = vpack.i.bf16 %v2478_v28, %v2477_v51  ;;  %v2328_v37 = vsel %vm7298_vm5, %v2326_v31, %v2327_v19  ;;  %v3122_v44 = vshll.u32 %v6035_v5, 16  ;;  %v3128_v45 = vshll.u32 %v6036_v25, 16  ;;  %v6040_v28 = vld [vmem:[%s7168_s25 + $0x8c] sm:$0x1] }
  0xb2   : > { %v2462_v48 = vunpack.c.l.bf16 %v2328_v37  ;;  %v7599_v49 = vpack.i.bf16 %v2688_v10, %v2687_v32  ;;  %v3121_v35 = vrot.slane %v3119_v16, 4  ;;  %v3132_v52 = vshrl.u32 %v6036_v25, 16  ;;  %v6014_v10 = vld [vmem:[%s7168_s25 + $0x24] sm:$0xf] }
  0xb3   : > { %6628 = vrot.lane.b32.xlu1 %v6627_v22, %s7093_s30  ;;  %v3124_v56 = vrot.slane %v3122_v44, 5  ;;  %v3130_v17 = vrot.slane %v3128_v45, 5  ;;  %v3138_v42 = vshll.u32 %v6037_v38, 16  ;;  %v2927_v59 = vshrl.u32 %v6011_v39, 16 }
  0xb4   : > { %6623 = vrot.lane.b32.xlu0 %v6622_v20, %s7093_s30  ;;  %v6632_v60 = vpack.i.bf16 %v2462_v48, %v2461_v33  ;;  %v3134_v62 = vrot.slane %v3132_v52, 4  ;;  %v2930_v63 = vshll.u32 %v6011_v39, 16  ;;  %v2936_v0 = vshll.u32 %v6012_v46, 16  ;;  %v7649_v38 = vpop.permute.xlu0 %6388  ;;  %v7658_v48 = vpop.permute.xlu1 %6408 }
  0xb5   : > { %v3125_v4 = vor.u32 %v3124_v56, %v3121_v35  ;;  %v3140_v6 = vrot.slane %v3138_v42, 5  ;;  %v2929_v9 = vrot.slane %v2927_v59, 4  ;;  %v2940_v11 = vshrl.u32 %v6012_v46, 16 }
  0xb6   : > { %v3135_v12 = vor.u32 %v3134_v62, %v3130_v17  ;;  %v2932_v13 = vrot.slane %v2930_v63, 5  ;;  %v2938_v14 = vrot.slane %v2936_v0, 5  ;;  %v2946_v22 = vshll.u32 %v6013_v58, 16 }
  0xb7   : > { %6638 = vrot.lane.b32.xlu1 %v6637_v43, %s7093_s30  ;;  %v3126_v15 = vrot.slane %v3125_v4, 4  ;;  %v2942_v51 = vrot.slane %v2940_v11, 4  ;;  %v6396_v20 = vunpack.i.h.bf16 %v6394_v53  ;;  %v6395_v40 = vunpack.i.l.bf16 %v6394_v53  ;;  %v6015_v43 = vld [vmem:[%s7168_s25 + $0x28] sm:$0xf]  ;;  %v6016_v53 = vld [vmem:[%s7168_s25 + $0x2c] sm:$0x1] }
  0xb8   : > { %6633 = vrot.lane.b32.xlu0 %v6632_v60, %s7093_s30  ;;  %v3136_v18 = vrot.slane %v3135_v12, 4  ;;  %v2933_v19 = vor.u32 %v2932_v13, %v2929_v9  ;;  %v2948_v5 = vrot.slane %v2946_v22, 5  ;;  %v6386_v41 = vunpack.i.h.bf16 %v6384_v1  ;;  %v7666_v13 = vpop.permute.xlu0 %6403 }
  0xb9   : > { %v3131_v21 = vsel %vm7180_vm2, %v3126_v15, %v3130_v17  ;;  %v2943_v36 = vor.u32 %v2942_v51, %v2938_v14  ;;  %873 = vst.msk [vmem:[#allocation2 + $0x28] sm:$0xff] %vm867_vm7, %v6396_v20  ;;  %v6385_v57 = vunpack.i.l.bf16 %v6384_v1  ;;  %872 = vst.msk [vmem:[#allocation2 + $0x20] sm:$0xff] %vm867_vm7, %v6395_v40  ;;  %v6150_v3 = vunpack.c.l.bf16 %v6149_v23  ;;  %v6083_v20 = vld [vmem:[%s7168_s25 + $0x78] sm:$0xe] }
  0xba   : > { %v3141_v47 = vsel %vm7180_vm2, %v3136_v18, %v3140_v6  ;;  %v3358_v61 = vunpack.c.l.bf16 %v3131_v21  ;;  %v2934_v2 = vrot.slane %v2933_v19, 4  ;;  %v6151_v25 = vunpack.c.h.bf16 %v6149_v23  ;;  %v149_v6 = vld [vmem:[%s7168_s25 + $0x24] sm:$0xff]   ;;  %v7676_v23 = vpop.permute.xlu1 %6418 }
  0xbb   : > { %6648 = vrot.lane.b32.xlu1 %v7493_v29, %s7094_s3  ;;  %v3359_v7 = vunpack.c.l.bf16 %v3141_v47  ;;  %v2944_v8 = vrot.slane %v2943_v36, 4  ;;  %v3143_v31 = vshrl.u32 %v6038_v54, 16  ;;  %v3146_v32 = vshll.u32 %v6038_v54, 16  ;;  %208 = vst.msk [vmem:[#allocation2] sm:$0xff] %vm207_vm6, %v6150_v3  ;;  %v6085_v54 = vld [vmem:[%s7168_s25 + $0x80] sm:$0x1] }
  0xbc   : > { %6643 = vrot.lane.b32.xlu0 %v7452_v50, %s7094_s3  ;;  %v2939_v30 = vsel %vm7180_vm2, %v2934_v2, %v2938_v14  ;;  %v3152_v33 = vshll.u32 %v6039_v55, 16  ;;  %209 = vst.msk [vmem:[#allocation2 + $0x8] sm:$0xff] %vm207_vm6, %v6151_v25  ;;  %v3156_v50 = vshrl.u32 %v6039_v55, 16  ;;  %v3162_v52 = vshll.u32 %v6040_v28, 16 }
  0xbd   : > { %v6667_v29 = vpack.i.bf16 %v3359_v7, %v3358_v61  ;;  %v2949_v16 = vsel %vm7180_vm2, %v2944_v8, %v2948_v5  ;;  %v3342_v39 = vunpack.c.l.bf16 %v2939_v30  ;;  %868 = vst.msk [vmem:[#allocation2] sm:$0xff] %vm867_vm7, %v6385_v57  ;;  %869 = vst.msk [vmem:[#allocation2 + $0x8] sm:$0xff] %vm867_vm7, %v6386_v41  ;;  %v3145_v44 = vrot.slane %v3143_v31, 4  ;;  %v145_v5 = vld [vmem:[%s7168_s25 + $0xc] sm:$0xff]   ;;  %v6084_v41 = vld [vmem:[%s7168_s25 + $0x7c] sm:$0xf] }
  0xbe   : > { %v3343_v37 = vunpack.c.l.bf16 %v2949_v16  ;;  %v3148_v45 = vrot.slane %v3146_v32, 5  ;;  %v3154_v46 = vrot.slane %v3152_v33, 5  ;;  %v3158_v35 = vrot.slane %v3156_v50, 4  ;;  %v6059_v57 = vld [vmem:[%s7168_s25 + $0x18] sm:$0xe] }
  0xbf   : > { %6658 = vrot.lane.b32.xlu1 %v7592_v34, %s7094_s3  ;;  %v2951_v56 = vshrl.u32 %v6014_v10, 16  ;;  %v2954_v17 = vshll.u32 %v6014_v10, 16  ;;  %v2960_v59 = vshll.u32 %v6015_v43, 16  ;;  %v2964_v60 = vshrl.u32 %v6015_v43, 16  ;;  %v6060_v7 = vld [vmem:[%s7168_s25 + $0x1c] sm:$0xf] }
  0xc0   : > { %6653 = vrot.lane.b32.xlu0 %v7599_v49, %s7094_s3  ;;  %v6662_v42 = vpack.i.bf16 %v3343_v37, %v3342_v39  ;;  %v3149_v58 = vor.u32 %v3148_v45, %v3145_v44  ;;  %v3159_v62 = vor.u32 %v3158_v35, %v3154_v46  ;;  %v3164_v63 = vrot.slane %v3162_v52, 5  ;;  %v6061_v30 = vld [vmem:[%s7168_s25 + $0x20] sm:$0x1]  ;;  %v7706_v35 = vpop.permute.xlu1 %6428 }
  0xc1   : > { %v2953_v0 = vrot.slane %v2951_v56, 4  ;;  %v2956_v4 = vrot.slane %v2954_v17, 5  ;;  %v2962_v34 = vrot.slane %v2960_v59, 5  ;;  %v2966_v11 = vrot.slane %v2964_v60, 4  ;;  %v153_v43 = vld [vmem:[%s7168_s25 + $0x3c] sm:$0xff]  }
  0xc2   : > { %v3150_v9 = vrot.slane %v3149_v58, 4  ;;  %v2970_v12 = vshll.u32 %v6016_v53, 16  ;;  %v3160_v49 = vrot.slane %v3159_v62, 4  ;;  %v6401_v22 = vunpack.i.h.bf16 %v7613_v24  ;;  %v6087_v58 = vld [vmem:[%s7168_s25 + $0x88] sm:$0xf] }
  0xc3   : > { %6668 = vrot.lane.b32.xlu1 %v6667_v29, %s7095_s4  ;;  %v2957_v14 = vor.u32 %v2956_v4, %v2953_v0  ;;  %v6400_v1 = vunpack.i.l.bf16 %v7613_v24  ;;  %v2967_v51 = vor.u32 %v2966_v11, %v2962_v34  ;;  %v181_v19 = vunpack.c.l.bf16 %v149_v6  ;;  %v6088_v0 = vld [vmem:[%s7168_s25 + $0x8c] sm:$0x1]  ;;  %v6062_v4 = vld [vmem:[%s7168_s25 + $0x24] sm:$0xe] }
  0xc4   : > { %6663 = vrot.lane.b32.xlu0 %v6662_v42, %s7095_s4  ;;  %v3155_v15 = vsel %vm7180_vm2, %v3150_v9, %v3154_v46  ;;  %v2972_v18 = vrot.slane %v2970_v12, 5  ;;  %v3165_v21 = vsel %vm7180_vm2, %v3160_v49, %v3164_v63  ;;  %v182_v24 = vunpack.c.h.bf16 %v149_v6  ;;  %v6086_v42 = vld [vmem:[%s7168_s25 + $0x84] sm:$0xe]  ;;  %v6063_v6 = vld [vmem:[%s7168_s25 + $0x28] sm:$0xf] }
  0xc5   : > { %v3360_v36 = vunpack.c.l.bf16 %v3155_v15  ;;  %v2958_v40 = vrot.slane %v2957_v14, 4  ;;  %v3361_v55 = vunpack.c.l.bf16 %v3165_v21  ;;  %v2968_v47 = vrot.slane %v2967_v51, 4  ;;  %214 = vst.msk [vmem:[#allocation2 + $0x30] sm:$0xff] %vm207_vm6, %v181_v19  ;;  %v6064_v49 = vld [vmem:[%s7168_s25 + $0x2c] sm:$0x1] }
  0xc6   : > { %v6391_v61 = vunpack.i.h.bf16 %v7649_v38  ;;  %v6390_v2 = vunpack.i.l.bf16 %v7649_v38  ;;  %215 = vst.msk [vmem:[#allocation2 + $0x38] sm:$0xff] %vm207_vm6, %v182_v24  ;;  %v177_v3 = vunpack.c.l.bf16 %v145_v5  ;;  %v178_v25 = vunpack.c.h.bf16 %v145_v5  ;;  %v7695_v38 = vpop.permute.xlu0 %6413 }
  0xc7   : > { %v2963_v8 = vsel %vm7180_vm2, %v2958_v40, %v2962_v34  ;;  %874 = vst.msk [vmem:[#allocation2 + $0x30] sm:$0xff] %vm867_vm7, %v6400_v1  ;;  %v6115_v28 = vrot.slane %v6083_v20, 9  ;;  %v6677_v31 = vpack.i.bf16 %v3361_v55, %v3360_v36  ;;  %v2973_v32 = vsel %vm7180_vm2, %v2968_v47, %v2972_v18  ;;  %875 = vst.msk [vmem:[#allocation2 + $0x38] sm:$0xff] %vm867_vm7, %v6401_v22  ;;  %v157_v20 = vld [vmem:[%s7168_s25 + $0x54] sm:$0xff]  }
  0xc8   : > { %v3344_v33 = vunpack.c.l.bf16 %v2963_v8  ;;  %v3689_v10 = vrot.slane %v6084_v41, 5  ;;  %v3345_v29 = vunpack.c.l.bf16 %v2973_v32  ;;  %210 = vst.msk [vmem:[#allocation2 + $0x10] sm:$0xff] %vm207_vm6, %v177_v3  ;;  %211 = vst.msk [vmem:[#allocation2 + $0x18] sm:$0xff] %vm207_vm6, %v178_v25  ;;  %v3692_v16 = vrot.slane %v6085_v54, 5  ;;  %v7735_v24 = vpop.permute.xlu1 %6438  ;;  %v5898_v3 = vld [vmem:[%s7168_s25 + $0x88] sm:$0xf] }
  0xc9   : > { %v6107_v39 = vrot.slane %v6059_v57, 9  ;;  %v3633_v50 = vrot.slane %v6060_v7, 5  ;;  %6678 = vrot.lane.b32.xlu1 %v6677_v31, %s7095_s4  ;;  %870 = vst.msk [vmem:[#allocation2 + $0x10] sm:$0xff] %vm867_vm7, %v6390_v2  ;;  %871 = vst.msk [vmem:[#allocation2 + $0x18] sm:$0xff] %vm867_vm7, %v6391_v61  ;;  %v3636_v45 = vrot.slane %v6061_v30, 5  ;;  %v6411_v46 = vunpack.i.h.bf16 %v7658_v48 }
  0xca   : > { %v3690_v37 = vsel %vm7298_vm5, %v6115_v28, %v3689_v10  ;;  %v3691_v44 = vrot.slane %v3689_v10, 4  ;;  %v6672_v52 = vpack.i.bf16 %v3345_v29, %v3344_v33  ;;  %v6410_v62 = vunpack.i.l.bf16 %v7658_v48  ;;  %v7725_v15 = vpop.permute.xlu0 %6423  ;;  %v5897_v61 = vld [vmem:[%s7168_s25 + $0x84] sm:$0xf]  ;;  %v5899_v25 = vld [vmem:[%s7168_s25 + $0x8c] sm:$0x1] }
  0xcb   : > { %v3791_v53 = vunpack.c.l.bf16 %v3690_v37  ;;  %v3634_v56 = vsel %vm7298_vm5, %v6107_v39, %v3633_v50  ;;  %v3635_v17 = vrot.slane %v3633_v50, 4  ;;  %v185_v63 = vunpack.c.l.bf16 %v153_v43  ;;  %v5873_v33 = vld [vmem:[%s7168_s25 + $0x24] sm:$0xf] }
  0xcc   : > { %v3693_v59 = vsel %vm7298_vm5, %v3691_v44, %v3692_v16  ;;  %v3775_v60 = vunpack.c.l.bf16 %v3634_v56  ;;  %6673 = vrot.lane.b32.xlu0 %v6672_v52, %s7095_s4  ;;  %v186_v11 = vunpack.c.h.bf16 %v153_v43  ;;  %v6406_v12 = vunpack.i.h.bf16 %v7666_v13 }
  0xcd   : > { %v3792_v9 = vunpack.c.l.bf16 %v3693_v59  ;;  %v3637_v34 = vsel %vm7298_vm5, %v3635_v17, %v3636_v45  ;;  %218 = vst.msk [vmem:[#allocation2 + $0x50] sm:$0xff] %vm207_vm6, %v185_v63  ;;  %v6405_v48 = vunpack.i.l.bf16 %v7666_v13  ;;  %v6116_v22 = vrot.slane %v6086_v42, 9  ;;  %v5874_v45 = vld [vmem:[%s7168_s25 + $0x28] sm:$0xf] }
  0xce   : > { %v3776_v14 = vunpack.c.l.bf16 %v3637_v34  ;;  %v3696_v1 = vrot.slane %v6087_v58, 5  ;;  %219 = vst.msk [vmem:[#allocation2 + $0x58] sm:$0xff] %vm207_vm6, %v186_v11  ;;  %v3699_v18 = vrot.slane %v6088_v0, 5  ;;  %v6108_v19 = vrot.slane %v6062_v4, 9  ;;  %v7754_v39 = vpop.permute.xlu0 %6433 }
  0xcf   : > { %v6687_v51 = vpack.i.bf16 %v3792_v9, %v3791_v53  ;;  %878 = vst.msk [vmem:[#allocation2 + $0x50] sm:$0xff] %vm867_vm7, %v6410_v62  ;;  %877 = vst.msk [vmem:[#allocation2 + $0x48] sm:$0xff] %vm867_vm7, %v6406_v12  ;;  %v3640_v5 = vrot.slane %v6063_v6, 5  ;;  %v3643_v40 = vrot.slane %v6064_v49, 5  ;;  %v6421_v47 = vunpack.i.h.bf16 %v7676_v23  ;;  %v5875_v53 = vld [vmem:[%s7168_s25 + $0x2c] sm:$0x1] }
  0xd0   : > { %v6682_v21 = vpack.i.bf16 %v3776_v14, %v3775_v60  ;;  %879 = vst.msk [vmem:[#allocation2 + $0x58] sm:$0xff] %vm867_vm7, %v6411_v46  ;;  %876 = vst.msk [vmem:[#allocation2 + $0x40] sm:$0xff] %vm867_vm7, %v6405_v48  ;;  %v3697_v13 = vsel %vm7298_vm5, %v6116_v22, %v3696_v1  ;;  %v3698_v36 = vrot.slane %v3696_v1, 4  ;;  %v6420_v7 = vunpack.i.l.bf16 %v7676_v23  ;;  %v161_v6 = vld [vmem:[%s7168_s25 + $0x6c] sm:$0xff]  }
  0xd1   : > { %6688 = vrot.lane.b32.xlu1 %v6687_v51, %s7096_s5  ;;  %v3793_v41 = vunpack.c.l.bf16 %v3697_v13  ;;  %v3641_v54 = vsel %vm7298_vm5, %v6108_v19, %v3640_v5  ;;  %v3642_v55 = vrot.slane %v3640_v5, 4  ;;  %v189_v8 = vunpack.c.l.bf16 %v157_v20 }
  0xd2   : > { %6683 = vrot.lane.b32.xlu0 %v6682_v21, %s7096_s5  ;;  %v3700_v2 = vsel %vm7298_vm5, %v3698_v36, %v3699_v18  ;;  %v3777_v57 = vunpack.c.l.bf16 %v3641_v54  ;;  %v190_v31 = vunpack.c.h.bf16 %v157_v20  ;;  %v6416_v32 = vunpack.i.h.bf16 %v7695_v38  ;;  %v7763_v17 = vpop.permute.xlu1 %6448  ;;  %v5900_v20 = vld [vmem:[%s7168_s25 + $0x90] sm:$0xf]  ;;  %v5902_v54 = vld [vmem:[%s7168_s25 + $0x98] sm:$0x1] }
  0xd3   : > { %v3794_v28 = vunpack.c.l.bf16 %v3700_v2  ;;  %v3644_v30 = vsel %vm7298_vm5, %v3642_v55, %v3643_v40  ;;  %222 = vst.msk [vmem:[#allocation2 + $0x70] sm:$0xff] %vm207_vm6, %v189_v8  ;;  %v6415_v29 = vunpack.i.l.bf16 %v7695_v38  ;;  %v1851_v16 = vshrl.u32 %v5897_v61, 16 }
  0xd4   : > { %v3778_v10 = vunpack.c.l.bf16 %v3644_v30  ;;  %v1854_v23 = vshll.u32 %v5897_v61, 16  ;;  %223 = vst.msk [vmem:[#allocation2 + $0x78] sm:$0xff] %vm207_vm6, %v190_v31  ;;  %v1860_v43 = vshll.u32 %v5898_v3, 16  ;;  %v1864_v37 = vshrl.u32 %v5898_v3, 16 }
  0xd5   : > { %v6697_v50 = vpack.i.bf16 %v3794_v28, %v3793_v41  ;;  %882 = vst.msk [vmem:[#allocation2 + $0x70] sm:$0xff] %vm867_vm7, %v6420_v7  ;;  %881 = vst.msk [vmem:[#allocation2 + $0x68] sm:$0xff] %vm867_vm7, %v6416_v32  ;;  %v1870_v44 = vshll.u32 %v5899_v25, 16  ;;  %v1853_v38 = vrot.slane %v1851_v16, 4  ;;  %v1659_v56 = vshrl.u32 %v5873_v33, 16 }
  0xd6   : > { %v6692_v46 = vpack.i.bf16 %v3778_v10, %v3777_v57  ;;  %883 = vst.msk [vmem:[#allocation2 + $0x78] sm:$0xff] %vm867_vm7, %v6421_v47  ;;  %880 = vst.msk [vmem:[#allocation2 + $0x60] sm:$0xff] %vm867_vm7, %v6415_v29  ;;  %v1856_v52 = vrot.slane %v1854_v23, 5  ;;  %v1862_v42 = vrot.slane %v1860_v43, 5  ;;  %v1866_v58 = vrot.slane %v1864_v37, 4 }
  0xd7   : > { %6698 = vrot.lane.b32.xlu1 %v6697_v50, %s7096_s5  ;;  %v1872_v59 = vrot.slane %v1870_v44, 5  ;;  %v1662_v60 = vshll.u32 %v5873_v33, 16  ;;  %v1661_v63 = vrot.slane %v1659_v56, 4  ;;  %v1668_v0 = vshll.u32 %v5874_v45, 16  ;;  %v7770_v1 = vpop.permute.xlu0 %6443  ;;  %v5901_v41 = vld [vmem:[%s7168_s25 + $0x94] sm:$0xf] }
  0xd8   : > { %6693 = vrot.lane.b32.xlu0 %v6692_v46, %s7096_s5  ;;  %v1857_v62 = vor.u32 %v1856_v52, %v1853_v38  ;;  %v1672_v4 = vshrl.u32 %v5874_v45, 16  ;;  %v1867_v9 = vor.u32 %v1866_v58, %v1862_v42  ;;  %v1678_v11 = vshll.u32 %v5875_v53, 16  ;;  %v5876_v25 = vld [vmem:[%s7168_s25 + $0x30] sm:$0xf]  ;;  %v5877_v32 = vld [vmem:[%s7168_s25 + $0x34] sm:$0xf] }
  0xd9   : > { %v1664_v34 = vrot.slane %v1662_v60, 5  ;;  %v6431_v12 = vunpack.i.h.bf16 %v7706_v35  ;;  %v1670_v14 = vrot.slane %v1668_v0, 5  ;;  %v6430_v22 = vunpack.i.l.bf16 %v7706_v35  ;;  %v5878_v46 = vld [vmem:[%s7168_s25 + $0x38] sm:$0x1] }
  0xda   : > { %v1858_v49 = vrot.slane %v1857_v62, 4  ;;  %v1674_v48 = vrot.slane %v1672_v4, 4  ;;  %v1868_v51 = vrot.slane %v1867_v9, 4  ;;  %v1680_v19 = vrot.slane %v1678_v11, 5  ;;  %v165_v62 = vld [vmem:[%s7168_s25 + $0x84] sm:$0xff]  }
  0xdb   : > { %v1665_v18 = vor.u32 %v1664_v34, %v1661_v63  ;;  %v193_v5 = vunpack.c.l.bf16 %v161_v6  ;;  %v194_v36 = vunpack.c.h.bf16 %v161_v6  ;;  %v6426_v40 = vunpack.i.h.bf16 %v7725_v15 }
  0xdc   : > { %v1863_v21 = vsel %vm7180_vm2, %v1858_v49, %v1862_v42  ;;  %v1675_v13 = vor.u32 %v1674_v48, %v1670_v14  ;;  %v7778_v55 = vpop.permute.xlu1 %6458  ;;  %v1873_v35 = vsel %vm7180_vm2, %v1868_v51, %v1872_v59  ;;  %v6425_v2 = vunpack.i.l.bf16 %v7725_v15 }
  0xdd   : > { %v2046_v47 = vunpack.c.l.bf16 %v1863_v21  ;;  %v1666_v61 = vrot.slane %v1665_v18, 4  ;;  %226 = vst.msk [vmem:[#allocation2 + $0x90] sm:$0xff] %vm207_vm6, %v193_v5  ;;  %v2047_v57 = vunpack.c.l.bf16 %v1873_v35  ;;  %227 = vst.msk [vmem:[#allocation2 + $0x98] sm:$0xff] %vm207_vm6, %v194_v36  ;;  %v1875_v8 = vshrl.u32 %v5900_v20, 16  ;;  %v6248_v18 = vld [vmem:[%s7168_s25 + $0x78] sm:$0xff]  }
  0xde   : > { %v1676_v7 = vrot.slane %v1675_v13, 4  ;;  %886 = vst.msk [vmem:[#allocation2 + $0x90] sm:$0xff] %vm867_vm7, %v6430_v22  ;;  %885 = vst.msk [vmem:[#allocation2 + $0x88] sm:$0xff] %vm867_vm7, %v6426_v40  ;;  %v1878_v3 = vshll.u32 %v5900_v20, 16  ;;  %v1884_v15 = vshll.u32 %v5901_v41, 16  ;;  %v1888_v30 = vshrl.u32 %v5901_v41, 16 }
  0xdf   : > { %v1671_v28 = vsel %vm7180_vm2, %v1666_v61, %v1670_v14  ;;  %887 = vst.msk [vmem:[#allocation2 + $0x98] sm:$0xff] %vm867_vm7, %v6431_v12  ;;  %884 = vst.msk [vmem:[#allocation2 + $0x80] sm:$0xff] %vm867_vm7, %v6425_v2  ;;  %v1894_v31 = vshll.u32 %v5902_v54, 16  ;;  %v6707_v33 = vpack.i.bf16 %v2047_v57, %v2046_v47  ;;  %v1877_v16 = vrot.slane %v1875_v8, 4  ;;  %v5945_v36 = vld [vmem:[%s7168_s25 + $0x84] sm:$0xe] }
  0xe0   : > { %v1681_v10 = vsel %vm7180_vm2, %v1676_v7, %v1680_v19  ;;  %v2030_v29 = vunpack.c.l.bf16 %v1671_v28  ;;  %v7795_v23 = vpop.permute.xlu0 %6453  ;;  %v7797_v50 = vpop.permute.xlu1 %6468  ;;  %v1880_v37 = vrot.slane %v1878_v3, 5  ;;  %v1886_v44 = vrot.slane %v1884_v15, 5  ;;  %v5946_v40 = vld [vmem:[%s7168_s25 + $0x88] sm:$0xf]  ;;  %v5947_v47 = vld [vmem:[%s7168_s25 + $0x8c] sm:$0x1] }
  0xe1   : > { %v2031_v43 = vunpack.c.l.bf16 %v1681_v10  ;;  %v1890_v45 = vrot.slane %v1888_v30, 4  ;;  %6708 = vrot.lane.b32.xlu1 %v6707_v33, %s7092_s29  ;;  %v1896_v38 = vrot.slane %v1894_v31, 5  ;;  %v1683_v52 = vshrl.u32 %v5876_v25, 16  ;;  %v5921_v61 = vld [vmem:[%s7168_s25 + $0x24] sm:$0xe] }
  0xe2   : > { %v1686_v53 = vshll.u32 %v5876_v25, 16  ;;  %v1692_v56 = vshll.u32 %v5877_v32, 16  ;;  %v1881_v58 = vor.u32 %v1880_v37, %v1877_v16  ;;  %v1696_v60 = vshrl.u32 %v5877_v32, 16  ;;  %v5922_v25 = vld [vmem:[%s7168_s25 + $0x28] sm:$0xf] }
  0xe3   : > { %v6702_v42 = vpack.i.bf16 %v2031_v43, %v2030_v29  ;;  %v1891_v59 = vor.u32 %v1890_v45, %v1886_v44  ;;  %v1685_v63 = vrot.slane %v1683_v52, 4  ;;  %v1702_v6 = vshll.u32 %v5878_v46, 16  ;;  %v5923_v32 = vld [vmem:[%s7168_s25 + $0x2c] sm:$0x1]  ;;  %v169_v46 = vld [vmem:[%s7168_s25 + $0x9c] sm:$0xff]  }
  0xe4   : > { %v1688_v0 = vrot.slane %v1686_v53, 5  ;;  %v1694_v4 = vrot.slane %v1692_v56, 5  ;;  %v7802_v9 = vpop.permute.xlu0 %6463  ;;  %v1882_v34 = vrot.slane %v1881_v58, 4  ;;  %v1698_v12 = vrot.slane %v1696_v60, 4  ;;  %v7847_v58 = vld [vmem:[%s7168_s25 + $0x90] sm:$0xff]  }
  0xe5   : > { %6703 = vrot.lane.b32.xlu0 %v6702_v42, %s7092_s29  ;;  %v1892_v11 = vrot.slane %v1891_v59, 4  ;;  %v6441_v49 = vunpack.i.h.bf16 %v7735_v24  ;;  %v1704_v48 = vrot.slane %v1702_v6, 5  ;;  %v6440_v22 = vunpack.i.l.bf16 %v7735_v24 }
  0xe6   : > { %v1689_v14 = vor.u32 %v1688_v0, %v1685_v63  ;;  %v197_v51 = vunpack.c.l.bf16 %v165_v62  ;;  %v7808_v19 = vpop.permute.xlu1 %6478  ;;  %v1887_v5 = vsel %vm7180_vm2, %v1882_v34, %v1886_v44  ;;  %v1699_v21 = vor.u32 %v1698_v12, %v1694_v4  ;;  %v5948_v0 = vld [vmem:[%s7168_s25 + $0x90] sm:$0xe] }
  0xe7   : > { %v1897_v20 = vsel %vm7180_vm2, %v1892_v11, %v1896_v38  ;;  %v198_v13 = vunpack.c.h.bf16 %v165_v62  ;;  %v2048_v41 = vunpack.c.l.bf16 %v1887_v5  ;;  %v6436_v24 = vunpack.i.h.bf16 %v7754_v39 }
  0xe8   : > { %v2049_v54 = vunpack.c.l.bf16 %v1897_v20  ;;  %v1690_v35 = vrot.slane %v1689_v14, 4  ;;  %230 = vst.msk [vmem:[#allocation2 + $0xb0] sm:$0xff] %vm207_vm6, %v197_v51  ;;  %v7820_v2 = vpop.permute.xlu0 %6473  ;;  %v1700_v57 = vrot.slane %v1699_v21, 4  ;;  %v6435_v7 = vunpack.i.l.bf16 %v7754_v39  ;;  %v5924_v14 = vld [vmem:[%s7168_s25 + $0x30] sm:$0xe] }
  0xe9   : > { %231 = vst.msk [vmem:[#allocation2 + $0xb8] sm:$0xff] %vm207_vm6, %v198_v13  ;;  %v6170_v8 = vunpack.c.l.bf16 %v6248_v18  ;;  %v6171_v3 = vunpack.c.h.bf16 %v6248_v18  ;;  %v5973_v30 = vrot.slane %v5945_v36, 9  ;;  %v2387_v31 = vrot.slane %v5946_v40, 5  ;;  %v5926_v20 = vld [vmem:[%s7168_s25 + $0x38] sm:$0x1] }
  0xea   : > { %890 = vst.msk [vmem:[#allocation2 + $0xb0] sm:$0xff] %vm867_vm7, %v6440_v22  ;;  %v6717_v28 = vpack.i.bf16 %v2049_v54, %v2048_v41  ;;  %v1695_v15 = vsel %vm7180_vm2, %v1690_v35, %v1694_v4  ;;  %891 = vst.msk [vmem:[#allocation2 + $0xb8] sm:$0xff] %vm867_vm7, %v6441_v49  ;;  %v7830_v33 = vpop.permute.xlu1 %6488  ;;  %v1705_v10 = vsel %vm7180_vm2, %v1700_v57, %v1704_v48  ;;  %v2390_v39 = vrot.slane %v5947_v47, 5  ;;  %v5949_v4 = vld [vmem:[%s7168_s25 + $0x94] sm:$0xf] }
  0xeb   : > { %v2032_v29 = vunpack.c.l.bf16 %v1695_v15  ;;  %228 = vst.msk [vmem:[#allocation2 + $0xa0] sm:$0xff] %vm207_vm6, %v6170_v8  ;;  %229 = vst.msk [vmem:[#allocation2 + $0xa8] sm:$0xff] %vm207_vm6, %v6171_v3  ;;  %v5965_v16 = vrot.slane %v5921_v61, 9  ;;  %v2033_v43 = vunpack.c.l.bf16 %v1705_v10  ;;  %v2388_v37 = vsel %vm7298_vm5, %v5973_v30, %v2387_v31  ;;  %v5950_v49 = vld [vmem:[%s7168_s25 + $0x98] sm:$0x1] }
  0xec   : > { %6718 = vrot.lane.b32.xlu1 %v6717_v28, %s7092_s29  ;;  %888 = vst.msk [vmem:[#allocation2 + $0xa0] sm:$0xff] %vm867_vm7, %v6435_v7  ;;  %889 = vst.msk [vmem:[#allocation2 + $0xa8] sm:$0xff] %vm867_vm7, %v6436_v24  ;;  %v2389_v44 = vrot.slane %v2387_v31, 4  ;;  %v2331_v45 = vrot.slane %v5922_v25, 5  ;;  %v7842_v38 = vpop.permute.xlu0 %6483  ;;  %v2479_v52 = vunpack.c.l.bf16 %v2388_v37  ;;  %v2334_v53 = vrot.slane %v5923_v32, 5  ;;  %v173_v47 = vld [vmem:[%s7168_s25 + $0xb4] sm:$0xff]  }
  0xed   : > { %v6451_v56 = vunpack.i.h.bf16 %v7763_v17  ;;  %v6450_v42 = vunpack.i.l.bf16 %v7763_v17  ;;  %v6712_v59 = vpack.i.bf16 %v2033_v43, %v2032_v29  ;;  %v201_v11 = vunpack.c.l.bf16 %v169_v46  ;;  %v5925_v17 = vld [vmem:[%s7168_s25 + $0x34] sm:$0xf]  ;;  %v7889_v31 = vld [vmem:[%s7168_s25 + $0xa8] sm:$0xff]  }
  0xee   : > { %v2391_v60 = vsel %vm7298_vm5, %v2389_v44, %v2390_v39  ;;  %v2332_v62 = vsel %vm7298_vm5, %v5965_v16, %v2331_v45  ;;  %v2333_v63 = vrot.slane %v2331_v45, 4  ;;  %v202_v12 = vunpack.c.h.bf16 %v169_v46  ;;  %v6260_v39 = vld [vmem:[%s7168_s25 + $0x30] sm:$0xff]  }
  0xef   : > { %v2480_v6 = vunpack.c.l.bf16 %v2391_v60  ;;  %v2463_v34 = vunpack.c.l.bf16 %v2332_v62  ;;  %v7858_v48 = vpop.permute.xlu1 %6498  ;;  %6713 = vrot.lane.b32.xlu0 %v6712_v59, %s7092_s29  ;;  %v6446_v51 = vunpack.i.h.bf16 %v7770_v1  ;;  %v6445_v18 = vunpack.i.l.bf16 %v7770_v1  ;;  %234 = vst.msk [vmem:[#allocation2 + $0xd0] sm:$0xff] %vm207_vm6, %v201_v11 }
  0xf0   : > { %v2335_v22 = vsel %vm7298_vm5, %v2333_v63, %v2334_v53  ;;  %v6174_v5 = vunpack.c.l.bf16 %v7847_v58  ;;  %v7867_v21 = vpop.permute.xlu0 %6493  ;;  %235 = vst.msk [vmem:[#allocation2 + $0xd8] sm:$0xff] %vm207_vm6, %v202_v12  ;;  %v6175_v40 = vunpack.c.h.bf16 %v7847_v58  ;;  %v5974_v41 = vrot.slane %v5948_v0, 9 }
  0xf1   : > { %v6727_v13 = vpack.i.bf16 %v2480_v6, %v2479_v52  ;;  %v2464_v36 = vunpack.c.l.bf16 %v2335_v22  ;;  %894 = vst.msk [vmem:[#allocation2 + $0xd0] sm:$0xff] %vm867_vm7, %v6450_v42  ;;  %895 = vst.msk [vmem:[#allocation2 + $0xd8] sm:$0xff] %vm867_vm7, %v6451_v56  ;;  %v2394_v1 = vrot.slane %v5949_v4, 5  ;;  %v2397_v54 = vrot.slane %v5950_v49, 5  ;;  %v6001_v42 = vld [vmem:[%s7168_s25 + $0x9c] sm:$0xff]  }
  0xf2   : > { %232 = vst.msk [vmem:[#allocation2 + $0xc0] sm:$0xff] %vm207_vm6, %v6174_v5  ;;  %v5966_v35 = vrot.slane %v5924_v14, 9  ;;  %v2338_v24 = vrot.slane %v5925_v17, 5  ;;  %233 = vst.msk [vmem:[#allocation2 + $0xc8] sm:$0xff] %vm207_vm6, %v6175_v40  ;;  %v2341_v57 = vrot.slane %v5926_v20, 5  ;;  %v6461_v7 = vunpack.i.h.bf16 %v7778_v55 }
  0xf3   : > { %6728 = vrot.lane.b32.xlu1 %v6727_v13, %s7093_s30  ;;  %v6722_v61 = vpack.i.bf16 %v2464_v36, %v2463_v34  ;;  %892 = vst.msk [vmem:[#allocation2 + $0xc0] sm:$0xff] %vm867_vm7, %v6445_v18  ;;  %v6460_v8 = vunpack.i.l.bf16 %v7778_v55  ;;  %v7881_v3 = vpop.permute.xlu1 %6508  ;;  %893 = vst.msk [vmem:[#allocation2 + $0xc8] sm:$0xff] %vm867_vm7, %v6446_v51  ;;  %v2395_v25 = vsel %vm7298_vm5, %v5974_v41, %v2394_v1  ;;  %v2396_v28 = vrot.slane %v2394_v1, 4  ;;  %v6041_v34 = vld [vmem:[%s7168_s25 + $0x90] sm:$0xf] }
  0xf4   : > { %v2339_v15 = vsel %vm7298_vm5, %v5966_v35, %v2338_v24  ;;  %v2340_v30 = vrot.slane %v2338_v24, 4  ;;  %v2481_v32 = vunpack.c.l.bf16 %v2395_v25  ;;  %v205_v55 = vunpack.c.l.bf16 %v173_v47  ;;  %v6042_v22 = vld [vmem:[%s7168_s25 + $0x94] sm:$0xf]  ;;  %v6043_v20 = vld [vmem:[%s7168_s25 + $0x98] sm:$0x1] }
  0xf5   : > { %6723 = vrot.lane.b32.xlu0 %v6722_v61, %s7093_s30  ;;  %v2465_v10 = vunpack.c.l.bf16 %v2339_v15  ;;  %v206_v29 = vunpack.c.h.bf16 %v173_v47  ;;  %v7893_v16 = vpop.permute.xlu0 %6503  ;;  %v2398_v43 = vsel %vm7298_vm5, %v2396_v28, %v2397_v54  ;;  %v6456_v44 = vunpack.i.h.bf16 %v7795_v23  ;;  %v6017_v13 = vld [vmem:[%s7168_s25 + $0x30] sm:$0xf]  ;;  %v6018_v1 = vld [vmem:[%s7168_s25 + $0x34] sm:$0xf] }
  0xf6   : > { %v2342_v37 = vsel %vm7298_vm5, %v2340_v30, %v2341_v57  ;;  %v6455_v45 = vunpack.i.l.bf16 %v7795_v23  ;;  %v2482_v46 = vunpack.c.l.bf16 %v2398_v43  ;;  %238 = vst.msk [vmem:[#allocation2 + $0xf0] sm:$0xff] %vm207_vm6, %v205_v55  ;;  %v6178_v53 = vunpack.c.l.bf16 %v7889_v31  ;;  %v5985_v23 = vld [vmem:[%s7168_s25 + $0x3c] sm:$0xff]  }
  0xf7   : > { %v2466_v52 = vunpack.c.l.bf16 %v2342_v37  ;;  %239 = vst.msk [vmem:[#allocation2 + $0xf8] sm:$0xff] %vm207_vm6, %v206_v29  ;;  %v6179_v56 = vunpack.c.h.bf16 %v7889_v31  ;;  %v6747_v58 = vpack.i.bf16 %v6175_v40, %v6174_v5  ;;  %v6218_v59 = vunpack.c.l.bf16 %v6260_v39 }
  0xf8   : > { %898 = vst.msk [vmem:[#allocation2 + $0xf0] sm:$0xff] %vm867_vm7, %v6460_v8  ;;  %899 = vst.msk [vmem:[#allocation2 + $0xf8] sm:$0xff] %vm867_vm7, %v6461_v7  ;;  %v6219_v60 = vunpack.c.h.bf16 %v6260_v39  ;;  %v7909_v62 = vpop.permute.xlu1 %6518  ;;  %v6737_v63 = vpack.i.bf16 %v2482_v46, %v2481_v32  ;;  %v6471_v4 = vunpack.i.h.bf16 %v7797_v50  ;;  %v6470_v6 = vunpack.i.l.bf16 %v7797_v50  ;;  %v6044_v46 = vld [vmem:[%s7168_s25 + $0x9c] sm:$0xf] }
  0xf9   : > { %v6732_v0 = vpack.i.bf16 %v2466_v52, %v2465_v10  ;;  %236 = vst.msk [vmem:[#allocation2 + $0xe0] sm:$0xff] %vm207_vm6, %v6178_v53  ;;  %237 = vst.msk [vmem:[#allocation2 + $0xe8] sm:$0xff] %vm207_vm6, %v6179_v56  ;;  %v7920_v11 = vpop.permute.xlu0 %6513  ;;  %v6466_v49 = vunpack.i.h.bf16 %v7802_v9  ;;  %v6465_v14 = vunpack.i.l.bf16 %v7802_v9  ;;  %v2707_v17 = vunpack.c.l.bf16 %v6001_v42 }
  0xfa   : > { %896 = vst.msk [vmem:[#allocation2 + $0xe0] sm:$0xff] %vm867_vm7, %v6455_v45  ;;  %897 = vst.msk [vmem:[#allocation2 + $0xe8] sm:$0xff] %vm867_vm7, %v6456_v44  ;;  %v6742_v12 = vpack.i.bf16 %v6219_v60, %v6218_v59  ;;  %6738 = vrot.lane.b32.xlu1 %v6737_v63, %s7093_s30  ;;  %v2708_v50 = vunpack.c.h.bf16 %v6001_v42  ;;  %v2691_v51 = vunpack.c.l.bf16 %v5985_v23  ;;  %v2692_v18 = vunpack.c.h.bf16 %v5985_v23  ;;  %v6045_v23 = vld [vmem:[%s7168_s25 + $0xa0] sm:$0xf] }
  0xfb   : > { %6733 = vrot.lane.b32.xlu0 %v6732_v0, %s7093_s30  ;;  %1306 = vst.msk [vmem:[#allocation2 + $0x10] sm:$0xff] %vm1303_vm8, %v6470_v6  ;;  %1307 = vst.msk [vmem:[#allocation2 + $0x18] sm:$0xff] %vm1303_vm8, %v6471_v4  ;;  %v6481_v5 = vunpack.i.h.bf16 %v7808_v19  ;;  %v6480_v9 = vunpack.i.l.bf16 %v7808_v19  ;;  %v6476_v36 = vunpack.i.h.bf16 %v7820_v2  ;;  %v6475_v40 = vunpack.i.l.bf16 %v7820_v2  ;;  %v6019_v2 = vld [vmem:[%s7168_s25 + $0x38] sm:$0x1] }
  0xfc   : > { %1304 = vst.msk [vmem:[#allocation2] sm:$0xff] %vm1303_vm8, %v6465_v14  ;;  %1305 = vst.msk [vmem:[#allocation2 + $0x8] sm:$0xff] %vm1303_vm8, %v6466_v49  ;;  %v3167_v41 = vshrl.u32 %v6041_v34, 16  ;;  %v7940_v54 = vpop.permute.xlu1 %6528  ;;  %v6757_v35 = vpack.i.bf16 %v2708_v50, %v2707_v17  ;;  %v6752_v24 = vpack.i.bf16 %v2692_v18, %v2691_v51  ;;  %v3170_v47 = vshll.u32 %v6041_v34, 16  ;;  %v6046_v50 = vld [vmem:[%s7168_s25 + $0xa4] sm:$0x1] }
  0xfd   : > { %1311 = vst.msk [vmem:[#allocation2 + $0x38] sm:$0xff] %vm1303_vm8, %v6481_v5  ;;  %v3176_v61 = vshll.u32 %v6042_v22, 16  ;;  %1310 = vst.msk [vmem:[#allocation2 + $0x30] sm:$0xff] %vm1303_vm8, %v6480_v9  ;;  %v3180_v57 = vshrl.u32 %v6042_v22, 16  ;;  %v3186_v7 = vshll.u32 %v6043_v20, 16  ;;  %v2975_v8 = vshrl.u32 %v6017_v13, 16 }
  0xfe   : > { %1308 = vst.msk [vmem:[#allocation2 + $0x20] sm:$0xff] %vm1303_vm8, %v6475_v40  ;;  %1309 = vst.msk [vmem:[#allocation2 + $0x28] sm:$0xff] %vm1303_vm8, %v6476_v36  ;;  %v3169_v19 = vrot.slane %v3167_v41, 4  ;;  %v7947_v25 = vpop.permute.xlu0 %6523  ;;  %6748 = vrot.lane.b32.xlu1 %v6747_v58, %s7094_s3  ;;  %v3172_v28 = vrot.slane %v3170_v47, 5  ;;  %v2978_v30 = vshll.u32 %v6017_v13, 16  ;;  %v2984_v32 = vshll.u32 %v6018_v1, 16 }
  0xff   : > { %6743 = vrot.lane.b32.xlu0 %v6742_v12, %s7094_s3  ;;  %v3178_v15 = vrot.slane %v3176_v61, 5  ;;  %v3182_v10 = vrot.slane %v3180_v57, 4  ;;  %v3188_v55 = vrot.slane %v3186_v7, 5  ;;  %v2977_v29 = vrot.slane %v2975_v8, 4  ;;  %v6020_v36 = vld [vmem:[%s7168_s25 + $0x3c] sm:$0xf] }
 0x100   : > { %v2988_v39 = vshrl.u32 %v6018_v1, 16  ;;  %v3173_v43 = vor.u32 %v3172_v28, %v3169_v19  ;;  %v2980_v37 = vrot.slane %v2978_v30, 5  ;;  %v2986_v44 = vrot.slane %v2984_v32, 5  ;;  %v6021_v47 = vld [vmem:[%s7168_s25 + $0x40] sm:$0xf] }
 0x101   : > { %v2994_v45 = vshll.u32 %v6019_v2, 16  ;;  %v7952_v52 = vpop.permute.xlu1 %6538  ;;  %v3183_v42 = vor.u32 %v3182_v10, %v3178_v15  ;;  %v6491_v59 = vunpack.i.h.bf16 %v7830_v33  ;;  %v6490_v60 = vunpack.i.l.bf16 %v7830_v33 }
 0x102   : > { %v2990_v58 = vrot.slane %v2988_v39, 4  ;;  %v7957_v63 = vpop.permute.xlu0 %6533  ;;  %6758 = vrot.lane.b32.xlu1 %v6757_v35, %s7094_s3  ;;  %v3174_v0 = vrot.slane %v3173_v43, 4  ;;  %v2981_v4 = vor.u32 %v2980_v37, %v2977_v29  ;;  %v6486_v34 = vunpack.i.h.bf16 %v7842_v38 }
 0x103   : > { %6753 = vrot.lane.b32.xlu0 %v6752_v24, %s7094_s3  ;;  %v2996_v6 = vrot.slane %v2994_v45, 5  ;;  %v3184_v12 = vrot.slane %v3183_v42, 4  ;;  %1314 = vst.msk [vmem:[#allocation2 + $0x50] sm:$0xff] %vm1303_vm8, %v6490_v60  ;;  %1315 = vst.msk [vmem:[#allocation2 + $0x58] sm:$0xff] %vm1303_vm8, %v6491_v59  ;;  %v6485_v33 = vunpack.i.l.bf16 %v7842_v38  ;;  %v3191_v14 = vshrl.u32 %v6044_v46, 16 }
 0x104   : > { %v2991_v49 = vor.u32 %v2990_v58, %v2986_v44  ;;  %v3179_v17 = vsel %vm7180_vm2, %v3174_v0, %v3178_v15  ;;  %v2982_v22 = vrot.slane %v2981_v4, 4  ;;  %1313 = vst.msk [vmem:[#allocation2 + $0x48] sm:$0xff] %vm1303_vm8, %v6486_v34  ;;  %v3194_v51 = vshll.u32 %v6044_v46, 16  ;;  %v6022_v15 = vld [vmem:[%s7168_s25 + $0x44] sm:$0x1] }
 0x105   : > { %v3200_v18 = vshll.u32 %v6045_v23, 16  ;;  %v7969_v5 = vpop.permute.xlu1 %6548  ;;  %v3189_v20 = vsel %vm7180_vm2, %v3184_v12, %v3188_v55  ;;  %v3362_v13 = vunpack.c.l.bf16 %v3179_v17  ;;  %1312 = vst.msk [vmem:[#allocation2 + $0x40] sm:$0xff] %vm1303_vm8, %v6485_v33  ;;  %v3193_v38 = vrot.slane %v3191_v14, 4  ;;  %v6090_v12 = vld [vmem:[%s7168_s25 + $0x94] sm:$0xf] }
 0x106   : > { %v2992_v9 = vrot.slane %v2991_v49, 4  ;;  %v7975_v40 = vpop.permute.xlu0 %6543  ;;  %v3363_v41 = vunpack.c.l.bf16 %v3189_v20  ;;  %v2987_v1 = vsel %vm7180_vm2, %v2982_v22, %v2986_v44  ;;  %v3196_v35 = vrot.slane %v3194_v51, 5  ;;  %v6091_v49 = vld [vmem:[%s7168_s25 + $0x98] sm:$0x1]  ;;  %v6065_v51 = vld [vmem:[%s7168_s25 + $0x30] sm:$0xe] }
 0x107   : > { %v3202_v24 = vrot.slane %v3200_v18, 5  ;;  %v3346_v19 = vunpack.c.l.bf16 %v2987_v1  ;;  %v3204_v57 = vshrl.u32 %v6045_v23, 16  ;;  %v3210_v7 = vshll.u32 %v6046_v50, 16  ;;  %v6089_v23 = vld [vmem:[%s7168_s25 + $0x90] sm:$0xe] }
 0x108   : > { %v2997_v61 = vsel %vm7180_vm2, %v2992_v9, %v2996_v6  ;;  %v6767_v2 = vpack.i.bf16 %v3363_v41, %v3362_v13  ;;  %v3197_v28 = vor.u32 %v3196_v35, %v3193_v38  ;;  %v2999_v30 = vshrl.u32 %v6020_v36, 16  ;;  %v6066_v18 = vld [vmem:[%s7168_s25 + $0x34] sm:$0xf]  ;;  %v6067_v38 = vld [vmem:[%s7168_s25 + $0x38] sm:$0x1] }
 0x109   : > { %v3347_v8 = vunpack.c.l.bf16 %v2997_v61  ;;  %v7983_v32 = vpop.permute.xlu1 %6558  ;;  %v3206_v10 = vrot.slane %v3204_v57, 4  ;;  %v3212_v55 = vrot.slane %v3210_v7, 5  ;;  %v3002_v29 = vshll.u32 %v6020_v36, 16 }
 0x10a   : > { %v3008_v39 = vshll.u32 %v6021_v47, 16  ;;  %v7985_v43 = vpop.permute.xlu0 %6553  ;;  %6768 = vrot.lane.b32.xlu1 %v6767_v2, %s7095_s4  ;;  %v3198_v44 = vrot.slane %v3197_v28, 4  ;;  %v3001_v45 = vrot.slane %v2999_v30, 4  ;;  %v3012_v46 = vshrl.u32 %v6021_v47, 16 }
 0x10b   : > { %v6762_v37 = vpack.i.bf16 %v3347_v8, %v3346_v19  ;;  %v3207_v42 = vor.u32 %v3206_v10, %v3202_v24  ;;  %v3004_v58 = vrot.slane %v3002_v29, 5  ;;  %v3018_v60 = vshll.u32 %v6022_v15, 16 }
 0x10c   : > { %v3010_v59 = vrot.slane %v3008_v39, 5  ;;  %v3203_v0 = vsel %vm7180_vm2, %v3198_v44, %v3202_v24  ;;  %v3014_v4 = vrot.slane %v3012_v46, 4  ;;  %v6501_v6 = vunpack.i.h.bf16 %v7858_v48  ;;  %v7022_v39 = vld [vmem:[%s9298_s1] sm:$0xff]  }
 0x10d   : > { %6763 = vrot.lane.b32.xlu0 %v6762_v37, %s7095_s4  ;;  %v6500_v34 = vunpack.i.l.bf16 %v7858_v48  ;;  %v7996_v33 = vpop.permute.xlu1 %6568  ;;  %v3208_v14 = vrot.slane %v3207_v42, 4  ;;  %v3364_v17 = vunpack.c.l.bf16 %v3203_v0  ;;  %v3005_v22 = vor.u32 %v3004_v58, %v3001_v45  ;;  %v6092_v42 = vld [vmem:[%s7168_s25 + $0x9c] sm:$0xe]  ;;  %v6094_v58 = vld [vmem:[%s7168_s25 + $0xa4] sm:$0x1]  ;;  %6286 = vmatprep.subr.bf16.mxu0 %v7022_v39 }
 0x10e   : > { %v3020_v50 = vrot.slane %v3018_v60, 5  ;;  %v3015_v20 = vor.u32 %v3014_v4, %v3010_v59  ;;  %1319 = vst.msk [vmem:[#allocation2 + $0x78] sm:$0xff] %vm1303_vm8, %v6501_v6  ;;  %v6496_v13 = vunpack.i.h.bf16 %v7867_v21  ;;  %v6495_v48 = vunpack.i.l.bf16 %v7867_v21  ;;  %v8007_v24 = vpop.permute.xlu0 %6563  ;;  %v6068_v4 = vld [vmem:[%s7168_s25 + $0x3c] sm:$0xe]  ;;  %v6069_v6 = vld [vmem:[%s7168_s25 + $0x40] sm:$0xf]  ;;  %6324 = vmatprep.subr.bf16.mxu1 %v7022_v39  ;;  %6287 = vmatpush3.bf16.msra.mxu0 %v7022_v39 }
 0x10f   : > { %1318 = vst.msk [vmem:[#allocation2 + $0x70] sm:$0xff] %vm1303_vm8, %v6500_v34  ;;  %v6117_v9 = vrot.slane %v6089_v23, 9  ;;  %v3213_v36 = vsel %vm7180_vm2, %v3208_v14, %v3212_v55  ;;  %v3006_v41 = vrot.slane %v3005_v22, 4  ;;  %v3703_v1 = vrot.slane %v6090_v12, 5  ;;  %v6093_v55 = vld [vmem:[%s7168_s25 + $0xa0] sm:$0xf]  ;;  %6327 = vmatpush3.bf16.msra.mxu1 %v7022_v39 }
 0x110   : > { %v3706_v35 = vrot.slane %v6091_v49, 5  ;;  %v3365_v47 = vunpack.c.l.bf16 %v3213_v36  ;;  %v3016_v61 = vrot.slane %v3015_v20, 4  ;;  %1316 = vst.msk [vmem:[#allocation2 + $0x60] sm:$0xff] %vm1303_vm8, %v6495_v48  ;;  %1317 = vst.msk [vmem:[#allocation2 + $0x68] sm:$0xff] %vm1303_vm8, %v6496_v13  ;;  %v6109_v19 = vrot.slane %v6065_v51, 9  ;;  %v7023_v39 = vld [vmem:[%s9298_s1 + $0x8] sm:$0xff]  }
 0x111   : > { %v3647_v57 = vrot.slane %v6066_v18, 5  ;;  %v3011_v21 = vsel %vm7180_vm2, %v3006_v41, %v3010_v59  ;;  %v3704_v7 = vsel %vm7298_vm5, %v6117_v9, %v3703_v1  ;;  %v3705_v2 = vrot.slane %v3703_v1, 4  ;;  %v8018_v29 = vpop.permute.xlu1 %6578  ;;  %v6070_v34 = vld [vmem:[%s7168_s25 + $0x44] sm:$0x1]  ;;  %v5859_v1 = vld [vmem:[%s7168_s25 + $0x9c] sm:$0xff]   ;;  %6288 = vmatprep.subr.bf16.mxu0 %v7023_v39  ;;  %6325 = vmatprep.subr.bf16.mxu1 %v7023_v39 }
 0x112   : > { %v3650_v8 = vrot.slane %v6067_v38, 5  ;;  %v6777_v28 = vpack.i.bf16 %v3365_v47, %v3364_v17  ;;  %v3021_v15 = vsel %vm7180_vm2, %v3016_v61, %v3020_v50  ;;  %v3348_v30 = vunpack.c.l.bf16 %v3011_v21  ;;  %v8039_v22 = vpop.permute.xlu0 %6573  ;;  %6289 = vmatpush3.bf16.msra.mxu0 %v7023_v39 }
 0x113   : > { %v3795_v10 = vunpack.c.l.bf16 %v3704_v7  ;;  %v3349_v37 = vunpack.c.l.bf16 %v3021_v15  ;;  %v3707_v44 = vsel %vm7298_vm5, %v3705_v2, %v3706_v35  ;;  %v3648_v45 = vsel %vm7298_vm5, %v6109_v19, %v3647_v57  ;;  %6328 = vmatpush3.bf16.msra.mxu1 %v7023_v39 }
 0x114   : > { %v3649_v46 = vrot.slane %v3647_v57, 4  ;;  %6778 = vrot.lane.b32.xlu1 %v6777_v28, %s7095_s4  ;;  %v3796_v59 = vunpack.c.l.bf16 %v3707_v44  ;;  %v3779_v60 = vunpack.c.l.bf16 %v3648_v45  ;;  %v6511_v23 = vunpack.i.h.bf16 %v7881_v3  ;;  %v5903_v28 = vld [vmem:[%s7168_s25 + $0x9c] sm:$0xf] }
 0x115   : > { %v6510_v0 = vunpack.i.l.bf16 %v7881_v3  ;;  %v6772_v12 = vpack.i.bf16 %v3349_v37, %v3348_v30  ;;  %v6506_v14 = vunpack.i.h.bf16 %v7893_v16  ;;  %v6505_v17 = vunpack.i.l.bf16 %v7893_v16  ;;  %v8051_v35 = vpop.permute.xlu1 %6588 }
 0x116   : > { %v3651_v49 = vsel %vm7298_vm5, %v3649_v46, %v3650_v8  ;;  %v6787_v50 = vpack.i.bf16 %v3796_v59, %v3795_v10  ;;  %1323 = vst.msk [vmem:[#allocation2 + $0x98] sm:$0xff] %vm1303_vm8, %v6511_v23  ;;  %v6118_v3 = vrot.slane %v6092_v42, 9  ;;  %v3710_v18 = vrot.slane %v6093_v55, 5  ;;  %v8073_v55 = vpop.permute.xlu0 %6583 }
 0x117   : > { %v3780_v51 = vunpack.c.l.bf16 %v3651_v49  ;;  %1322 = vst.msk [vmem:[#allocation2 + $0x90] sm:$0xff] %vm1303_vm8, %v6510_v0  ;;  %6773 = vrot.lane.b32.xlu0 %v6772_v12, %s7095_s4  ;;  %1320 = vst.msk [vmem:[#allocation2 + $0x80] sm:$0xff] %vm1303_vm8, %v6505_v17  ;;  %v3713_v16 = vrot.slane %v6094_v58, 5  ;;  %v6110_v20 = vrot.slane %v6068_v4, 9  ;;  %v3654_v13 = vrot.slane %v6069_v6, 5 }
 0x118   : > { %1321 = vst.msk [vmem:[#allocation2 + $0x88] sm:$0xff] %vm1303_vm8, %v6506_v14  ;;  %v3657_v48 = vrot.slane %v6070_v34, 5  ;;  %6788 = vrot.lane.b32.xlu1 %v6787_v50, %s7096_s5  ;;  %v3711_v38 = vsel %vm7298_vm5, %v6118_v3, %v3710_v18  ;;  %v3712_v36 = vrot.slane %v3710_v18, 4  ;;  %v6521_v41 = vunpack.i.h.bf16 %v7909_v62  ;;  %v5881_v49 = vld [vmem:[%s7168_s25 + $0x44] sm:$0x1] }
 0x119   : > { %v6782_v9 = vpack.i.bf16 %v3780_v51, %v3779_v60  ;;  %v3797_v47 = vunpack.c.l.bf16 %v3711_v38  ;;  %v3655_v61 = vsel %vm7298_vm5, %v6110_v20, %v3654_v13  ;;  %v3656_v19 = vrot.slane %v3654_v13, 4  ;;  %v5880_v60 = vld [vmem:[%s7168_s25 + $0x40] sm:$0xf]  ;;  %v8089_v6 = vpop.permute.xlu1 %6598 }
 0x11a   : > { %v6520_v57 = vunpack.i.l.bf16 %v7909_v62  ;;  %v3714_v21 = vsel %vm7298_vm5, %v3712_v36, %v3713_v16  ;;  %v3781_v7 = vunpack.c.l.bf16 %v3655_v61  ;;  %1327 = vst.msk [vmem:[#allocation2 + $0xb8] sm:$0xff] %vm1303_vm8, %v6521_v41  ;;  %v6516_v2 = vunpack.i.h.bf16 %v7920_v11 }
 0x11b   : > { %v6515_v8 = vunpack.i.l.bf16 %v7920_v11  ;;  %6783 = vrot.lane.b32.xlu0 %v6782_v9, %s7096_s5  ;;  %v3798_v15 = vunpack.c.l.bf16 %v3714_v21  ;;  %v3658_v30 = vsel %vm7298_vm5, %v3656_v19, %v3657_v48  ;;  %v8070_v62 = vpack.i.bf16 %v6179_v56, %v6178_v53  ;;  %v5904_v11 = vld [vmem:[%s7168_s25 + $0xa0] sm:$0xf]  ;;  %v5905_v53 = vld [vmem:[%s7168_s25 + $0xa4] sm:$0x1]  ;;  %v5879_v56 = vld [vmem:[%s7168_s25 + $0x3c] sm:$0xf]  ;;  %v8096_v48 = vpop.permute.xlu0 %6593 }
 0x11c   : > { %1326 = vst.msk [vmem:[#allocation2 + $0xb0] sm:$0xff] %vm1303_vm8, %v6520_v57  ;;  %v1393_v10 = vunpack.c.l.bf16 %v5859_v1  ;;  %v3782_v37 = vunpack.c.l.bf16 %v3658_v30  ;;  %1325 = vst.msk [vmem:[#allocation2 + $0xa8] sm:$0xff] %vm1303_vm8, %v6516_v2  ;;  %v1394_v44 = vunpack.c.h.bf16 %v5859_v1  ;;  %v6531_v45 = vunpack.i.h.bf16 %v7940_v54  ;;  %v5906_v1 = vld [vmem:[%s7168_s25 + $0xa8] sm:$0xf]  ;;  %v5907_v21 = vld [vmem:[%s7168_s25 + $0xac] sm:$0xf] }
 0x11d   : > { %1324 = vst.msk [vmem:[#allocation2 + $0xa0] sm:$0xff] %vm1303_vm8, %v6515_v8  ;;  %v6530_v31 = vunpack.i.l.bf16 %v7940_v54  ;;  %v6797_v46 = vpack.i.bf16 %v3798_v15, %v3797_v47  ;;  %v6526_v42 = vunpack.i.h.bf16 %v7947_v25  ;;  %v6525_v58 = vunpack.i.l.bf16 %v7947_v25  ;;  %v8106_v15 = vpop.permute.xlu1 %6608 }
 0x11e   : > { %v1899_v59 = vshrl.u32 %v5903_v28, 16  ;;  %v6792_v23 = vpack.i.bf16 %v3782_v37, %v3781_v7  ;;  %v6802_v0 = vpack.i.bf16 %v1394_v44, %v1393_v10  ;;  %1331 = vst.msk [vmem:[#allocation2 + $0xd8] sm:$0xff] %vm1303_vm8, %v6531_v45  ;;  %v1902_v4 = vshll.u32 %v5903_v28, 16  ;;  %v5908_v44 = vld [vmem:[%s7168_s25 + $0xb0] sm:$0x1] }
 0x11f   : > { %1330 = vst.msk [vmem:[#allocation2 + $0xd0] sm:$0xff] %vm1303_vm8, %v6530_v31  ;;  %v1908_v54 = vshll.u32 %v5904_v11, 16  ;;  %6798 = vrot.lane.b32.xlu1 %v6797_v46, %s7096_s5  ;;  %1328 = vst.msk [vmem:[#allocation2 + $0xc0] sm:$0xff] %vm1303_vm8, %v6525_v58  ;;  %v1912_v34 = vshrl.u32 %v5904_v11, 16  ;;  %v1918_v12 = vshll.u32 %v5905_v53, 16  ;;  %v1707_v14 = vshrl.u32 %v5879_v56, 16  ;;  %v8119_v58 = vpop.permute.xlu0 %6603 }
 0x120   : > { %1329 = vst.msk [vmem:[#allocation2 + $0xc8] sm:$0xff] %vm1303_vm8, %v6526_v42  ;;  %v1901_v25 = vrot.slane %v1899_v59, 4  ;;  %6793 = vrot.lane.b32.xlu0 %v6792_v23, %s7096_s5  ;;  %v1904_v17 = vrot.slane %v1902_v4, 5  ;;  %v1710_v51 = vshll.u32 %v5879_v56, 16  ;;  %v1716_v3 = vshll.u32 %v5880_v60, 16 }
 0x121   : > { %v1910_v50 = vrot.slane %v1908_v54, 5  ;;  %v1914_v18 = vrot.slane %v1912_v34, 4  ;;  %v1920_v16 = vrot.slane %v1918_v12, 5  ;;  %v1709_v20 = vrot.slane %v1707_v14, 4  ;;  %v5882_v42 = vld [vmem:[%s7168_s25 + $0x48] sm:$0xf] }
 0x122   : > { %v1720_v13 = vshrl.u32 %v5880_v60, 16  ;;  %v1905_v9 = vor.u32 %v1904_v17, %v1901_v25  ;;  %v1712_v38 = vrot.slane %v1710_v51, 5  ;;  %v1718_v36 = vrot.slane %v1716_v3, 5  ;;  %v5883_v4 = vld [vmem:[%s7168_s25 + $0x4c] sm:$0xf]  ;;  %v8127_v3 = vpop.permute.xlu1 %6618 }
 0x123   : > { %v1726_v41 = vshll.u32 %v5881_v49, 16  ;;  %6808 = vrot.lane.b32.xlu1 %v8070_v62, %s7091_s28  ;;  %v1915_v47 = vor.u32 %v1914_v18, %v1910_v50  ;;  %v6541_v19 = vunpack.i.h.bf16 %v7952_v52  ;;  %v6540_v57 = vunpack.i.l.bf16 %v7952_v52 }
 0x124   : > { %v1722_v61 = vrot.slane %v1720_v13, 4  ;;  %6803 = vrot.lane.b32.xlu0 %v6802_v0, %s7091_s28  ;;  %v1906_v7 = vrot.slane %v1905_v9, 4  ;;  %v1713_v2 = vor.u32 %v1712_v38, %v1709_v20  ;;  %v6536_v28 = vunpack.i.h.bf16 %v7957_v63 }
 0x125   : > { %v1728_v8 = vrot.slane %v1726_v41, 5  ;;  %v1916_v30 = vrot.slane %v1915_v47, 4  ;;  %1334 = vst.msk [vmem:[#allocation2 + $0xf0] sm:$0xff] %vm1303_vm8, %v6540_v57  ;;  %1335 = vst.msk [vmem:[#allocation2 + $0xf8] sm:$0xff] %vm1303_vm8, %v6541_v19  ;;  %v6535_v52 = vunpack.i.l.bf16 %v7957_v63  ;;  %v1923_v11 = vshrl.u32 %v5906_v1, 16  ;;  %v8130_v57 = vpop.permute.xlu0 %6613 }
 0x126   : > { %v1723_v10 = vor.u32 %v1722_v61, %v1718_v36  ;;  %v1911_v39 = vsel %vm7180_vm2, %v1906_v7, %v1910_v50  ;;  %v1714_v37 = vrot.slane %v1713_v2, 4  ;;  %1333 = vst.msk [vmem:[#allocation2 + $0xe8] sm:$0xff] %vm1303_vm8, %v6536_v28  ;;  %v1926_v45 = vshll.u32 %v5906_v1, 16  ;;  %v5884_v50 = vld [vmem:[%s7168_s25 + $0x50] sm:$0x1] }
 0x127   : > { %v1932_v31 = vshll.u32 %v5907_v21, 16  ;;  %v1921_v53 = vsel %vm7180_vm2, %v1916_v30, %v1920_v16  ;;  %v2050_v56 = vunpack.c.l.bf16 %v1911_v39  ;;  %1332 = vst.msk [vmem:[#allocation2 + $0xe0] sm:$0xff] %vm1303_vm8, %v6535_v52  ;;  %v1925_v63 = vrot.slane %v1923_v11, 4  ;;  %v5952_v28 = vld [vmem:[%s7168_s25 + $0xa0] sm:$0xf] }
 0x128   : > { %v1724_v46 = vrot.slane %v1723_v10, 4  ;;  %v2051_v59 = vunpack.c.l.bf16 %v1921_v53  ;;  %v1719_v60 = vsel %vm7180_vm2, %v1714_v37, %v1718_v36  ;;  %v1928_v23 = vrot.slane %v1926_v45, 5  ;;  %v5953_v39 = vld [vmem:[%s7168_s25 + $0xa4] sm:$0x1]  ;;  %v5927_v37 = vld [vmem:[%s7168_s25 + $0x3c] sm:$0xe] }
 0x129   : > { %v1934_v0 = vrot.slane %v1932_v31, 5  ;;  %v2034_v25 = vunpack.c.l.bf16 %v1719_v60  ;;  %v1936_v34 = vshrl.u32 %v5907_v21, 16  ;;  %v1942_v12 = vshll.u32 %v5908_v44, 16 }
 0x12a   : > { %v1729_v54 = vsel %vm7180_vm2, %v1724_v46, %v1728_v8  ;;  %v6817_v49 = vpack.i.bf16 %v2051_v59, %v2050_v56  ;;  %v1929_v17 = vor.u32 %v1928_v23, %v1925_v63  ;;  %v1731_v51 = vshrl.u32 %v5882_v42, 16  ;;  %v5951_v8 = vld [vmem:[%s7168_s25 + $0x9c] sm:$0xe]  ;;  %v5928_v56 = vld [vmem:[%s7168_s25 + $0x40] sm:$0xf]  ;;  %v8145_v46 = vpop.permute.xlu1 %6628 }
 0x12b   : > { %v2035_v14 = vunpack.c.l.bf16 %v1729_v54  ;;  %v1938_v18 = vrot.slane %v1936_v34, 4  ;;  %v1944_v16 = vrot.slane %v1942_v12, 5  ;;  %v1734_v20 = vshll.u32 %v5882_v42, 16  ;;  %v5929_v34 = vld [vmem:[%s7168_s25 + $0x44] sm:$0x1] }
 0x12c   : > { %v1740_v13 = vshll.u32 %v5883_v4, 16  ;;  %6818 = vrot.lane.b32.xlu1 %v6817_v49, %s7092_s29  ;;  %v1930_v38 = vrot.slane %v1929_v17, 4  ;;  %v1733_v36 = vrot.slane %v1731_v51, 4  ;;  %v1744_v41 = vshrl.u32 %v5883_v4, 16  ;;  %v8157_v49 = vpop.permute.xlu0 %6623 }
 0x12d   : > { %v6812_v9 = vpack.i.bf16 %v2035_v14, %v2034_v25  ;;  %v1939_v1 = vor.u32 %v1938_v18, %v1934_v0  ;;  %v1736_v47 = vrot.slane %v1734_v20, 5  ;;  %v1750_v19 = vshll.u32 %v5884_v50, 16  ;;  %v5955_v18 = vld [vmem:[%s7168_s25 + $0xac] sm:$0xf] }
 0x12e   : > { %v1742_v61 = vrot.slane %v1740_v13, 5  ;;  %v1935_v21 = vsel %vm7180_vm2, %v1930_v38, %v1934_v0  ;;  %v1746_v7 = vrot.slane %v1744_v41, 4  ;;  %v6551_v2 = vunpack.i.h.bf16 %v7969_v5  ;;  %v5954_v38 = vld [vmem:[%s7168_s25 + $0xa8] sm:$0xe] }
 0x12f   : > { %6813 = vrot.lane.b32.xlu0 %v6812_v9, %s7092_s29  ;;  %v1940_v30 = vrot.slane %v1939_v1, 4  ;;  %v2052_v10 = vunpack.c.l.bf16 %v1935_v21  ;;  %v1737_v52 = vor.u32 %v1736_v47, %v1733_v36  ;;  %v1752_v11 = vrot.slane %v1750_v19, 5  ;;  %v5931_v36 = vld [vmem:[%s7168_s25 + $0x4c] sm:$0xf]  ;;  %v5956_v19 = vld [vmem:[%s7168_s25 + $0xb0] sm:$0x1] }
 0x130   : > { %v1747_v44 = vor.u32 %v1746_v7, %v1742_v61  ;;  %v6550_v45 = vunpack.i.l.bf16 %v7969_v5  ;;  %1533 = vst.msk [vmem:[#allocation2 + $0x18] sm:$0xff] %vm1529_vm9, %v6551_v2  ;;  %v6546_v31 = vunpack.i.h.bf16 %v7975_v40  ;;  %v6545_v53 = vunpack.i.l.bf16 %v7975_v40  ;;  %v5930_v21 = vld [vmem:[%s7168_s25 + $0x48] sm:$0xe]  ;;  %v8172_v7 = vpop.permute.xlu1 %6638 }
 0x131   : > { %v1945_v63 = vsel %vm7180_vm2, %v1940_v30, %v1944_v16  ;;  %v1738_v42 = vrot.slane %v1737_v52, 4  ;;  %v5975_v59 = vrot.slane %v5951_v8, 9  ;;  %v2401_v60 = vrot.slane %v5952_v28, 5 }
 0x132   : > { %v2053_v23 = vunpack.c.l.bf16 %v1945_v63  ;;  %v1748_v0 = vrot.slane %v1747_v44, 4  ;;  %1532 = vst.msk [vmem:[#allocation2 + $0x10] sm:$0xff] %vm1529_vm9, %v6550_v45  ;;  %1530 = vst.msk [vmem:[#allocation2] sm:$0xff] %vm1529_vm9, %v6545_v53  ;;  %v2404_v5 = vrot.slane %v5953_v39, 5  ;;  %v5967_v40 = vrot.slane %v5927_v37, 9 }
 0x133   : > { %1531 = vst.msk [vmem:[#allocation2 + $0x8] sm:$0xff] %vm1529_vm9, %v6546_v31  ;;  %v1743_v4 = vsel %vm7180_vm2, %v1738_v42, %v1742_v61  ;;  %v2402_v54 = vsel %vm7298_vm5, %v5975_v59, %v2401_v60  ;;  %v2403_v25 = vrot.slane %v2401_v60, 4  ;;  %v2345_v12 = vrot.slane %v5928_v56, 5  ;;  %v8185_v31 = vpop.permute.xlu0 %6633 }
 0x134   : > { %v6827_v14 = vpack.i.bf16 %v2053_v23, %v2052_v10  ;;  %v1753_v17 = vsel %vm7180_vm2, %v1748_v0, %v1752_v11  ;;  %v2036_v50 = vunpack.c.l.bf16 %v1743_v4  ;;  %v2483_v51 = vunpack.c.l.bf16 %v2402_v54  ;;  %v5932_v10 = vld [vmem:[%s7168_s25 + $0x50] sm:$0x1] }
 0x135   : > { %v2037_v16 = vunpack.c.l.bf16 %v1753_v17  ;;  %v2405_v20 = vsel %vm7298_vm5, %v2403_v25, %v2404_v5  ;;  %v2346_v13 = vsel %vm7298_vm5, %v5967_v40, %v2345_v12  ;;  %v2347_v9 = vrot.slane %v2345_v12, 4  ;;  %v6261_v5 = vld [vmem:[%s7168_s25 + $0x48] sm:$0xff]  }
 0x136   : > { %6828 = vrot.lane.b32.xlu1 %v6827_v14, %s7092_s29  ;;  %v2484_v41 = vunpack.c.l.bf16 %v2405_v20  ;;  %v2348_v1 = vrot.slane %v5929_v34, 5  ;;  %v2467_v47 = vunpack.c.l.bf16 %v2346_v13  ;;  %v6561_v61 = vunpack.i.h.bf16 %v7983_v32  ;;  %v8199_v34 = vpop.permute.xlu1 %6648  ;;  %v5989_v20 = vld [vmem:[%s7168_s25 + $0x54] sm:$0xff]  }
 0x137   : > { %v6822_v2 = vpack.i.bf16 %v2037_v16, %v2036_v50  ;;  %v6560_v8 = vunpack.i.l.bf16 %v7983_v32  ;;  %v6556_v28 = vunpack.i.h.bf16 %v7985_v43  ;;  %v6555_v30 = vunpack.i.l.bf16 %v7985_v43  ;;  %v6005_v50 = vld [vmem:[%s7168_s25 + $0xb4] sm:$0xff]  }
 0x138   : > { %v6837_v52 = vpack.i.bf16 %v2484_v41, %v2483_v51  ;;  %v2349_v11 = vsel %vm7298_vm5, %v2347_v9, %v2348_v1  ;;  %1537 = vst.msk [vmem:[#allocation2 + $0x38] sm:$0xff] %vm1529_vm9, %v6561_v61  ;;  %v5976_v39 = vrot.slane %v5954_v38, 9  ;;  %v2408_v37 = vrot.slane %v5955_v18, 5  ;;  %v8215_v41 = vpop.permute.xlu0 %6643 }
 0x139   : > { %6823 = vrot.lane.b32.xlu0 %v6822_v2, %s7092_s29  ;;  %v2468_v44 = vunpack.c.l.bf16 %v2349_v11  ;;  %1536 = vst.msk [vmem:[#allocation2 + $0x30] sm:$0xff] %vm1529_vm9, %v6560_v8  ;;  %1534 = vst.msk [vmem:[#allocation2 + $0x20] sm:$0xff] %vm1529_vm9, %v6555_v30  ;;  %v2411_v32 = vrot.slane %v5956_v19, 5  ;;  %v5968_v43 = vrot.slane %v5930_v21, 9  ;;  %v2352_v45 = vrot.slane %v5931_v36, 5 }
 0x13a   : > { %1535 = vst.msk [vmem:[#allocation2 + $0x28] sm:$0xff] %vm1529_vm9, %v6556_v28  ;;  %6838 = vrot.lane.b32.xlu1 %v6837_v52, %s7093_s30  ;;  %v2409_v53 = vsel %vm7298_vm5, %v5976_v39, %v2408_v37  ;;  %v2410_v56 = vrot.slane %v2408_v37, 4  ;;  %v2355_v63 = vrot.slane %v5932_v10, 5  ;;  %v6571_v42 = vunpack.i.h.bf16 %v7996_v33  ;;  %v6047_v36 = vld [vmem:[%s7168_s25 + $0xa8] sm:$0xf] }
 0x13b   : > { %v6832_v59 = vpack.i.bf16 %v2468_v44, %v2467_v47  ;;  %v2485_v60 = vunpack.c.l.bf16 %v2409_v53  ;;  %v2353_v23 = vsel %vm7298_vm5, %v5968_v43, %v2352_v45  ;;  %v2354_v0 = vrot.slane %v2352_v45, 4  ;;  %v6048_v21 = vld [vmem:[%s7168_s25 + $0xac] sm:$0xf]  ;;  %v6049_v28 = vld [vmem:[%s7168_s25 + $0xb0] sm:$0x1]  ;;  %v8231_v44 = vpop.permute.xlu1 %6658 }
 0x13c   : > { %v2412_v40 = vsel %vm7298_vm5, %v2410_v56, %v2411_v32  ;;  %v2469_v4 = vunpack.c.l.bf16 %v2353_v23  ;;  %v6570_v54 = vunpack.i.l.bf16 %v7996_v33  ;;  %1541 = vst.msk [vmem:[#allocation2 + $0x58] sm:$0xff] %vm1529_vm9, %v6571_v42  ;;  %v6566_v25 = vunpack.i.h.bf16 %v8007_v24  ;;  %v6023_v30 = vld [vmem:[%s7168_s25 + $0x48] sm:$0xf]  ;;  %v6024_v37 = vld [vmem:[%s7168_s25 + $0x4c] sm:$0xf] }
 0x13d   : > { %6833 = vrot.lane.b32.xlu0 %v6832_v59, %s7093_s30  ;;  %v2486_v12 = vunpack.c.l.bf16 %v2412_v40  ;;  %v2356_v14 = vsel %vm7298_vm5, %v2354_v0, %v2355_v63  ;;  %v6565_v17 = vunpack.i.l.bf16 %v8007_v24  ;;  %v6222_v33 = vunpack.c.l.bf16 %v6261_v5  ;;  %v6025_v63 = vld [vmem:[%s7168_s25 + $0x50] sm:$0x1] }
 0x13e   : > { %v2470_v51 = vunpack.c.l.bf16 %v2356_v14  ;;  %1540 = vst.msk [vmem:[#allocation2 + $0x50] sm:$0xff] %vm1529_vm9, %v6570_v54  ;;  %1539 = vst.msk [vmem:[#allocation2 + $0x48] sm:$0xff] %vm1529_vm9, %v6566_v25  ;;  %v6223_v18 = vunpack.c.h.bf16 %v6261_v5  ;;  %v6581_v16 = vunpack.i.h.bf16 %v8018_v29  ;;  %v6580_v9 = vunpack.i.l.bf16 %v8018_v29  ;;  %v8240_v5 = vpop.permute.xlu0 %6653 }
 0x13f   : > { %v6847_v13 = vpack.i.bf16 %v2486_v12, %v2485_v60  ;;  %1538 = vst.msk [vmem:[#allocation2 + $0x40] sm:$0xff] %vm1529_vm9, %v6565_v17  ;;  %v6576_v38 = vunpack.i.h.bf16 %v8039_v22  ;;  %v6575_v24 = vunpack.i.l.bf16 %v8039_v22  ;;  %v2711_v61 = vunpack.c.l.bf16 %v6005_v50 }
 0x140   : > { %v6842_v1 = vpack.i.bf16 %v2470_v51, %v2469_v4  ;;  %v6852_v47 = vpack.i.bf16 %v6223_v18, %v6222_v33  ;;  %1545 = vst.msk [vmem:[#allocation2 + $0x78] sm:$0xff] %vm1529_vm9, %v6581_v16  ;;  %v2712_v19 = vunpack.c.h.bf16 %v6005_v50  ;;  %1544 = vst.msk [vmem:[#allocation2 + $0x70] sm:$0xff] %vm1529_vm9, %v6580_v9  ;;  %v2695_v29 = vunpack.c.l.bf16 %v5989_v20  ;;  %v6050_v51 = vld [vmem:[%s7168_s25 + $0xb4] sm:$0xf] }
 0x141   : > { %6848 = vrot.lane.b32.xlu1 %v6847_v13, %s7093_s30  ;;  %1542 = vst.msk [vmem:[#allocation2 + $0x60] sm:$0xff] %vm1529_vm9, %v6575_v24  ;;  %1543 = vst.msk [vmem:[#allocation2 + $0x68] sm:$0xff] %vm1529_vm9, %v6576_v38  ;;  %v2696_v22 = vunpack.c.h.bf16 %v5989_v20  ;;  %v6591_v2 = vunpack.i.h.bf16 %v8051_v35  ;;  %v6590_v8 = vunpack.i.l.bf16 %v8051_v35  ;;  %v6586_v52 = vunpack.i.h.bf16 %v8073_v55  ;;  %v6051_v20 = vld [vmem:[%s7168_s25 + $0xb8] sm:$0xf]  ;;  %v8247_v13 = vpop.permute.xlu1 %6668 }
 0x142   : > { %6843 = vrot.lane.b32.xlu0 %v6842_v1, %s7093_s30  ;;  %v6867_v10 = vpack.i.bf16 %v2712_v19, %v2711_v61  ;;  %v6585_v11 = vunpack.i.l.bf16 %v8073_v55  ;;  %v3215_v39 = vshrl.u32 %v6047_v36, 16  ;;  %v3218_v35 = vshll.u32 %v6047_v36, 16 }
 0x143   : > { %v6862_v32 = vpack.i.bf16 %v2696_v22, %v2695_v29  ;;  %1548 = vst.msk [vmem:[#allocation2 + $0x90] sm:$0xff] %vm1529_vm9, %v6590_v8  ;;  %1549 = vst.msk [vmem:[#allocation2 + $0x98] sm:$0xff] %vm1529_vm9, %v6591_v2  ;;  %v3224_v43 = vshll.u32 %v6048_v21, 16  ;;  %v3228_v45 = vshrl.u32 %v6048_v21, 16  ;;  %v3234_v56 = vshll.u32 %v6049_v28, 16  ;;  %v8261_v8 = vpop.permute.xlu0 %6663 }
 0x144   : > { %1546 = vst.msk [vmem:[#allocation2 + $0x80] sm:$0xff] %vm1529_vm9, %v6585_v11  ;;  %1547 = vst.msk [vmem:[#allocation2 + $0x88] sm:$0xff] %vm1529_vm9, %v6586_v52  ;;  %v3217_v53 = vrot.slane %v3215_v39, 4  ;;  %v3023_v55 = vshrl.u32 %v6023_v30, 16  ;;  %v3026_v42 = vshll.u32 %v6023_v30, 16  ;;  %v3220_v59 = vrot.slane %v3218_v35, 5 }
 0x145   : > { %6858 = vrot.lane.b32.xlu1 %v8070_v62, %s7094_s3  ;;  %v3226_v60 = vrot.slane %v3224_v43, 5  ;;  %v3230_v23 = vrot.slane %v3228_v45, 4  ;;  %v3032_v0 = vshll.u32 %v6024_v37, 16  ;;  %v3236_v40 = vrot.slane %v3234_v56, 5  ;;  %v6052_v29 = vld [vmem:[%s7168_s25 + $0xbc] sm:$0x1] }
 0x146   : > { %6853 = vrot.lane.b32.xlu0 %v6852_v47, %s7094_s3  ;;  %v3025_v4 = vrot.slane %v3023_v55, 4  ;;  %v3028_v54 = vrot.slane %v3026_v42, 5  ;;  %v3036_v25 = vshrl.u32 %v6024_v37, 16  ;;  %v3221_v12 = vor.u32 %v3220_v59, %v3217_v53  ;;  %v6026_v52 = vld [vmem:[%s7168_s25 + $0x54] sm:$0xf] }
 0x147   : > { %v3231_v14 = vor.u32 %v3230_v23, %v3226_v60  ;;  %v3034_v17 = vrot.slane %v3032_v0, 5  ;;  %v3042_v50 = vshll.u32 %v6025_v63, 16  ;;  %v6601_v18 = vunpack.i.h.bf16 %v8089_v6  ;;  %v6027_v35 = vld [vmem:[%s7168_s25 + $0x58] sm:$0xf]  ;;  %v8270_v63 = vpop.permute.xlu1 %6678  ;;  %v6028_v59 = vld [vmem:[%s7168_s25 + $0x5c] sm:$0x1] }
 0x148   : > { %v3029_v33 = vor.u32 %v3028_v54, %v3025_v4  ;;  %v3038_v62 = vrot.slane %v3036_v25, 4  ;;  %v6600_v16 = vunpack.i.l.bf16 %v8089_v6  ;;  %v3222_v9 = vrot.slane %v3221_v12, 4 }
 0x149   : > { %6868 = vrot.lane.b32.xlu1 %v6867_v10, %s7094_s3  ;;  %v3232_v38 = vrot.slane %v3231_v14, 4  ;;  %v3044_v24 = vrot.slane %v3042_v50, 5  ;;  %v6596_v36 = vunpack.i.h.bf16 %v8096_v48  ;;  %1553 = vst.msk [vmem:[#allocation2 + $0xb8] sm:$0xff] %vm1529_vm9, %v6601_v18  ;;  %v6595_v6 = vunpack.i.l.bf16 %v8096_v48  ;;  %v8274_v50 = vpop.permute.xlu0 %6673 }
 0x14a   : > { %6863 = vrot.lane.b32.xlu0 %v6862_v32, %s7094_s3  ;;  %v3030_v1 = vrot.slane %v3029_v33, 4  ;;  %v3039_v47 = vor.u32 %v3038_v62, %v3034_v17  ;;  %1552 = vst.msk [vmem:[#allocation2 + $0xb0] sm:$0xff] %vm1529_vm9, %v6600_v16  ;;  %v3239_v61 = vshrl.u32 %v6050_v51, 16  ;;  %v3227_v19 = vsel %vm7180_vm2, %v3222_v9, %v3226_v60 }
 0x14b   : > { %v3237_v21 = vsel %vm7180_vm2, %v3232_v38, %v3236_v40  ;;  %1551 = vst.msk [vmem:[#allocation2 + $0xa8] sm:$0xff] %vm1529_vm9, %v6596_v36  ;;  %v3242_v22 = vshll.u32 %v6050_v51, 16  ;;  %v3248_v2 = vshll.u32 %v6051_v20, 16  ;;  %v3366_v28 = vunpack.c.l.bf16 %v3227_v19  ;;  %1550 = vst.msk [vmem:[#allocation2 + $0xa0] sm:$0xff] %vm1529_vm9, %v6595_v6  ;;  %v6095_v38 = vld [vmem:[%s7168_s25 + $0xa8] sm:$0xe] }
 0x14c   : > { %v3367_v30 = vunpack.c.l.bf16 %v3237_v21  ;;  %v3035_v48 = vsel %vm7180_vm2, %v3030_v1, %v3034_v17  ;;  %v3040_v10 = vrot.slane %v3039_v47, 4  ;;  %v3241_v39 = vrot.slane %v3239_v61, 4  ;;  %v6097_v61 = vld [vmem:[%s7168_s25 + $0xb0] sm:$0x1]  ;;  %v6071_v19 = vld [vmem:[%s7168_s25 + $0x48] sm:$0xe]  ;;  %v8284_v21 = vpop.permute.xlu1 %6688 }
 0x14d   : > { %v3350_v11 = vunpack.c.l.bf16 %v3035_v48  ;;  %v3244_v37 = vrot.slane %v3242_v22, 5  ;;  %v3250_v32 = vrot.slane %v3248_v2, 5  ;;  %v3252_v53 = vshrl.u32 %v6051_v20, 16 }
 0x14e   : > { %v6877_v43 = vpack.i.bf16 %v3367_v30, %v3366_v28  ;;  %v3045_v45 = vsel %vm7180_vm2, %v3040_v10, %v3044_v24  ;;  %v3258_v56 = vshll.u32 %v6052_v29, 16  ;;  %v3047_v60 = vshrl.u32 %v6026_v52, 16  ;;  %v6096_v24 = vld [vmem:[%s7168_s25 + $0xac] sm:$0xf] }
 0x14f   : > { %v3351_v55 = vunpack.c.l.bf16 %v3045_v45  ;;  %v3245_v42 = vor.u32 %v3244_v37, %v3241_v39  ;;  %v3050_v23 = vshll.u32 %v6026_v52, 16  ;;  %v3254_v0 = vrot.slane %v3252_v53, 4 }
 0x150   : > { %6878 = vrot.lane.b32.xlu1 %v6877_v43, %s7095_s4  ;;  %v3260_v40 = vrot.slane %v3258_v56, 5  ;;  %v3056_v4 = vshll.u32 %v6027_v35, 16  ;;  %v3060_v54 = vshrl.u32 %v6027_v35, 16  ;;  %v3049_v14 = vrot.slane %v3047_v60, 4  ;;  %v8299_v35 = vpop.permute.xlu0 %6683 }
 0x151   : > { %v6872_v25 = vpack.i.bf16 %v3351_v55, %v3350_v11  ;;  %v3246_v12 = vrot.slane %v3245_v42, 4  ;;  %v3052_v17 = vrot.slane %v3050_v23, 5  ;;  %v3255_v51 = vor.u32 %v3254_v0, %v3250_v32  ;;  %v6072_v11 = vld [vmem:[%s7168_s25 + $0x4c] sm:$0xf]  ;;  %v6098_v23 = vld [vmem:[%s7168_s25 + $0xb4] sm:$0xe] }
 0x152   : > { %v3058_v33 = vrot.slane %v3056_v4, 5  ;;  %v3062_v62 = vrot.slane %v3060_v54, 4  ;;  %v3066_v18 = vshll.u32 %v6028_v59, 16  ;;  %v6611_v9 = vunpack.i.h.bf16 %v8106_v15  ;;  %v6099_v0 = vld [vmem:[%s7168_s25 + $0xb8] sm:$0xf] }
 0x153   : > { %6873 = vrot.lane.b32.xlu0 %v6872_v25, %s7095_s4  ;;  %v3251_v16 = vsel %vm7180_vm2, %v3246_v12, %v3250_v32  ;;  %v3053_v20 = vor.u32 %v3052_v17, %v3049_v14  ;;  %v3256_v36 = vrot.slane %v3255_v51, 4  ;;  %v6610_v22 = vunpack.i.l.bf16 %v8106_v15  ;;  %v6100_v12 = vld [vmem:[%s7168_s25 + $0xbc] sm:$0x1]  ;;  %v6075_v14 = vld [vmem:[%s7168_s25 + $0x58] sm:$0xf]  ;;  %v8313_v17 = vpop.permute.xlu1 %6698 }
 0x154   : > { %v3368_v1 = vunpack.c.l.bf16 %v3251_v16  ;;  %v3063_v47 = vor.u32 %v3062_v62, %v3058_v33  ;;  %v3068_v6 = vrot.slane %v3066_v18, 5  ;;  %2204 = vst.msk [vmem:[#allocation2 + $0x88] sm:$0xff] %vm2186_vm10, %v6611_v9  ;;  %v6606_v2 = vunpack.i.h.bf16 %v8119_v58  ;;  %v6074_v16 = vld [vmem:[%s7168_s25 + $0x54] sm:$0xe] }
 0x155   : > { %v3054_v29 = vrot.slane %v3053_v20, 4  ;;  %v6605_v28 = vunpack.i.l.bf16 %v8119_v58  ;;  %v3261_v30 = vsel %vm7180_vm2, %v3256_v36, %v3260_v40  ;;  %v6119_v10 = vrot.slane %v6095_v38, 9  ;;  %2203 = vst.msk [vmem:[#allocation2 + $0x80] sm:$0xff] %vm2186_vm10, %v6610_v22  ;;  %v6073_v58 = vld [vmem:[%s7168_s25 + $0x50] sm:$0x1] }
 0x156   : > { %v3064_v48 = vrot.slane %v3063_v47, 4  ;;  %v3717_v52 = vrot.slane %v6096_v24, 5  ;;  %v3369_v39 = vunpack.c.l.bf16 %v3261_v30  ;;  %2188 = vst.msk [vmem:[#allocation2 + $0x8] sm:$0xff] %vm2186_vm10, %v6606_v2  ;;  %v3720_v15 = vrot.slane %v6097_v61, 5  ;;  %v6076_v20 = vld [vmem:[%s7168_s25 + $0x5c] sm:$0x1]  ;;  %v8327_v61 = vpop.permute.xlu0 %6693 }
 0x157   : > { %v3059_v37 = vsel %vm7180_vm2, %v3054_v29, %v3058_v33  ;;  %2187 = vst.msk [vmem:[#allocation2] sm:$0xff] %vm2186_vm10, %v6605_v28  ;;  %v6111_v32 = vrot.slane %v6071_v19, 9  ;;  %v3661_v60 = vrot.slane %v6072_v11, 5  ;;  %v3664_v4 = vrot.slane %v6073_v58, 5 }
 0x158   : > { %v3069_v43 = vsel %vm7180_vm2, %v3064_v48, %v3068_v6  ;;  %v3352_v45 = vunpack.c.l.bf16 %v3059_v37  ;;  %v3718_v53 = vsel %vm7298_vm5, %v6119_v10, %v3717_v52  ;;  %v3719_v56 = vrot.slane %v3717_v52, 4  ;;  %v6258_v48 = vld [vmem:[%s7168_s25 + $0xc0] sm:$0xff]   ;;  %v5863_v37 = vld [vmem:[%s7168_s25 + $0xb4] sm:$0xff]  }
 0x159   : > { %v6887_v55 = vpack.i.bf16 %v3369_v39, %v3368_v1  ;;  %v3353_v42 = vunpack.c.l.bf16 %v3069_v43  ;;  %v3799_v59 = vunpack.c.l.bf16 %v3718_v53  ;;  %v6621_v54 = vunpack.i.h.bf16 %v8127_v3 }
 0x15a   : > { %v3721_v40 = vsel %vm7298_vm5, %v3719_v56, %v3720_v15  ;;  %v6620_v25 = vunpack.i.l.bf16 %v8127_v3  ;;  %v3662_v62 = vsel %vm7298_vm5, %v6111_v32, %v3661_v60  ;;  %v3663_v18 = vrot.slane %v3661_v60, 4  ;;  %v8339_v15 = vpop.permute.xlu1 %6708 }
 0x15b   : > { %6888 = vrot.lane.b32.xlu1 %v6887_v55, %s7095_s4  ;;  %v6882_v51 = vpack.i.bf16 %v3353_v42, %v3352_v45  ;;  %v3800_v33 = vunpack.c.l.bf16 %v3721_v40  ;;  %v3783_v9 = vunpack.c.l.bf16 %v3662_v62  ;;  %2206 = vst.msk [vmem:[#allocation2 + $0x98] sm:$0xff] %vm2186_vm10, %v6621_v54  ;;  %v6616_v3 = vunpack.i.h.bf16 %v8130_v57  ;;  %v5910_v40 = vld [vmem:[%s7168_s25 + $0xb8] sm:$0xf] }
 0x15c   : > { %2205 = vst.msk [vmem:[#allocation2 + $0x90] sm:$0xff] %vm2186_vm10, %v6620_v25  ;;  %v6615_v38 = vunpack.i.l.bf16 %v8130_v57  ;;  %v6120_v24 = vrot.slane %v6098_v23, 9  ;;  %v3665_v1 = vsel %vm7298_vm5, %v3663_v18, %v3664_v4  ;;  %v3724_v47 = vrot.slane %v6099_v0, 5  ;;  %v5909_v0 = vld [vmem:[%s7168_s25 + $0xb4] sm:$0xf]  ;;  %v8354_v4 = vpop.permute.xlu0 %6703 }
 0x15d   : > { %6883 = vrot.lane.b32.xlu0 %v6882_v51, %s7095_s4  ;;  %v6897_v36 = vpack.i.bf16 %v3800_v33, %v3799_v59  ;;  %v3727_v6 = vrot.slane %v6100_v12, 5  ;;  %v3784_v19 = vunpack.c.l.bf16 %v3665_v1  ;;  %2190 = vst.msk [vmem:[#allocation2 + $0x18] sm:$0xff] %vm2186_vm10, %v6616_v3  ;;  %v6112_v29 = vrot.slane %v6074_v16, 9  ;;  %v5885_v51 = vld [vmem:[%s7168_s25 + $0x54] sm:$0xf] }
 0x15e   : > { %2189 = vst.msk [vmem:[#allocation2 + $0x10] sm:$0xff] %vm2186_vm10, %v6615_v38  ;;  %v3668_v57 = vrot.slane %v6075_v14, 5  ;;  %v3671_v22 = vrot.slane %v6076_v20, 5  ;;  %v3725_v2 = vsel %vm7298_vm5, %v6120_v24, %v3724_v47  ;;  %v3726_v28 = vrot.slane %v3724_v47, 4  ;;  %v5911_v14 = vld [vmem:[%s7168_s25 + $0xbc] sm:$0x1]  ;;  %v8370_v24 = vpop.permute.xlu1 %6718 }
 0x15f   : > { %6898 = vrot.lane.b32.xlu1 %v6897_v36, %s7096_s5  ;;  %v6631_v30 = vunpack.i.h.bf16 %v8145_v46  ;;  %v6892_v10 = vpack.i.bf16 %v3784_v19, %v3783_v9  ;;  %v3801_v52 = vunpack.c.l.bf16 %v3725_v2  ;;  %v6630_v43 = vunpack.i.l.bf16 %v8145_v46  ;;  %v5886_v33 = vld [vmem:[%s7168_s25 + $0x58] sm:$0xf] }
 0x160   : > { %v3669_v11 = vsel %vm7298_vm5, %v6112_v29, %v3668_v57  ;;  %v3670_v39 = vrot.slane %v3668_v57, 4  ;;  %v3728_v58 = vsel %vm7298_vm5, %v3726_v28, %v3727_v6  ;;  %v6626_v45 = vunpack.i.h.bf16 %v8157_v49 }
 0x161   : > { %v3785_v32 = vunpack.c.l.bf16 %v3669_v11  ;;  %2637 = vst.msk [vmem:[#allocation2 + $0x88] sm:$0xff] %vm2619_vm11, %v6631_v30  ;;  %6893 = vrot.lane.b32.xlu0 %v6892_v10, %s7096_s5  ;;  %v3802_v53 = vunpack.c.l.bf16 %v3728_v58  ;;  %v6625_v55 = vunpack.i.l.bf16 %v8157_v49  ;;  %v6210_v42 = vunpack.c.l.bf16 %v6258_v48  ;;  %2636 = vst.msk [vmem:[#allocation2 + $0x80] sm:$0xff] %vm2619_vm11, %v6630_v43  ;;  %v8375_v10 = vpop.permute.xlu0 %6713  ;;  %v5912_v58 = vld [vmem:[%s7168_s25 + $0xc0] sm:$0xf] }
 0x162   : > { %v3672_v56 = vsel %vm7298_vm5, %v3670_v39, %v3671_v22  ;;  %2621 = vst.msk [vmem:[#allocation2 + $0x8] sm:$0xff] %vm2619_vm11, %v6626_v45  ;;  %v6211_v46 = vunpack.c.h.bf16 %v6258_v48  ;;  %v1397_v60 = vunpack.c.l.bf16 %v5863_v37  ;;  %v1398_v23 = vunpack.c.h.bf16 %v5863_v37 }
 0x163   : > { %v3786_v59 = vunpack.c.l.bf16 %v3672_v56  ;;  %v6907_v54 = vpack.i.bf16 %v3802_v53, %v3801_v52  ;;  %2620 = vst.msk [vmem:[#allocation2] sm:$0xff] %vm2619_vm11, %v6625_v55  ;;  %v6641_v49 = vunpack.i.h.bf16 %v8172_v7  ;;  %v6640_v25 = vunpack.i.l.bf16 %v8172_v7 }
 0x164   : > { %v6636_v12 = vunpack.i.h.bf16 %v8185_v31  ;;  %v8363_v18 = vpack.i.bf16 %v6211_v46, %v6210_v42  ;;  %v6912_v16 = vpack.i.bf16 %v1398_v23, %v1397_v60  ;;  %v6635_v20 = vunpack.i.l.bf16 %v8185_v31  ;;  %v5887_v31 = vld [vmem:[%s7168_s25 + $0x5c] sm:$0x1] }
 0x165   : > { %v6902_v62 = vpack.i.bf16 %v3786_v59, %v3785_v32  ;;  %6908 = vrot.lane.b32.xlu1 %v6907_v54, %s7096_s5  ;;  %2638 = vst.msk [vmem:[#allocation2 + $0x90] sm:$0xff] %vm2619_vm11, %v6640_v25  ;;  %2639 = vst.msk [vmem:[#allocation2 + $0x98] sm:$0xff] %vm2619_vm11, %v6641_v49  ;;  %v1947_v7 = vshrl.u32 %v5909_v0, 16  ;;  %v1950_v9 = vshll.u32 %v5909_v0, 16  ;;  %v1956_v3 = vshll.u32 %v5910_v40, 16  ;;  %v8383_v59 = vpop.permute.xlu1 %6728 }
 0x166   : > { %2623 = vst.msk [vmem:[#allocation2 + $0x18] sm:$0xff] %vm2619_vm11, %v6636_v12  ;;  %v1960_v38 = vshrl.u32 %v5910_v40, 16  ;;  %2622 = vst.msk [vmem:[#allocation2 + $0x10] sm:$0xff] %vm2619_vm11, %v6635_v20  ;;  %v1966_v36 = vshll.u32 %v5911_v14, 16  ;;  %v1755_v1 = vshrl.u32 %v5885_v51, 16  ;;  %v1758_v47 = vshll.u32 %v5885_v51, 16 }
 0x167   : > { %6903 = vrot.lane.b32.xlu0 %v6902_v62, %s7096_s5  ;;  %v1764_v6 = vshll.u32 %v5886_v33, 16  ;;  %v1949_v19 = vrot.slane %v1947_v7, 4  ;;  %v1952_v29 = vrot.slane %v1950_v9, 5  ;;  %v1958_v57 = vrot.slane %v1956_v3, 5  ;;  %v5913_v0 = vld [vmem:[%s7168_s25 + $0xc4] sm:$0xf] }
 0x168   : > { %v1962_v22 = vrot.slane %v1960_v38, 4  ;;  %v1968_v2 = vrot.slane %v1966_v36, 5  ;;  %v1757_v28 = vrot.slane %v1755_v1, 4  ;;  %v1760_v30 = vrot.slane %v1758_v47, 5  ;;  %v5914_v25 = vld [vmem:[%s7168_s25 + $0xc8] sm:$0x1] }
 0x169   : > { %v1766_v48 = vrot.slane %v1764_v6, 5  ;;  %6918 = vrot.lane.b32.xlu1 %v8363_v18, %s7091_s28  ;;  %v1953_v52 = vor.u32 %v1952_v29, %v1949_v19  ;;  %v1768_v39 = vshrl.u32 %v5886_v33, 16  ;;  %v1774_v37 = vshll.u32 %v5887_v31, 16  ;;  %v5888_v14 = vld [vmem:[%s7168_s25 + $0x60] sm:$0xf] }
 0x16a   : > { %v1963_v11 = vor.u32 %v1962_v22, %v1958_v57  ;;  %v1761_v32 = vor.u32 %v1760_v30, %v1757_v28  ;;  %v6651_v43 = vunpack.i.h.bf16 %v8199_v34  ;;  %v6650_v45 = vunpack.i.l.bf16 %v8199_v34  ;;  %v5889_v1 = vld [vmem:[%s7168_s25 + $0x64] sm:$0xf] }
 0x16b   : > { %6913 = vrot.lane.b32.xlu0 %v6912_v16, %s7091_s28  ;;  %v1954_v53 = vrot.slane %v1953_v52, 4  ;;  %v1770_v55 = vrot.slane %v1768_v39, 4  ;;  %v1776_v42 = vrot.slane %v1774_v37, 5  ;;  %v6646_v60 = vunpack.i.h.bf16 %v8215_v41  ;;  %v8400_v16 = vpop.permute.xlu0 %6723 }
 0x16c   : > { %v1964_v56 = vrot.slane %v1963_v11, 4  ;;  %v1762_v46 = vrot.slane %v1761_v32, 4  ;;  %2862 = vst.msk [vmem:[#allocation2 + $0x80] sm:$0xff] %vm2845_vm12, %v6650_v45  ;;  %2863 = vst.msk [vmem:[#allocation2 + $0x88] sm:$0xff] %vm2845_vm12, %v6651_v43  ;;  %v6645_v23 = vunpack.i.l.bf16 %v8215_v41  ;;  %v1971_v40 = vshrl.u32 %v5912_v58, 16 }
 0x16d   : > { %v1959_v34 = vsel %vm7180_vm2, %v1954_v53, %v1958_v57  ;;  %v1771_v49 = vor.u32 %v1770_v55, %v1766_v48  ;;  %v1974_v12 = vshll.u32 %v5912_v58, 16  ;;  %2847 = vst.msk [vmem:[#allocation2 + $0x8] sm:$0xff] %vm2845_vm12, %v6646_v60  ;;  %v1980_v3 = vshll.u32 %v5913_v0, 16  ;;  %v5890_v57 = vld [vmem:[%s7168_s25 + $0x68] sm:$0x1] }
 0x16e   : > { %v1969_v54 = vsel %vm7180_vm2, %v1964_v56, %v1968_v2  ;;  %v2054_v51 = vunpack.c.l.bf16 %v1959_v34  ;;  %v1767_v62 = vsel %vm7180_vm2, %v1762_v46, %v1766_v48  ;;  %2846 = vst.msk [vmem:[#allocation2] sm:$0xff] %vm2845_vm12, %v6645_v23  ;;  %v1973_v41 = vrot.slane %v1971_v40, 4  ;;  %v8406_v2 = vpop.permute.xlu1 %6738  ;;  %v5958_v56 = vld [vmem:[%s7168_s25 + $0xb8] sm:$0xf]  ;;  %v5959_v40 = vld [vmem:[%s7168_s25 + $0xbc] sm:$0x1] }
 0x16f   : > { %v2055_v33 = vunpack.c.l.bf16 %v1969_v54  ;;  %v1772_v20 = vrot.slane %v1771_v49, 4  ;;  %v2038_v7 = vunpack.c.l.bf16 %v1767_v62  ;;  %v1976_v9 = vrot.slane %v1974_v12, 5  ;;  %v8411_v55 = vpop.permute.xlu0 %6733  ;;  %v5933_v12 = vld [vmem:[%s7168_s25 + $0x54] sm:$0xe] }
 0x170   : > { %v1984_v36 = vshrl.u32 %v5913_v0, 16  ;;  %v1990_v31 = vshll.u32 %v5914_v25, 16  ;;  %v1779_v47 = vshrl.u32 %v5888_v14, 16  ;;  %v1982_v29 = vrot.slane %v1980_v3, 5  ;;  %v5957_v0 = vld [vmem:[%s7168_s25 + $0xb4] sm:$0xe] }
 0x171   : > { %v6927_v38 = vpack.i.bf16 %v2055_v33, %v2054_v51  ;;  %v1777_v6 = vsel %vm7180_vm2, %v1772_v20, %v1776_v42  ;;  %v1977_v19 = vor.u32 %v1976_v9, %v1973_v41  ;;  %v1782_v22 = vshll.u32 %v5888_v14, 16  ;;  %v5934_v41 = vld [vmem:[%s7168_s25 + $0x58] sm:$0xf] }
 0x172   : > { %v2039_v28 = vunpack.c.l.bf16 %v1777_v6  ;;  %v1986_v30 = vrot.slane %v1984_v36, 4  ;;  %v1992_v48 = vrot.slane %v1990_v31, 5  ;;  %v1781_v52 = vrot.slane %v1779_v47, 4  ;;  %v8424_v20 = vpop.permute.xlu1 %6748 }
 0x173   : > { %6928 = vrot.lane.b32.xlu1 %v6927_v38, %s7092_s29  ;;  %v1978_v11 = vrot.slane %v1977_v19, 4  ;;  %v1784_v39 = vrot.slane %v1782_v22, 5  ;;  %v1788_v37 = vshll.u32 %v5889_v1, 16  ;;  %v1792_v58 = vshrl.u32 %v5889_v1, 16  ;;  %v5935_v38 = vld [vmem:[%s7168_s25 + $0x5c] sm:$0x1] }
 0x174   : > { %v6922_v32 = vpack.i.bf16 %v2039_v28, %v2038_v7  ;;  %v1987_v43 = vor.u32 %v1986_v30, %v1982_v29  ;;  %v1798_v45 = vshll.u32 %v5890_v57, 16  ;;  %v6661_v53 = vunpack.i.h.bf16 %v8231_v44  ;;  %v8436_v57 = vpop.permute.xlu0 %6743 }
 0x175   : > { %v1983_v42 = vsel %vm7180_vm2, %v1978_v11, %v1982_v29  ;;  %v1785_v46 = vor.u32 %v1784_v39, %v1781_v52  ;;  %v1790_v60 = vrot.slane %v1788_v37, 5  ;;  %v1794_v23 = vrot.slane %v1792_v58, 4  ;;  %v5960_v52 = vld [vmem:[%s7168_s25 + $0xc0] sm:$0xe] }
 0x176   : > { %6923 = vrot.lane.b32.xlu0 %v6922_v32, %s7092_s29  ;;  %v1988_v34 = vrot.slane %v1987_v43, 4  ;;  %v2056_v54 = vunpack.c.l.bf16 %v1983_v42  ;;  %v1800_v49 = vrot.slane %v1798_v45, 5  ;;  %v6660_v25 = vunpack.i.l.bf16 %v8231_v44  ;;  %2865 = vst.msk [vmem:[#allocation2 + $0x98] sm:$0xff] %vm2845_vm12, %v6661_v53  ;;  %v5961_v32 = vld [vmem:[%s7168_s25 + $0xc4] sm:$0xf] }
 0x177   : > { %v1786_v14 = vrot.slane %v1785_v46, 4  ;;  %v1795_v51 = vor.u32 %v1794_v23, %v1790_v60  ;;  %v6656_v33 = vunpack.i.h.bf16 %v8240_v5  ;;  %v6655_v62 = vunpack.i.l.bf16 %v8240_v5  ;;  %v5962_v43 = vld [vmem:[%s7168_s25 + $0xc8] sm:$0x1]  ;;  %v5936_v42 = vld [vmem:[%s7168_s25 + $0x60] sm:$0xe] }
 0x178   : > { %v1993_v7 = vsel %vm7180_vm2, %v1988_v34, %v1992_v48  ;;  %2864 = vst.msk [vmem:[#allocation2 + $0x90] sm:$0xff] %vm2845_vm12, %v6660_v25  ;;  %v5977_v9 = vrot.slane %v5957_v0, 9  ;;  %v2415_v3 = vrot.slane %v5958_v56, 5  ;;  %v2418_v44 = vrot.slane %v5959_v40, 5  ;;  %v5937_v46 = vld [vmem:[%s7168_s25 + $0x64] sm:$0xf] }
 0x179   : > { %v2057_v36 = vunpack.c.l.bf16 %v1993_v7  ;;  %v1791_v31 = vsel %vm7180_vm2, %v1786_v14, %v1790_v60  ;;  %v1796_v1 = vrot.slane %v1795_v51, 4  ;;  %2848 = vst.msk [vmem:[#allocation2 + $0x10] sm:$0xff] %vm2845_vm12, %v6655_v62  ;;  %2849 = vst.msk [vmem:[#allocation2 + $0x18] sm:$0xff] %vm2845_vm12, %v6656_v33  ;;  %v5969_v5 = vrot.slane %v5933_v12, 9  ;;  %v8451_v60 = vpop.permute.xlu1 %6758 }
 0x17a   : > { %v2040_v47 = vunpack.c.l.bf16 %v1791_v31  ;;  %v2416_v6 = vsel %vm7298_vm5, %v5977_v9, %v2415_v3  ;;  %v2417_v19 = vrot.slane %v2415_v3, 4  ;;  %v2359_v29 = vrot.slane %v5934_v41, 5  ;;  %v8463_v41 = vpop.permute.xlu0 %6753 }
 0x17b   : > { %v6937_v22 = vpack.i.bf16 %v2057_v36, %v2056_v54  ;;  %v1801_v28 = vsel %vm7180_vm2, %v1796_v1, %v1800_v49  ;;  %v2487_v30 = vunpack.c.l.bf16 %v2416_v6  ;;  %v2362_v48 = vrot.slane %v5935_v38, 5  ;;  %v5938_v54 = vld [vmem:[%s7168_s25 + $0x68] sm:$0x1] }
 0x17c   : > { %v2041_v11 = vunpack.c.l.bf16 %v1801_v28  ;;  %v2419_v39 = vsel %vm7298_vm5, %v2417_v19, %v2418_v44  ;;  %v2360_v37 = vsel %vm7298_vm5, %v5969_v5, %v2359_v29  ;;  %v2361_v58 = vrot.slane %v2359_v29, 4  ;;  %v6262_v44 = vld [vmem:[%s7168_s25 + $0x60] sm:$0xff]  }
 0x17d   : > { %6938 = vrot.lane.b32.xlu1 %v6937_v22, %s7092_s29  ;;  %v2488_v45 = vunpack.c.l.bf16 %v2419_v39  ;;  %v2471_v53 = vunpack.c.l.bf16 %v2360_v37  ;;  %v6671_v56 = vunpack.i.h.bf16 %v8247_v13  ;;  %v6670_v40 = vunpack.i.l.bf16 %v8247_v13  ;;  %v8478_v19 = vpop.permute.xlu1 %6768  ;;  %v5993_v39 = vld [vmem:[%s7168_s25 + $0x6c] sm:$0xff]  }
 0x17e   : > { %v6932_v23 = vpack.i.bf16 %v2041_v11, %v2040_v47  ;;  %v2363_v0 = vsel %vm7298_vm5, %v2361_v58, %v2362_v48  ;;  %v6666_v34 = vunpack.i.h.bf16 %v8261_v8  ;;  %v6665_v12 = vunpack.i.l.bf16 %v8261_v8  ;;  %v6009_v48 = vld [vmem:[%s7168_s25 + $0xcc] sm:$0xff]  }
 0x17f   : > { %v6947_v49 = vpack.i.bf16 %v2488_v45, %v2487_v30  ;;  %v2472_v25 = vunpack.c.l.bf16 %v2363_v0  ;;  %3520 = vst.msk [vmem:[#allocation2 + $0x88] sm:$0xff] %vm3502_vm13, %v6671_v56  ;;  %v5978_v14 = vrot.slane %v5960_v52, 9  ;;  %3519 = vst.msk [vmem:[#allocation2 + $0x80] sm:$0xff] %vm3502_vm13, %v6670_v40  ;;  %v2422_v51 = vrot.slane %v5961_v32, 5  ;;  %v6053_v45 = vld [vmem:[%s7168_s25 + $0xc0] sm:$0xf] }
 0x180   : > { %6933 = vrot.lane.b32.xlu0 %v6932_v23, %s7092_s29  ;;  %3504 = vst.msk [vmem:[#allocation2 + $0x8] sm:$0xff] %vm3502_vm13, %v6666_v34  ;;  %v2425_v33 = vrot.slane %v5962_v43, 5  ;;  %v5970_v13 = vrot.slane %v5936_v42, 9  ;;  %v2366_v62 = vrot.slane %v5937_v46, 5  ;;  %3503 = vst.msk [vmem:[#allocation2] sm:$0xff] %vm3502_vm13, %v6665_v12  ;;  %v2369_v8 = vrot.slane %v5938_v54, 5  ;;  %s9246_s29 = scalar_lea.hbm %s9299_s2, %s6147_s24 }
 0x181   : > { %6948 = vrot.lane.b32.xlu1 %v6947_v49, %s7093_s30  ;;  %v6942_v7 = vpack.i.bf16 %v2472_v25, %v2471_v53  ;;  %v6681_v9 = vunpack.i.h.bf16 %v8270_v63  ;;  %v6680_v3 = vunpack.i.l.bf16 %v8270_v63  ;;  %v2423_v38 = vsel %vm7298_vm5, %v5978_v14, %v2422_v51  ;;  %v8494_v53 = vpop.permute.xlu0 %6763  ;;  %v6054_v0 = vld [vmem:[%s7168_s25 + $0xc4] sm:$0xf]  ;;  %v6055_v54 = vld [vmem:[%s7168_s25 + $0xc8] sm:$0x1]  ;;  %v6029_v49 = vld [vmem:[%s7168_s25 + $0x60] sm:$0xf] }
 0x182   : > { %v2424_v36 = vrot.slane %v2422_v51, 4  ;;  %v2367_v31 = vsel %vm7298_vm5, %v5970_v13, %v2366_v62  ;;  %v2368_v1 = vrot.slane %v2366_v62, 4  ;;  %v2489_v5 = vunpack.c.l.bf16 %v2423_v38 }
 0x183   : > { %v2473_v47 = vunpack.c.l.bf16 %v2367_v31  ;;  %3521 = vst.msk [vmem:[#allocation2 + $0x90] sm:$0xff] %vm3502_vm13, %v6680_v3  ;;  %3522 = vst.msk [vmem:[#allocation2 + $0x98] sm:$0xff] %vm3502_vm13, %v6681_v9  ;;  %v6676_v6 = vunpack.i.h.bf16 %v8274_v50  ;;  %v6675_v63 = vunpack.i.l.bf16 %v8274_v50  ;;  %v6226_v28 = vunpack.c.l.bf16 %v6262_v44 }
 0x184   : > { %6943 = vrot.lane.b32.xlu0 %v6942_v7, %s7093_s30  ;;  %v2426_v29 = vsel %vm7298_vm5, %v2424_v36, %v2425_v33  ;;  %v2370_v22 = vsel %vm7298_vm5, %v2368_v1, %v2369_v8  ;;  %v6227_v30 = vunpack.c.h.bf16 %v6262_v44  ;;  %v6691_v50 = vunpack.i.h.bf16 %v8284_v21  ;;  %v6030_v33 = vld [vmem:[%s7168_s25 + $0x64] sm:$0xf]  ;;  %v6031_v44 = vld [vmem:[%s7168_s25 + $0x68] sm:$0x1] }
 0x185   : > { %v2490_v52 = vunpack.c.l.bf16 %v2426_v29  ;;  %v2474_v11 = vunpack.c.l.bf16 %v2370_v22  ;;  %3505 = vst.msk [vmem:[#allocation2 + $0x10] sm:$0xff] %vm3502_vm13, %v6675_v63  ;;  %3506 = vst.msk [vmem:[#allocation2 + $0x18] sm:$0xff] %vm3502_vm13, %v6676_v6  ;;  %v6690_v58 = vunpack.i.l.bf16 %v8284_v21  ;;  %v6686_v32 = vunpack.i.h.bf16 %v8299_v35 }
 0x186   : > { %v6962_v37 = vpack.i.bf16 %v6227_v30, %v6226_v28  ;;  %v6685_v43 = vunpack.i.l.bf16 %v8299_v35  ;;  %3953 = vst.msk [vmem:[#allocation2 + $0x88] sm:$0xff] %vm3935_vm14, %v6691_v50  ;;  %v2715_v46 = vunpack.c.l.bf16 %v6009_v48  ;;  %v2716_v23 = vunpack.c.h.bf16 %v6009_v48  ;;  %v8510_v13 = vpop.permute.xlu1 %6778 }
 0x187   : > { %v6957_v56 = vpack.i.bf16 %v2490_v52, %v2489_v5  ;;  %v6952_v42 = vpack.i.bf16 %v2474_v11, %v2473_v47  ;;  %3952 = vst.msk [vmem:[#allocation2 + $0x80] sm:$0xff] %vm3935_vm14, %v6690_v58  ;;  %3937 = vst.msk [vmem:[#allocation2 + $0x8] sm:$0xff] %vm3935_vm14, %v6686_v32  ;;  %v2699_v21 = vunpack.c.l.bf16 %v5993_v39  ;;  %v2700_v35 = vunpack.c.h.bf16 %v5993_v39  ;;  %v6056_v11 = vld [vmem:[%s7168_s25 + $0xcc] sm:$0xf] }
 0x188   : > { %3936 = vst.msk [vmem:[#allocation2] sm:$0xff] %vm3935_vm14, %v6685_v43  ;;  %v6701_v40 = vunpack.i.h.bf16 %v8313_v17  ;;  %v6700_v34 = vunpack.i.l.bf16 %v8313_v17  ;;  %v6977_v25 = vpack.i.bf16 %v2716_v23, %v2715_v46  ;;  %v6696_v12 = vunpack.i.h.bf16 %v8327_v61  ;;  %v6057_v43 = vld [vmem:[%s7168_s25 + $0xd0] sm:$0xf] }
 0x189   : > { %6958 = vrot.lane.b32.xlu1 %v6957_v56, %s7093_s30  ;;  %6953 = vrot.lane.b32.xlu0 %v6952_v42, %s7093_s30  ;;  %v6695_v14 = vunpack.i.l.bf16 %v8327_v61  ;;  %v3263_v51 = vshrl.u32 %v6053_v45, 16  ;;  %v6972_v62 = vpack.i.bf16 %v2700_v35, %v2699_v21  ;;  %v3266_v17 = vshll.u32 %v6053_v45, 16  ;;  %v8517_v47 = vpop.permute.xlu0 %6773 }
 0x18a   : > { %3954 = vst.msk [vmem:[#allocation2 + $0x90] sm:$0xff] %vm3935_vm14, %v6700_v34  ;;  %3955 = vst.msk [vmem:[#allocation2 + $0x98] sm:$0xff] %vm3935_vm14, %v6701_v40  ;;  %v3272_v7 = vshll.u32 %v6054_v0, 16  ;;  %v3276_v8 = vshrl.u32 %v6054_v0, 16  ;;  %v3282_v3 = vshll.u32 %v6055_v54, 16  ;;  %v3071_v61 = vshrl.u32 %v6029_v49, 16  ;;  %v8526_v45 = vpop.permute.xlu1 %6788 }
 0x18b   : > { %3938 = vst.msk [vmem:[#allocation2 + $0x10] sm:$0xff] %vm3935_vm14, %v6695_v14  ;;  %3939 = vst.msk [vmem:[#allocation2 + $0x18] sm:$0xff] %vm3935_vm14, %v6696_v12  ;;  %v3265_v9 = vrot.slane %v3263_v51, 4  ;;  %v3074_v38 = vshll.u32 %v6029_v49, 16  ;;  %v3268_v36 = vrot.slane %v3266_v17, 5  ;;  %v3080_v5 = vshll.u32 %v6030_v33, 16 }
 0x18c   : > { %v3274_v31 = vrot.slane %v3272_v7, 5  ;;  %v3278_v1 = vrot.slane %v3276_v8, 4  ;;  %v3284_v6 = vrot.slane %v3282_v3, 5  ;;  %v3073_v63 = vrot.slane %v3071_v61, 4  ;;  %v6058_v40 = vld [vmem:[%s7168_s25 + $0xd4] sm:$0x1] }
 0x18d   : > { %6968 = vrot.lane.b32.xlu1 %v8363_v18, %s7094_s3  ;;  %6963 = vrot.lane.b32.xlu0 %v6962_v37, %s7094_s3  ;;  %v3076_v29 = vrot.slane %v3074_v38, 5  ;;  %v3084_v22 = vshrl.u32 %v6030_v33, 16  ;;  %v3269_v28 = vor.u32 %v3268_v36, %v3265_v9  ;;  %v3082_v48 = vrot.slane %v3080_v5, 5  ;;  %v8540_v49 = vpop.permute.xlu0 %6783  ;;  %v6032_v51 = vld [vmem:[%s7168_s25 + $0x6c] sm:$0xf] }
 0x18e   : > { %v3279_v30 = vor.u32 %v3278_v1, %v3274_v31  ;;  %v3090_v52 = vshll.u32 %v6031_v44, 16  ;;  %v6711_v58 = vunpack.i.h.bf16 %v8339_v15  ;;  %v6710_v32 = vunpack.i.l.bf16 %v8339_v15  ;;  %v6033_v8 = vld [vmem:[%s7168_s25 + $0x70] sm:$0xf]  ;;  %v6034_v1 = vld [vmem:[%s7168_s25 + $0x74] sm:$0x1] }
 0x18f   : > { %v3077_v50 = vor.u32 %v3076_v29, %v3073_v63  ;;  %v3086_v39 = vrot.slane %v3084_v22, 4  ;;  %v3270_v18 = vrot.slane %v3269_v28, 4  ;;  %v6706_v42 = vunpack.i.h.bf16 %v8354_v4 }
 0x190   : > { %v3280_v37 = vrot.slane %v3279_v30, 4  ;;  %v3092_v56 = vrot.slane %v3090_v52, 5  ;;  %2207 = vst.msk [vmem:[#allocation2 + $0xa0] sm:$0xff] %vm2186_vm10, %v6710_v32  ;;  %2208 = vst.msk [vmem:[#allocation2 + $0xa8] sm:$0xff] %vm2186_vm10, %v6711_v58  ;;  %v6705_v15 = vunpack.i.l.bf16 %v8354_v4  ;;  %v3287_v0 = vshrl.u32 %v6056_v11, 16 }
 0x191   : > { %6978 = vrot.lane.b32.xlu1 %v6977_v25, %s7094_s3  ;;  %6973 = vrot.lane.b32.xlu0 %v6972_v62, %s7094_s3  ;;  %v3078_v46 = vrot.slane %v3077_v50, 4  ;;  %v3087_v23 = vor.u32 %v3086_v39, %v3082_v48  ;;  %v3275_v21 = vsel %vm7180_vm2, %v3270_v18, %v3274_v31  ;;  %2192 = vst.msk [vmem:[#allocation2 + $0x28] sm:$0xff] %vm2186_vm10, %v6706_v42  ;;  %v3290_v34 = vshll.u32 %v6056_v11, 16  ;;  %v8549_v38 = vpop.permute.xlu1 %6798  ;;  %v7024_v18 = vld [vmem:[%s9298_s1 + $0x10] ss:$0 sps:$4 sm:$0x33]  }
 0x192   : > { %v3285_v35 = vsel %vm7180_vm2, %v3280_v37, %v3284_v6  ;;  %v3296_v54 = vshll.u32 %v6057_v43, 16  ;;  %v3370_v25 = vunpack.c.l.bf16 %v3275_v21  ;;  %2191 = vst.msk [vmem:[#allocation2 + $0x20] sm:$0xff] %vm2186_vm10, %v6705_v15  ;;  %v3289_v62 = vrot.slane %v3287_v0, 4  ;;  %v8553_v50 = vpop.permute.xlu0 %6793  ;;  %v3969_v15 = vld [vmem:[#allocation2 + $0x8] sm:$0xff]  ;;  %6330 = vmatprep.subr.msk.bf16.mxu0 %vm4085_vm15, %v7024_v18  ;;  %6331 = vmatprep.subr.msk.bf16.mxu1 %vm4085_vm15, %v7024_v18  ;;  %s7098_s3 = smov [#allocation3]  }
 0x193   : > { %v3371_v12 = vunpack.c.l.bf16 %v3285_v35  ;;  %v3083_v4 = vsel %vm7180_vm2, %v3078_v46, %v3082_v48  ;;  %v3088_v14 = vrot.slane %v3087_v23, 4  ;;  %v3292_v17 = vrot.slane %v3290_v34, 5  ;;  %v3968_v23 = vld [vmem:[#allocation2] sm:$0xff] }
 0x194   : > { %v3354_v33 = vunpack.c.l.bf16 %v3083_v4  ;;  %v3298_v7 = vrot.slane %v3296_v54, 5  ;;  %v3300_v44 = vshrl.u32 %v6057_v43, 16  ;;  %v3306_v61 = vshll.u32 %v6058_v40, 16  ;;  %v3984_v34 = vld [vmem:[#allocation2 + $0x80] sm:$0xff]  ;;  %v3985_v54 = vld [vmem:[#allocation2 + $0x88] sm:$0xff] }
 0x195   : > { %v6987_v9 = vpack.i.bf16 %v3371_v12, %v3370_v25  ;;  %v3093_v3 = vsel %vm7180_vm2, %v3088_v14, %v3092_v56  ;;  %v3293_v31 = vor.u32 %v3292_v17, %v3289_v62  ;;  %v3095_v5 = vshrl.u32 %v6032_v51, 16  ;;  %v8563_v25 = vpop.permute.xlu1 %6808  ;;  %v6101_v14 = vld [vmem:[%s7168_s25 + $0xc0] sm:$0xe] }
 0x196   : > { %v3355_v36 = vunpack.c.l.bf16 %v3093_v3  ;;  %v3098_v6 = vshll.u32 %v6032_v51, 16  ;;  %v3302_v63 = vrot.slane %v3300_v44, 4  ;;  %v3308_v29 = vrot.slane %v3306_v61, 5  ;;  %v6102_v51 = vld [vmem:[%s7168_s25 + $0xc4] sm:$0xf] }
 0x197   : > { %6988 = vrot.lane.b32.xlu1 %v6987_v9, %s7095_s4  ;;  %v3104_v22 = vshll.u32 %v6033_v8, 16  ;;  %v3108_v28 = vshrl.u32 %v6033_v8, 16  ;;  %v3294_v48 = vrot.slane %v3293_v31, 4  ;;  %v3097_v52 = vrot.slane %v3095_v5, 4  ;;  %v6077_v8 = vld [vmem:[%s7168_s25 + $0x60] sm:$0xe]  ;;  %v8584_v31 = vpop.permute.xlu0 %6803 }
 0x198   : > { %v6982_v30 = vpack.i.bf16 %v3355_v36, %v3354_v33  ;;  %v3100_v11 = vrot.slane %v3098_v6, 5  ;;  %v3303_v39 = vor.u32 %v3302_v63, %v3298_v7  ;;  %v3114_v43 = vshll.u32 %v6034_v1, 16  ;;  %v6078_v61 = vld [vmem:[%s7168_s25 + $0x64] sm:$0xf]  ;;  %v6079_v36 = vld [vmem:[%s7168_s25 + $0x68] sm:$0x1] }
 0x199   : > { %v3106_v58 = vrot.slane %v3104_v22, 5  ;;  %v3110_v32 = vrot.slane %v3108_v28, 4  ;;  %v3299_v37 = vsel %vm7180_vm2, %v3294_v48, %v3298_v7  ;;  %v6721_v42 = vunpack.i.h.bf16 %v8370_v24  ;;  %v6103_v7 = vld [vmem:[%s7168_s25 + $0xc8] sm:$0x1]  ;;  %v6105_v48 = vld [vmem:[%s7168_s25 + $0xd0] sm:$0xf] }
 0x19a   : > { %6983 = vrot.lane.b32.xlu0 %v6982_v30, %s7095_s4  ;;  %v3101_v56 = vor.u32 %v3100_v11, %v3097_v52  ;;  %v6720_v46 = vunpack.i.l.bf16 %v8370_v24  ;;  %v3304_v0 = vrot.slane %v3303_v39, 4  ;;  %v3372_v21 = vunpack.c.l.bf16 %v3299_v37 }
 0x19b   : > { %v3111_v35 = vor.u32 %v3110_v32, %v3106_v58  ;;  %v3116_v40 = vrot.slane %v3114_v43, 5  ;;  %2210 = vst.msk [vmem:[#allocation2 + $0xb8] sm:$0xff] %vm2186_vm10, %v6721_v42  ;;  %v6716_v24 = vunpack.i.h.bf16 %v8375_v10  ;;  %v6715_v4 = vunpack.i.l.bf16 %v8375_v10  ;;  %v3971_v32 = vld [vmem:[#allocation2 + $0x18] sm:$0xff] }
 0x19c   : > { %v3102_v12 = vrot.slane %v3101_v56, 4  ;;  %2209 = vst.msk [vmem:[#allocation2 + $0xb0] sm:$0xff] %vm2186_vm10, %v6720_v46  ;;  %v3309_v33 = vsel %vm7180_vm2, %v3304_v0, %v3308_v29  ;;  %v4000_v17 = vpack.c.bf16 %v3969_v15, %v3968_v23  ;;  %v4008_v3 = vpack.c.bf16 %v3985_v54, %v3984_v34  ;;  %v3986_v46 = vld [vmem:[#allocation2 + $0x90] sm:$0xff]  ;;  %v3987_v23 = vld [vmem:[#allocation2 + $0x98] sm:$0xff]  ;;  %v6104_v15 = vld [vmem:[%s7168_s25 + $0xcc] sm:$0xe] }
 0x19d   : > { %v3112_v62 = vrot.slane %v3111_v35, 4  ;;  %v3373_v9 = vunpack.c.l.bf16 %v3309_v33  ;;  %2193 = vst.msk [vmem:[#allocation2 + $0x30] sm:$0xff] %vm2186_vm10, %v6715_v4  ;;  %2194 = vst.msk [vmem:[#allocation2 + $0x38] sm:$0xff] %vm2186_vm10, %v6716_v24  ;;  %v4087_v44 = vsel %vm4085_vm15, %v7024_v18, 0  ;;  %v6121_v6 = vrot.slane %v6101_v14, 9 }
 0x19e   : > { %v3107_v10 = vsel %vm7180_vm2, %v3102_v12, %v3106_v58  ;;  %6292 = vmatprep.mubr.msk.bf16.mxu0 %vm4036_vm0, %v4000_v17  ;;  %6291 = vmatpush3.bf16.msra.mxu0 %v4087_v44  ;;  %v3731_v63 = vrot.slane %v6102_v51, 5  ;;  %v3734_v28 = vrot.slane %v6103_v7, 5  ;;  %v6113_v30 = vrot.slane %v6077_v8, 9  ;;  %v3970_v58 = vld [vmem:[#allocation2 + $0x10] sm:$0xff]  ;;  %v8593_v43 = vpop.permute.xlu1 %6818  ;;  %v6080_v54 = vld [vmem:[%s7168_s25 + $0x6c] sm:$0xe] }
 0x19f   : > { %v3117_v1 = vsel %vm7180_vm2, %v3112_v62, %v3116_v40  ;;  %v3356_v5 = vunpack.c.l.bf16 %v3107_v10  ;;  %v6997_v29 = vpack.i.bf16 %v3373_v9, %v3372_v21  ;;  %6308 = vmatprep.mubr.msk.bf16.mxu1 %vm4036_vm0, %v4008_v3  ;;  %6329 = vmatpush3.bf16.msra.mxu1 %v4087_v44  ;;  %v3675_v11 = vrot.slane %v6078_v61, 5  ;;  %v6106_v34 = vld [vmem:[%s7168_s25 + $0xd4] sm:$0x1]  ;;  %v6081_v14 = vld [vmem:[%s7168_s25 + $0x70] sm:$0xf] }
 0x1a0   : > { %v3357_v22 = vunpack.c.l.bf16 %v3117_v1  ;;  %v3732_v52 = vsel %vm7298_vm5, %v6121_v6, %v3731_v63  ;;  %v3733_v26 = vrot.slane %v3731_v63, 4  ;;  %v3678_v39 = vrot.slane %v6079_v36, 5  ;;  %v6082_v51 = vld [vmem:[%s7168_s25 + $0x74] sm:$0x1]  ;;  %s5751_s25 = sshll.u32 %s8924_s23, 4  ;;  %s9249_s25 = int_to_ptr.vmem [resolvable:$true] %s5751_s25 }
 0x1a1   : > { %6998 = vrot.lane.b32.xlu1 %v6997_v29, %s7095_s4  ;;  %v3803_v37 = vunpack.c.l.bf16 %v3732_v52  ;;  %v6731_v56 = vunpack.i.h.bf16 %v8383_v59  ;;  %v6730_v42 = vunpack.i.l.bf16 %v8383_v59  ;;  %v3676_v21 = vsel %vm7298_vm5, %v6113_v30, %v3675_v11  ;;  %v8612_v33 = vpop.permute.xlu0 %6813  ;;  %s7025_s30 = scalar_lea.vmem %s9249_s25, 1024 }
 0x1a2   : > { %v6992_v18 = vpack.i.bf16 %v3357_v22, %v3356_v5  ;;  %v3735_v0 = vsel %vm7298_vm5, %v3733_v26, %v3734_v28  ;;  %v3677_v35 = vrot.slane %v3675_v11, 4  ;;  %v6726_v40 = vunpack.i.h.bf16 %v8400_v16  ;;  %p7026_p11 = scmp.ne.s32.totalorder %s9249_s25, %s7025_s30 }
 0x1a3   : > { %v3804_v12 = vunpack.c.l.bf16 %v3735_v0  ;;  %v3787_v59 = vunpack.c.l.bf16 %v3676_v21  ;;  %2640 = vst.msk [vmem:[#allocation2 + $0xa0] sm:$0xff] %vm2619_vm11, %v6730_v42  ;;  %2641 = vst.msk [vmem:[#allocation2 + $0xa8] sm:$0xff] %vm2619_vm11, %v6731_v56  ;;  %v6725_v24 = vunpack.i.l.bf16 %v8400_v16  ;;  %v4001_v4 = vpack.c.bf16 %v3971_v32, %v3970_v58 }
 0x1a4   : > { %6993 = vrot.lane.b32.xlu0 %v6992_v18, %s7095_s4  ;;  %v3679_v62 = vsel %vm7298_vm5, %v3677_v35, %v3678_v39  ;;  %2625 = vst.msk [vmem:[#allocation2 + $0x28] sm:$0xff] %vm2619_vm11, %v6726_v40  ;;  %v4009_v17 = vpack.c.bf16 %v3987_v23, %v3986_v46  ;;  %v6122_v7 = vrot.slane %v6104_v15, 9  ;;  %v3738_v8 = vrot.slane %v6105_v48, 5  ;;  %p7027_p12 = pnand %p7026_p11, %p7153_p5  ;;  %s7029_s4 = sshll.u32 %s7098_s3, 4  ;;  %s7030_s4 = int_to_ptr.vmem [resolvable:$false] %s7029_s4 }
 0x1a5   : > { %v7007_v9 = vpack.i.bf16 %v3804_v12, %v3803_v37  ;;  %v3788_v10 = vunpack.c.l.bf16 %v3679_v62  ;;  %2624 = vst.msk [vmem:[#allocation2 + $0x20] sm:$0xff] %vm2619_vm11, %v6725_v24  ;;  %6293 = vmatmul.mubr.msk.bf16.vlgmr.msra.gmra.mrb[0].mxu0 %vm4036_vm0, %v4001_v4  ;;  %v3741_v16 = vrot.slane %v6106_v34, 5  ;;  %v6114_v3 = vrot.slane %v6080_v54, 9  ;;  %p7032_p0 = scmp.lt.s32.totalorder %s9249_s25, %s7030_s4 }
 0x1a6   : > { %6309 = vmatmul.mubr.msk.bf16.vlgmr.msra.gmra.mrb[0].mxu1 %vm4036_vm0, %v4009_v17  ;;  %v3739_v44 = vsel %vm7298_vm5, %v6122_v7, %v3738_v8  ;;  %v3740_v61 = vrot.slane %v3738_v8, 4  ;;  %v3682_v36 = vrot.slane %v6081_v14, 5  ;;  %v3685_v1 = vrot.slane %v6082_v51, 5  ;;  %p7028_p13 = pneg %p7027_p12 }
 0x1a7   : > { %7008 = vrot.lane.b32.xlu1 %v7007_v9, %s7096_s5  ;;  %v7002_v6 = vpack.i.bf16 %v3788_v10, %v3787_v59  ;;  %v3805_v63 = vunpack.c.l.bf16 %v3739_v44  ;;  %v6741_v29 = vunpack.i.h.bf16 %v8406_v2  ;;  %v6740_v22 = vunpack.i.l.bf16 %v8406_v2 }
 0x1a8   : > { %v8622_v5 = vpop.permute.xlu1 %6828  ;;  %v3742_v28 = vsel %vm7298_vm5, %v3740_v61, %v3741_v16  ;;  %v3683_v30 = vsel %vm7298_vm5, %v6114_v3, %v3682_v36  ;;  %v3684_v48 = vrot.slane %v3682_v36, 4  ;;  %v6736_v52 = vunpack.i.h.bf16 %v8411_v55 }
 0x1a9   : > { %7003 = vrot.lane.b32.xlu0 %v7002_v6, %s7096_s5  ;;  %v3806_v26 = vunpack.c.l.bf16 %v3742_v28  ;;  %v3789_v11 = vunpack.c.l.bf16 %v3683_v30  ;;  %2642 = vst.msk [vmem:[#allocation2 + $0xb0] sm:$0xff] %vm2619_vm11, %v6740_v22  ;;  %2643 = vst.msk [vmem:[#allocation2 + $0xb8] sm:$0xff] %vm2619_vm11, %v6741_v29  ;;  %v6735_v39 = vunpack.i.l.bf16 %v8411_v55  ;;  %v6751_v2 = vunpack.i.h.bf16 %v8424_v20 }
 0x1aa   : > { %v3686_v32 = vsel %vm7298_vm5, %v3684_v48, %v3685_v1  ;;  %2627 = vst.msk [vmem:[#allocation2 + $0x38] sm:$0xff] %vm2619_vm11, %v6736_v52  ;;  %v6750_v18 = vunpack.i.l.bf16 %v8424_v20  ;;  %v6746_v37 = vunpack.i.h.bf16 %v8436_v57  ;;  %v6745_v56 = vunpack.i.l.bf16 %v8436_v57 }
 0x1ab   : > { %v8637_v58 = vpop.permute.xlu0 %6823  ;;  %v7017_v42 = vpack.i.bf16 %v3806_v26, %v3805_v63  ;;  %v3790_v46 = vunpack.c.l.bf16 %v3686_v32  ;;  %2626 = vst.msk [vmem:[#allocation2 + $0x30] sm:$0xff] %vm2619_vm11, %v6735_v39  ;;  %v6761_v55 = vunpack.i.h.bf16 %v8451_v60  ;;  %v6760_v23 = vunpack.i.l.bf16 %v8451_v60 }
 0x1ac   : > { %2867 = vst.msk [vmem:[#allocation2 + $0xa8] sm:$0xff] %vm2845_vm12, %v6751_v2  ;;  %v8649_v27 = vpop.permute.xlu1 %6838  ;;  %2866 = vst.msk [vmem:[#allocation2 + $0xa0] sm:$0xff] %vm2845_vm12, %v6750_v18  ;;  %v6756_v20 = vunpack.i.h.bf16 %v8463_v41  ;;  %v6755_v57 = vunpack.i.l.bf16 %v8463_v41  ;;  %v6771_v15 = vunpack.i.h.bf16 %v8478_v19  ;;  %v6770_v0 = vunpack.i.l.bf16 %v8478_v19 }
 0x1ad   : > { %2850 = vst.msk [vmem:[#allocation2 + $0x20] sm:$0xff] %vm2845_vm12, %v6745_v56  ;;  %2851 = vst.msk [vmem:[#allocation2 + $0x28] sm:$0xff] %vm2845_vm12, %v6746_v37  ;;  %7018 = vrot.lane.b32.xlu1 %v7017_v42, %s7096_s5  ;;  %v7012_v21 = vpack.i.bf16 %v3790_v46, %v3789_v11  ;;  %v6766_v60 = vunpack.i.h.bf16 %v8494_v53  ;;  %v6765_v35 = vunpack.i.l.bf16 %v8494_v53  ;;  %v6781_v40 = vunpack.i.h.bf16 %v8510_v13 }
 0x1ae   : > { %2868 = vst.msk [vmem:[#allocation2 + $0xb0] sm:$0xff] %vm2845_vm12, %v6760_v23  ;;  %2869 = vst.msk [vmem:[#allocation2 + $0xb8] sm:$0xff] %vm2845_vm12, %v6761_v55  ;;  %v6780_v41 = vunpack.i.l.bf16 %v8510_v13  ;;  %v6776_v19 = vunpack.i.h.bf16 %v8517_v47  ;;  %v6775_v54 = vunpack.i.l.bf16 %v8517_v47  ;;  %v6791_v53 = vunpack.i.h.bf16 %v8526_v45 }
 0x1af   : > { %v8664_v34 = vpop.permute.xlu0 %6833  ;;  %2852 = vst.msk [vmem:[#allocation2 + $0x30] sm:$0xff] %vm2845_vm12, %v6755_v57  ;;  %2853 = vst.msk [vmem:[#allocation2 + $0x38] sm:$0xff] %vm2845_vm12, %v6756_v20  ;;  %7013 = vrot.lane.b32.xlu0 %v7012_v21, %s7096_s5  ;;  %v6790_v12 = vunpack.i.l.bf16 %v8526_v45  ;;  %v6786_v59 = vunpack.i.h.bf16 %v8540_v49  ;;  %v6785_v13 = vunpack.i.l.bf16 %v8540_v49  ;;  %v6801_v24 = vunpack.i.h.bf16 %v8549_v38  ;;  %s7031_s5 = scalar_lea.vmem %s7030_s4, 2048 }
 0x1b0   : > { %3523 = vst.msk [vmem:[#allocation2 + $0xa0] sm:$0xff] %vm3502_vm13, %v6770_v0  ;;  %3524 = vst.msk [vmem:[#allocation2 + $0xa8] sm:$0xff] %vm3502_vm13, %v6771_v15  ;;  %v6800_v47 = vunpack.i.l.bf16 %v8549_v38  ;;  %v6796_v4 = vunpack.i.h.bf16 %v8553_v50  ;;  %v6795_v45 = vunpack.i.l.bf16 %v8553_v50  ;;  %v6811_v14 = vunpack.i.h.bf16 %v8563_v25  ;;  %p7033_p1 = scmp.lt.s32.totalorder %s7031_s5, %s7025_s30 }
 0x1b1   : > { %3507 = vst.msk [vmem:[#allocation2 + $0x20] sm:$0xff] %vm3502_vm13, %v6765_v35  ;;  %3508 = vst.msk [vmem:[#allocation2 + $0x28] sm:$0xff] %vm3502_vm13, %v6766_v60  ;;  %v6810_v49 = vunpack.i.l.bf16 %v8563_v25  ;;  %v6806_v51 = vunpack.i.h.bf16 %v8584_v31  ;;  %v6805_v38 = vunpack.i.l.bf16 %v8584_v31  ;;  %v6821_v62 = vunpack.i.h.bf16 %v8593_v43 }
 0x1b2   : > { %3526 = vst.msk [vmem:[#allocation2 + $0xb8] sm:$0xff] %vm3502_vm13, %v6781_v40  ;;  %3525 = vst.msk [vmem:[#allocation2 + $0xb0] sm:$0xff] %vm3502_vm13, %v6780_v41  ;;  %v6820_v50 = vunpack.i.l.bf16 %v8593_v43  ;;  %v6816_v7 = vunpack.i.h.bf16 %v8612_v33  ;;  %v6815_v25 = vunpack.i.l.bf16 %v8612_v33  ;;  %v6831_v8 = vunpack.i.h.bf16 %v8622_v5  ;;  %p7034_p2 = por %p7033_p1, %p7032_p0 }
 0x1b3   : > { %3509 = vst.msk [vmem:[#allocation2 + $0x30] sm:$0xff] %vm3502_vm13, %v6775_v54  ;;  %3510 = vst.msk [vmem:[#allocation2 + $0x38] sm:$0xff] %vm3502_vm13, %v6776_v19  ;;  %v6849_v17 = vpop.permute.xlu1 %6848  ;;  %v6830_v9 = vunpack.i.l.bf16 %v8622_v5  ;;  %v6826_v10 = vunpack.i.h.bf16 %v8637_v58  ;;  %v6825_v16 = vunpack.i.l.bf16 %v8637_v58  ;;  %v6841_v43 = vunpack.i.h.bf16 %v8649_v27 }
 0x1b4   : > { %3957 = vst.msk [vmem:[#allocation2 + $0xa8] sm:$0xff] %vm3935_vm14, %v6791_v53  ;;  %3956 = vst.msk [vmem:[#allocation2 + $0xa0] sm:$0xff] %vm3935_vm14, %v6790_v12  ;;  %v6844_v31 = vpop.permute.xlu0 %6843  ;;  %v6840_v33 = vunpack.i.l.bf16 %v8649_v27  ;;  %v6836_v3 = vunpack.i.h.bf16 %v8664_v34  ;;  %v6835_v44 = vunpack.i.l.bf16 %v8664_v34  ;;  %v6851_v61 = vunpack.i.h.bf16 %v6849_v17  ;;  %p7035_p3 = pnand %p7034_p2, %p7028_p13 }
 0x1b5   : > { %3940 = vst.msk [vmem:[#allocation2 + $0x20] sm:$0xff] %vm3935_vm14, %v6785_v13  ;;  %3941 = vst.msk [vmem:[#allocation2 + $0x28] sm:$0xff] %vm3935_vm14, %v6786_v59  ;;  %v6850_v36 = vunpack.i.l.bf16 %v6849_v17  ;;  %v6846_v1 = vunpack.i.h.bf16 %v6844_v31  ;;  %v6845_v5 = vunpack.i.l.bf16 %v6844_v31  ;;  %vm5660_vm2 = vcmask 1042434  }
 0x1b6   : > { %3959 = vst.msk [vmem:[#allocation2 + $0xb8] sm:$0xff] %vm3935_vm14, %v6801_v24  ;;  %3958 = vst.msk [vmem:[#allocation2 + $0xb0] sm:$0xff] %vm3935_vm14, %v6800_v47  ;;  %vm5666_vm5 = vcmask 1045509   ;;  %vm5668_vm6 = vcmask 1046534   ;;  %vm5670_vm7 = vcmask 1047559  }
 0x1b7   : > { %3942 = vst.msk [vmem:[#allocation2 + $0x30] sm:$0xff] %vm3935_vm14, %v6795_v45  ;;  %3943 = vst.msk [vmem:[#allocation2 + $0x38] sm:$0xff] %vm3935_vm14, %v6796_v4  ;;  %v6859_v6 = vpop.permute.xlu1 %6858 }
 0x1b8   : > { %1557 = vst.msk [vmem:[#allocation2 + $0xd8] sm:$0xff] %vm1529_vm9, %v6811_v14  ;;  %1556 = vst.msk [vmem:[#allocation2 + $0xd0] sm:$0xff] %vm1529_vm9, %v6810_v49  ;;  %v6861_v63 = vunpack.i.h.bf16 %v6859_v6  ;;  %v6860_v29 = vunpack.i.l.bf16 %v6859_v6  ;;  %v6854_v22 = vpop.permute.xlu0 %6853 }
 0x1b9   : > { %1554 = vst.msk [vmem:[#allocation2 + $0xc0] sm:$0xff] %vm1529_vm9, %v6805_v38  ;;  %1555 = vst.msk [vmem:[#allocation2 + $0xc8] sm:$0xff] %vm1529_vm9, %v6806_v51  ;;  %v6856_v30 = vunpack.i.h.bf16 %v6854_v22  ;;  %v6855_v48 = vunpack.i.l.bf16 %v6854_v22 }
 0x1ba   : > { %2211 = vst.msk [vmem:[#allocation2 + $0xc0] sm:$0xff] %vm2186_vm10, %v6820_v50  ;;  %2212 = vst.msk [vmem:[#allocation2 + $0xc8] sm:$0xff] %vm2186_vm10, %v6821_v62 }
 0x1bb   : > { %2195 = vst.msk [vmem:[#allocation2 + $0x40] sm:$0xff] %vm2186_vm10, %v6815_v25  ;;  %2196 = vst.msk [vmem:[#allocation2 + $0x48] sm:$0xff] %vm2186_vm10, %v6816_v7  ;;  %v3989_v28 = vld [vmem:[#allocation2 + $0xa8] sm:$0xff]  ;;  %v3988_v11 = vld [vmem:[#allocation2 + $0xa0] sm:$0xff]  ;;  %v6869_v37 = vpop.permute.xlu1 %6868 }
 0x1bc   : > { %2214 = vst.msk [vmem:[#allocation2 + $0xd8] sm:$0xff] %vm2186_vm10, %v6831_v8  ;;  %2213 = vst.msk [vmem:[#allocation2 + $0xd0] sm:$0xff] %vm2186_vm10, %v6830_v9  ;;  %v3972_v52 = vld [vmem:[#allocation2 + $0x20] sm:$0xff]  ;;  %v3973_v26 = vld [vmem:[#allocation2 + $0x28] sm:$0xff]  ;;  %v4010_v2 = vpack.c.bf16 %v3989_v28, %v3988_v11  ;;  %v6871_v46 = vunpack.i.h.bf16 %v6869_v37  ;;  %v6870_v55 = vunpack.i.l.bf16 %v6869_v37  ;;  %v6864_v23 = vpop.permute.xlu0 %6863 }
 0x1bd   : > { %2197 = vst.msk [vmem:[#allocation2 + $0x50] sm:$0xff] %vm2186_vm10, %v6825_v16  ;;  %2198 = vst.msk [vmem:[#allocation2 + $0x58] sm:$0xff] %vm2186_vm10, %v6826_v10  ;;  %v4002_v39 = vpack.c.bf16 %v3973_v26, %v3972_v52  ;;  %v3990_v18 = vld [vmem:[#allocation2 + $0xb0] sm:$0xff]  ;;  %v3991_v42 = vld [vmem:[#allocation2 + $0xb8] sm:$0xff]  ;;  %v6866_v20 = vunpack.i.h.bf16 %v6864_v23  ;;  %v6865_v57 = vunpack.i.l.bf16 %v6864_v23 }
 0x1be   : > { %2645 = vst.msk [vmem:[#allocation2 + $0xc8] sm:$0xff] %vm2619_vm11, %v6841_v43  ;;  %2644 = vst.msk [vmem:[#allocation2 + $0xc0] sm:$0xff] %vm2619_vm11, %v6840_v33  ;;  %v3974_v58 = vld [vmem:[#allocation2 + $0x30] sm:$0xff]  ;;  %v3975_v32 = vld [vmem:[#allocation2 + $0x38] sm:$0xff]  ;;  %6312 = vmatprep.mubr.msk.bf16.mxu1 %vm4036_vm0, %v4010_v2  ;;  %v4011_v27 = vpack.c.bf16 %v3991_v42, %v3990_v18 }
 0x1bf   : > { %2628 = vst.msk [vmem:[#allocation2 + $0x40] sm:$0xff] %vm2619_vm11, %v6835_v44  ;;  %2629 = vst.msk [vmem:[#allocation2 + $0x48] sm:$0xff] %vm2619_vm11, %v6836_v3  ;;  %v4003_v56 = vpack.c.bf16 %v3975_v32, %v3974_v58  ;;  %6296 = vmatprep.mubr.msk.bf16.mxu0 %vm4036_vm0, %v4002_v39 }
 0x1c0   : > { %2647 = vst.msk [vmem:[#allocation2 + $0xd8] sm:$0xff] %vm2619_vm11, %v6851_v61  ;;  %2646 = vst.msk [vmem:[#allocation2 + $0xd0] sm:$0xff] %vm2619_vm11, %v6850_v36  ;;  %6313 = vmatmul.mubr.msk.bf16.gmra.mrb[4].mxu1 %vm4036_vm0, %v4011_v27 }
 0x1c1   : > { %2630 = vst.msk [vmem:[#allocation2 + $0x50] sm:$0xff] %vm2619_vm11, %v6845_v5  ;;  %2631 = vst.msk [vmem:[#allocation2 + $0x58] sm:$0xff] %vm2619_vm11, %v6846_v1  ;;  %6297 = vmatmul.mubr.msk.bf16.gmra.mrb[4].mxu0 %vm4036_vm0, %v4003_v56 }
 0x1c2   : > { %2870 = vst.msk [vmem:[#allocation2 + $0xc0] sm:$0xff] %vm2845_vm12, %v6860_v29  ;;  %2871 = vst.msk [vmem:[#allocation2 + $0xc8] sm:$0xff] %vm2845_vm12, %v6861_v63  ;;  %v6879_v15 = vpop.permute.xlu1 %6878 }
 0x1c3   : > { %2854 = vst.msk [vmem:[#allocation2 + $0x40] sm:$0xff] %vm2845_vm12, %v6855_v48  ;;  %2855 = vst.msk [vmem:[#allocation2 + $0x48] sm:$0xff] %vm2845_vm12, %v6856_v30  ;;  %v6881_v0 = vunpack.i.h.bf16 %v6879_v15  ;;  %v6880_v21 = vunpack.i.l.bf16 %v6879_v15 }
 0x1c4   : > { %2872 = vst.msk [vmem:[#allocation2 + $0xd0] sm:$0xff] %vm2845_vm12, %v6870_v55  ;;  %2873 = vst.msk [vmem:[#allocation2 + $0xd8] sm:$0xff] %vm2845_vm12, %v6871_v46 }
 0x1c5   : > { %2856 = vst.msk [vmem:[#allocation2 + $0x50] sm:$0xff] %vm2845_vm12, %v6865_v57  ;;  %2857 = vst.msk [vmem:[#allocation2 + $0x58] sm:$0xff] %vm2845_vm12, %v6866_v20  ;;  %v6874_v60 = vpop.permute.xlu0 %6873 }
 0x1c6   : > { %3527 = vst.msk [vmem:[#allocation2 + $0xc0] sm:$0xff] %vm3502_vm13, %v6880_v21  ;;  %3528 = vst.msk [vmem:[#allocation2 + $0xc8] sm:$0xff] %vm3502_vm13, %v6881_v0  ;;  %v6876_v35 = vunpack.i.h.bf16 %v6874_v60  ;;  %v6875_v40 = vunpack.i.l.bf16 %v6874_v60 }
 0x1c8   : > { %3511 = vst.msk [vmem:[#allocation2 + $0x40] sm:$0xff] %vm3502_vm13, %v6875_v40  ;;  %3512 = vst.msk [vmem:[#allocation2 + $0x48] sm:$0xff] %vm3502_vm13, %v6876_v35 }
 0x1cd   : > { %v6889_v34 = vpop.permute.xlu1 %6888 }
 0x1ce   : > { %v6891_v41 = vunpack.i.h.bf16 %v6889_v34  ;;  %v6890_v19 = vunpack.i.l.bf16 %v6889_v34 }
 0x1cf   : > { %v6884_v54 = vpop.permute.xlu0 %6883 }
 0x1d0   : > { %3529 = vst.msk [vmem:[#allocation2 + $0xd0] sm:$0xff] %vm3502_vm13, %v6890_v19  ;;  %3530 = vst.msk [vmem:[#allocation2 + $0xd8] sm:$0xff] %vm3502_vm13, %v6891_v41  ;;  %v6886_v53 = vunpack.i.h.bf16 %v6884_v54  ;;  %v6885_v12 = vunpack.i.l.bf16 %v6884_v54 }
 0x1d1   : > { %v6899_v59 = vpop.permute.xlu1 %6898 }
 0x1d2   : > { %3513 = vst.msk [vmem:[#allocation2 + $0x50] sm:$0xff] %vm3502_vm13, %v6885_v12  ;;  %3514 = vst.msk [vmem:[#allocation2 + $0x58] sm:$0xff] %vm3502_vm13, %v6886_v53  ;;  %v6901_v13 = vunpack.i.h.bf16 %v6899_v59  ;;  %v6900_v24 = vunpack.i.l.bf16 %v6899_v59 }
 0x1d3   : > { %v6894_v47 = vpop.permute.xlu0 %6893 }
 0x1d4   : > { %3960 = vst.msk [vmem:[#allocation2 + $0xc0] sm:$0xff] %vm3935_vm14, %v6900_v24  ;;  %3961 = vst.msk [vmem:[#allocation2 + $0xc8] sm:$0xff] %vm3935_vm14, %v6901_v13  ;;  %v6896_v4 = vunpack.i.h.bf16 %v6894_v47  ;;  %v6895_v45 = vunpack.i.l.bf16 %v6894_v47 }
 0x1d6   : > { %3944 = vst.msk [vmem:[#allocation2 + $0x40] sm:$0xff] %vm3935_vm14, %v6895_v45  ;;  %3945 = vst.msk [vmem:[#allocation2 + $0x48] sm:$0xff] %vm3935_vm14, %v6896_v4 }
 0x1d7   : > { %v6909_v14 = vpop.permute.xlu1 %6908 }
 0x1d8   : > { %v6911_v49 = vunpack.i.h.bf16 %v6909_v14  ;;  %v6910_v51 = vunpack.i.l.bf16 %v6909_v14 }
 0x1d9   : > { %v6904_v38 = vpop.permute.xlu0 %6903 }
 0x1da   : > { %v6906_v62 = vunpack.i.h.bf16 %v6904_v38  ;;  %v6905_v17 = vunpack.i.l.bf16 %v6904_v38  ;;  %3962 = vst.msk [vmem:[#allocation2 + $0xd0] sm:$0xff] %vm3935_vm14, %v6910_v51  ;;  %3963 = vst.msk [vmem:[#allocation2 + $0xd8] sm:$0xff] %vm3935_vm14, %v6911_v49 }
 0x1db   : > { %v3992_v50 = vld [vmem:[#allocation2 + $0xc0] sm:$0xff]  ;;  %v3993_v7 = vld [vmem:[#allocation2 + $0xc8] sm:$0xff]  ;;  %v6919_v25 = vpop.permute.xlu1 %6918 }
 0x1dc   : > { %3946 = vst.msk [vmem:[#allocation2 + $0x50] sm:$0xff] %vm3935_vm14, %v6905_v17  ;;  %3947 = vst.msk [vmem:[#allocation2 + $0x58] sm:$0xff] %vm3935_vm14, %v6906_v62  ;;  %v4012_v8 = vpack.c.bf16 %v3993_v7, %v3992_v50  ;;  %v6921_v31 = vunpack.i.h.bf16 %v6919_v25  ;;  %v6920_v9 = vunpack.i.l.bf16 %v6919_v25 }
 0x1dd   : > { %v6914_v10 = vpop.permute.xlu0 %6913  ;;  %v3976_v33 = vld [vmem:[#allocation2 + $0x40] sm:$0xff]  ;;  %v3977_v3 = vld [vmem:[#allocation2 + $0x48] sm:$0xff] }
 0x1de   : > { %v6916_v16 = vunpack.i.h.bf16 %v6914_v10  ;;  %v6915_v43 = vunpack.i.l.bf16 %v6914_v10  ;;  %6316 = vmatprep.mubr.msk.bf16.mxu1 %vm4036_vm0, %v4012_v8  ;;  %1560 = vst.msk [vmem:[#allocation2 + $0xf0] sm:$0xff] %vm1529_vm9, %v6920_v9  ;;  %1561 = vst.msk [vmem:[#allocation2 + $0xf8] sm:$0xff] %vm1529_vm9, %v6921_v31  ;;  %v4004_v44 = vpack.c.bf16 %v3977_v3, %v3976_v33 }
 0x1e0   : > { %1558 = vst.msk [vmem:[#allocation2 + $0xe0] sm:$0xff] %vm1529_vm9, %v6915_v43  ;;  %1559 = vst.msk [vmem:[#allocation2 + $0xe8] sm:$0xff] %vm1529_vm9, %v6916_v16  ;;  %6300 = vmatprep.mubr.msk.bf16.mxu0 %vm4036_vm0, %v4004_v44 }
 0x1e1   : > { %v3994_v61 = vld [vmem:[#allocation2 + $0xd0] sm:$0xff]  ;;  %v3995_v36 = vld [vmem:[#allocation2 + $0xd8] sm:$0xff] }
 0x1e2   : > { %v4013_v6 = vpack.c.bf16 %v3995_v36, %v3994_v61 }
 0x1e3   : > { %v3978_v1 = vld [vmem:[#allocation2 + $0x50] sm:$0xff]  ;;  %v3979_v5 = vld [vmem:[#allocation2 + $0x58] sm:$0xff] }
 0x1e4   : > { %v4005_v63 = vpack.c.bf16 %v3979_v5, %v3978_v1  ;;  %6317 = vmatmul.mubr.msk.bf16.gmra.mrb[8].mxu1 %vm4036_vm0, %v4013_v6 }
 0x1e5   : > { %v6929_v29 = vpop.permute.xlu1 %6928 }
 0x1e6   : > { %v6931_v22 = vunpack.i.h.bf16 %v6929_v29  ;;  %v6930_v28 = vunpack.i.l.bf16 %v6929_v29  ;;  %6301 = vmatmul.mubr.msk.bf16.gmra.mrb[8].mxu0 %vm4036_vm0, %v4005_v63 }
 0x1e8   : > { %2215 = vst.msk [vmem:[#allocation2 + $0xe0] sm:$0xff] %vm2186_vm10, %v6930_v28  ;;  %2216 = vst.msk [vmem:[#allocation2 + $0xe8] sm:$0xff] %vm2186_vm10, %v6931_v22  ;;  %v6924_v30 = vpop.permute.xlu0 %6923 }
 0x1e9   : > { %v6926_v48 = vunpack.i.h.bf16 %v6924_v30  ;;  %v6925_v52 = vunpack.i.l.bf16 %v6924_v30 }
 0x1eb   : > { %2199 = vst.msk [vmem:[#allocation2 + $0x60] sm:$0xff] %vm2186_vm10, %v6925_v52  ;;  %2200 = vst.msk [vmem:[#allocation2 + $0x68] sm:$0xff] %vm2186_vm10, %v6926_v48 }
 0x1ef   : > { %v6939_v26 = vpop.permute.xlu1 %6938 }
 0x1f0   : > { %v6941_v11 = vunpack.i.h.bf16 %v6939_v26  ;;  %v6940_v39 = vunpack.i.l.bf16 %v6939_v26 }
 0x1f2   : > { %2217 = vst.msk [vmem:[#allocation2 + $0xf0] sm:$0xff] %vm2186_vm10, %v6940_v39  ;;  %2218 = vst.msk [vmem:[#allocation2 + $0xf8] sm:$0xff] %vm2186_vm10, %v6941_v11  ;;  %v6934_v2 = vpop.permute.xlu0 %6933  ;;  %v7097_v39 = vmov 1983009808  }
 0x1f3   : > { %v6936_v58 = vunpack.i.h.bf16 %v6934_v2  ;;  %v6935_v32 = vunpack.i.l.bf16 %v6934_v2  ;;  %v6949_v18 = vpop.permute.xlu1 %6948  ;;  %v4284_v2 = vunpack.c.l.s4 %v7097_v39 }
 0x1f4   : > { %v6951_v37 = vunpack.i.h.bf16 %v6949_v18  ;;  %v6950_v56 = vunpack.i.l.bf16 %v6949_v18 }
 0x1f5   : > { %2201 = vst.msk [vmem:[#allocation2 + $0x70] sm:$0xff] %vm2186_vm10, %v6935_v32  ;;  %2202 = vst.msk [vmem:[#allocation2 + $0x78] sm:$0xff] %vm2186_vm10, %v6936_v58  ;;  %v4286_v58 = vlaneseq  ;;  %v4285_v32 = vunpack.c.0.s8 %v4284_v2 }
 0x1f6   : > { %2648 = vst.msk [vmem:[#allocation2 + $0xe0] sm:$0xff] %vm2619_vm11, %v6950_v56  ;;  %2649 = vst.msk [vmem:[#allocation2 + $0xe8] sm:$0xff] %vm2619_vm11, %v6951_v37  ;;  %v6944_v42 = vpop.permute.xlu0 %6943 }
 0x1f7   : > { %v6946_v46 = vunpack.i.h.bf16 %v6944_v42  ;;  %v6945_v55 = vunpack.i.l.bf16 %v6944_v42  ;;  %v4287_v18 = vshrl.u32 %v4286_v58, 7 }
 0x1f9   : > { %2632 = vst.msk [vmem:[#allocation2 + $0x60] sm:$0xff] %vm2619_vm11, %v6945_v55  ;;  %2633 = vst.msk [vmem:[#allocation2 + $0x68] sm:$0xff] %vm2619_vm11, %v6946_v46  ;;  %v8812_v37 = vsub.s32 %v4285_v32, %v4287_v18 }
 0x1fb   : > { %v6959_v23 = vpop.permute.xlu1 %6958  ;;  %v6954_v27 = vpop.permute.xlu0 %6953 }
 0x1fc   : > { %v6961_v20 = vunpack.i.h.bf16 %v6959_v23  ;;  %v6960_v57 = vunpack.i.l.bf16 %v6959_v23  ;;  %v6956_v15 = vunpack.i.h.bf16 %v6954_v27  ;;  %v6955_v0 = vunpack.i.l.bf16 %v6954_v27 }
 0x1fe   : > { %2650 = vst.msk [vmem:[#allocation2 + $0xf0] sm:$0xff] %vm2619_vm11, %v6960_v57  ;;  %2651 = vst.msk [vmem:[#allocation2 + $0xf8] sm:$0xff] %vm2619_vm11, %v6961_v20 }
 0x1ff   : > { %2634 = vst.msk [vmem:[#allocation2 + $0x70] sm:$0xff] %vm2619_vm11, %v6955_v0  ;;  %2635 = vst.msk [vmem:[#allocation2 + $0x78] sm:$0xff] %vm2619_vm11, %v6956_v15  ;;  %v6969_v21 = vpop.permute.xlu1 %6968  ;;  %v6964_v60 = vpop.permute.xlu0 %6963 }
 0x200   : > { %v6971_v35 = vunpack.i.h.bf16 %v6969_v21  ;;  %v6970_v40 = vunpack.i.l.bf16 %v6969_v21  ;;  %v6966_v34 = vunpack.i.h.bf16 %v6964_v60  ;;  %v6965_v41 = vunpack.i.l.bf16 %v6964_v60 }
 0x202   : > { %2874 = vst.msk [vmem:[#allocation2 + $0xe0] sm:$0xff] %vm2845_vm12, %v6970_v40  ;;  %2875 = vst.msk [vmem:[#allocation2 + $0xe8] sm:$0xff] %vm2845_vm12, %v6971_v35 }
 0x203   : > { %2858 = vst.msk [vmem:[#allocation2 + $0x60] sm:$0xff] %vm2845_vm12, %v6965_v41  ;;  %2859 = vst.msk [vmem:[#allocation2 + $0x68] sm:$0xff] %vm2845_vm12, %v6966_v34  ;;  %v6979_v19 = vpop.permute.xlu1 %6978  ;;  %v6974_v54 = vpop.permute.xlu0 %6973 }
 0x204   : > { %v6981_v53 = vunpack.i.h.bf16 %v6979_v19  ;;  %v6980_v12 = vunpack.i.l.bf16 %v6979_v19  ;;  %v6976_v59 = vunpack.i.h.bf16 %v6974_v54  ;;  %v6975_v13 = vunpack.i.l.bf16 %v6974_v54 }
 0x206   : > { %2876 = vst.msk [vmem:[#allocation2 + $0xf0] sm:$0xff] %vm2845_vm12, %v6980_v12  ;;  %2877 = vst.msk [vmem:[#allocation2 + $0xf8] sm:$0xff] %vm2845_vm12, %v6981_v53 }
 0x207   : > { %2860 = vst.msk [vmem:[#allocation2 + $0x70] sm:$0xff] %vm2845_vm12, %v6975_v13  ;;  %2861 = vst.msk [vmem:[#allocation2 + $0x78] sm:$0xff] %vm2845_vm12, %v6976_v59 }
 0x209   : > { %v6989_v24 = vpop.permute.xlu1 %6988 }
 0x20a   : > { %v6991_v47 = vunpack.i.h.bf16 %v6989_v24  ;;  %v6990_v4 = vunpack.i.l.bf16 %v6989_v24 }
 0x20c   : > { %3531 = vst.msk [vmem:[#allocation2 + $0xe0] sm:$0xff] %vm3502_vm13, %v6990_v4  ;;  %3532 = vst.msk [vmem:[#allocation2 + $0xe8] sm:$0xff] %vm3502_vm13, %v6991_v47  ;;  %v6984_v45 = vpop.permute.xlu0 %6983 }
 0x20d   : > { %v6986_v14 = vunpack.i.h.bf16 %v6984_v45  ;;  %v6985_v49 = vunpack.i.l.bf16 %v6984_v45 }
 0x20f   : > { %3515 = vst.msk [vmem:[#allocation2 + $0x60] sm:$0xff] %vm3502_vm13, %v6985_v49  ;;  %3516 = vst.msk [vmem:[#allocation2 + $0x68] sm:$0xff] %vm3502_vm13, %v6986_v14 }
 0x213   : > { %v6999_v51 = vpop.permute.xlu1 %6998 }
 0x214   : > { %v7001_v38 = vunpack.i.h.bf16 %v6999_v51  ;;  %v7000_v62 = vunpack.i.l.bf16 %v6999_v51 }
 0x216   : > { %v6994_v17 = vpop.permute.xlu0 %6993  ;;  %3533 = vst.msk [vmem:[#allocation2 + $0xf0] sm:$0xff] %vm3502_vm13, %v7000_v62  ;;  %3534 = vst.msk [vmem:[#allocation2 + $0xf8] sm:$0xff] %vm3502_vm13, %v7001_v38 }
 0x217   : > { %v6996_v50 = vunpack.i.h.bf16 %v6994_v17  ;;  %v6995_v7 = vunpack.i.l.bf16 %v6994_v17 }
 0x219   : > { %3517 = vst.msk [vmem:[#allocation2 + $0x70] sm:$0xff] %vm3502_vm13, %v6995_v7  ;;  %3518 = vst.msk [vmem:[#allocation2 + $0x78] sm:$0xff] %vm3502_vm13, %v6996_v50  ;;  %v7009_v25 = vpop.permute.xlu1 %7008 }
 0x21a   : > { %v7011_v8 = vunpack.i.h.bf16 %v7009_v25  ;;  %v7010_v31 = vunpack.i.l.bf16 %v7009_v25 }
 0x21b   : > { %v7004_v9 = vpop.permute.xlu0 %7003 }
 0x21c   : > { %3964 = vst.msk [vmem:[#allocation2 + $0xe0] sm:$0xff] %vm3935_vm14, %v7010_v31  ;;  %3965 = vst.msk [vmem:[#allocation2 + $0xe8] sm:$0xff] %vm3935_vm14, %v7011_v8  ;;  %v7006_v10 = vunpack.i.h.bf16 %v7004_v9  ;;  %v7005_v16 = vunpack.i.l.bf16 %v7004_v9 }
 0x21e   : > { %3948 = vst.msk [vmem:[#allocation2 + $0x60] sm:$0xff] %vm3935_vm14, %v7005_v16  ;;  %3949 = vst.msk [vmem:[#allocation2 + $0x68] sm:$0xff] %vm3935_vm14, %v7006_v10 }
 0x21f   : > { %v7019_v43 = vpop.permute.xlu1 %7018 }
 0x220   : > { %v7021_v33 = vunpack.i.h.bf16 %v7019_v43  ;;  %v7020_v3 = vunpack.i.l.bf16 %v7019_v43 }
 0x221   : > { %v7014_v44 = vpop.permute.xlu0 %7013 }
 0x222   : > { %3966 = vst.msk [vmem:[#allocation2 + $0xf0] sm:$0xff] %vm3935_vm14, %v7020_v3  ;;  %3967 = vst.msk [vmem:[#allocation2 + $0xf8] sm:$0xff] %vm3935_vm14, %v7021_v33  ;;  %v7016_v61 = vunpack.i.h.bf16 %v7014_v44  ;;  %v7015_v36 = vunpack.i.l.bf16 %v7014_v44 }
 0x223   : > { %v3996_v1 = vld [vmem:[#allocation2 + $0xe0] sm:$0xff]  ;;  %v3997_v5 = vld [vmem:[#allocation2 + $0xe8] sm:$0xff] }
 0x224   : > { %3950 = vst.msk [vmem:[#allocation2 + $0x70] sm:$0xff] %vm3935_vm14, %v7015_v36  ;;  %3951 = vst.msk [vmem:[#allocation2 + $0x78] sm:$0xff] %vm3935_vm14, %v7016_v61  ;;  %v4014_v6 = vpack.c.bf16 %v3997_v5, %v3996_v1 }
 0x225   : > { %v3980_v63 = vld [vmem:[#allocation2 + $0x60] sm:$0xff]  ;;  %v3981_v29 = vld [vmem:[#allocation2 + $0x68] sm:$0xff] }
 0x226   : > { %v4006_v22 = vpack.c.bf16 %v3981_v29, %v3980_v63  ;;  %6320 = vmatprep.mubr.msk.bf16.mxu1 %vm4036_vm0, %v4014_v6 }
 0x228   : > { %6304 = vmatprep.mubr.msk.bf16.mxu0 %vm4036_vm0, %v4006_v22 }
 0x229   : > { %v3998_v28 = vld [vmem:[#allocation2 + $0xf0] sm:$0xff]  ;;  %v3999_v30 = vld [vmem:[#allocation2 + $0xf8] sm:$0xff] }
 0x22a   : > { %v4015_v48 = vpack.c.bf16 %v3999_v30, %v3998_v28 }
 0x22b   : > { %v3982_v52 = vld [vmem:[#allocation2 + $0x70] sm:$0xff]  ;;  %v3983_v26 = vld [vmem:[#allocation2 + $0x78] sm:$0xff] }
 0x22c   : > { %v4007_v11 = vpack.c.bf16 %v3983_v26, %v3982_v52  ;;  %6321 = vmatmul.mubr.msk.bf16.gmra.mrb[12].mxu1 %vm4036_vm0, %v4015_v48 }
 0x22e   : > { %6305 = vmatmul.mubr.msk.bf16.gmra.mrb[12].mxu0 %vm4036_vm0, %v4007_v11 }
 0x278   : > { %v6294_v56 = vpop.f32.mrb[0].mxu0 }
 0x279   : > { %v4316_v42 = vcombine.high %v6294_v56, %v6294_v56  ;;  %v4323_v46 = vrot.slane %v6294_v56, %v8812_v37  ;;  %v6310_v55 = vpop.f32.mrb[0].mxu1  ;;  %v4123_v23 = vpop.f32.mrb[1].mxu0 }
 0x27a   : > { %v4588_v27 = vcombine.high %v6310_v55, %v6310_v55  ;;  %v4595_v20 = vrot.slane %v6310_v55, %v8812_v37  ;;  %v4282_v57 = vcombine.high %v4123_v23, %v4123_v23  ;;  %v4289_v15 = vrot.slane %v4123_v23, %v8812_v37  ;;  %v4187_v0 = vpop.f32.mrb[1].mxu1  ;;  %v8817_v21 = vpop.f32.mrb[2].mxu0 }
 0x27b   : > { %v4330_v60 = vrot.slane %v4316_v42, %v8812_v37  ;;  %v4331_v35 = vcombine.high %v4323_v46, %v4323_v46  ;;  %v4955_v40 = vsel %vm4085_vm15, %v4323_v46, -inf  ;;  %v4554_v34 = vcombine.high %v4187_v0, %v4187_v0  ;;  %v8821_v41 = vpop.f32.mrb[2].mxu1  ;;  %v8823_v19 = vpop.f32.mrb[3].mxu0 }
 0x27c   : > { %v4602_v54 = vrot.slane %v4588_v27, %v8812_v37  ;;  %v4603_v53 = vcombine.high %v4595_v20, %v4595_v20  ;;  %v5243_v12 = vsel %vm4085_vm15, %v4595_v20, -inf  ;;  %v4296_v59 = vrot.slane %v4282_v57, %v8812_v37  ;;  %v8828_v13 = vpop.f32.mrb[3].mxu1 }
 0x27d   : > { %v4332_v24 = vcombine.high %v4330_v60, %v4330_v60  ;;  %v4964_v47 = vsel %vm4085_vm15, %v4331_v35, -inf  ;;  %v4973_v4 = vsel %vm4085_vm15, %v4330_v60, -inf  ;;  %v4297_v45 = vcombine.high %v4289_v15, %v4289_v15 }
 0x27e   : > { %v4604_v14 = vcombine.high %v4602_v54, %v4602_v54  ;;  %v5252_v49 = vsel %vm4085_vm15, %v4603_v53, -inf  ;;  %v5261_v51 = vsel %vm4085_vm15, %v4602_v54, -inf  ;;  %v4298_v38 = vcombine.high %v4296_v59, %v4296_v59 }
 0x27f   : > { %v4982_v62 = vsel %vm4085_vm15, %v4332_v24, -inf  ;;  %v4954_v17 = vsel %vm4085_vm15, %v4289_v15, -inf  ;;  %v4963_v50 = vsel %vm4085_vm15, %v4297_v45, -inf  ;;  %v4972_v7 = vsel %vm4085_vm15, %v4296_v59, -inf }
 0x280   : > { %v5270_v25 = vsel %vm4085_vm15, %v4604_v14, -inf  ;;  %v4956_v8 = vmax.f32 %v4954_v17, %v4955_v40  ;;  %v4965_v31 = vmax.f32 %v4963_v50, %v4964_v47  ;;  %v4974_v9 = vmax.f32 %v4972_v7, %v4973_v4 }
 0x281   : > { %v4981_v10 = vsel %vm4085_vm15, %v4298_v38, -inf  ;;  %v4561_v16 = vrot.slane %v4187_v0, %v8812_v37  ;;  %v4568_v43 = vrot.slane %v4554_v34, %v8812_v37  ;;  %v4333_v33 = vcombine.high %v8817_v21, %v8817_v21 }
 0x282   : > { %v4957_v3 = vrot.slane %v4956_v8, 4  ;;  %v4966_v44 = vrot.slane %v4965_v31, 4  ;;  %v4975_v61 = vrot.slane %v4974_v9, 4  ;;  %v4983_v36 = vmax.f32 %v4981_v10, %v4982_v62 }
 0x283   : > { %v4569_v1 = vcombine.high %v4561_v16, %v4561_v16  ;;  %v4570_v5 = vcombine.high %v4568_v43, %v4568_v43  ;;  %v5242_v6 = vsel %vm4085_vm15, %v4561_v16, -inf  ;;  %v5260_v63 = vsel %vm4085_vm15, %v4568_v43, -inf }
 0x284   : > { %v4958_v29 = vmax.f32 %v4956_v8, %v4957_v3  ;;  %v4967_v22 = vmax.f32 %v4965_v31, %v4966_v44  ;;  %v4976_v28 = vmax.f32 %v4974_v9, %v4975_v61  ;;  %v4984_v30 = vrot.slane %v4983_v36, 4 }
 0x285   : > { %v5244_v48 = vmax.f32 %v5242_v6, %v5243_v12  ;;  %v5251_v52 = vsel %vm4085_vm15, %v4569_v1, -inf  ;;  %v5262_v26 = vmax.f32 %v5260_v63, %v5261_v51  ;;  %v5269_v11 = vsel %vm4085_vm15, %v4570_v5, -inf }
 0x286   : > { %v4959_v39 = vrot.slane %v4958_v29, 2  ;;  %v4968_v2 = vrot.slane %v4967_v22, 2  ;;  %v4977_v58 = vrot.slane %v4976_v28, 2  ;;  %v4985_v32 = vmax.f32 %v4983_v36, %v4984_v30 }
 0x287   : > { %v5245_v18 = vrot.slane %v5244_v48, 4  ;;  %v5253_v56 = vmax.f32 %v5251_v52, %v5252_v49  ;;  %v5263_v42 = vrot.slane %v5262_v26, 4  ;;  %v5271_v46 = vmax.f32 %v5269_v11, %v5270_v25 }
 0x288   : > { %v4960_v55 = vmax.f32 %v4958_v29, %v4959_v39  ;;  %v4969_v23 = vmax.f32 %v4967_v22, %v4968_v2  ;;  %v4978_v27 = vmax.f32 %v4976_v28, %v4977_v58  ;;  %v4986_v20 = vrot.slane %v4985_v32, 2 }
 0x289   : > { %v5246_v57 = vmax.f32 %v5244_v48, %v5245_v18  ;;  %v5254_v15 = vrot.slane %v5253_v56, 4  ;;  %v5264_v0 = vmax.f32 %v5262_v26, %v5263_v42  ;;  %v5272_v60 = vrot.slane %v5271_v46, 4 }
 0x28a   : > { %v4961_v35 = vrot.slane %v4960_v55, 1  ;;  %v4970_v40 = vrot.slane %v4969_v23, 1  ;;  %v4979_v34 = vrot.slane %v4978_v27, 1  ;;  %v4987_v54 = vmax.f32 %v4985_v32, %v4986_v20 }
 0x28b   : > { %v5247_v53 = vrot.slane %v5246_v57, 2  ;;  %v5255_v12 = vmax.f32 %v5253_v56, %v5254_v15  ;;  %v5265_v59 = vrot.slane %v5264_v0, 2  ;;  %v5273_v24 = vmax.f32 %v5271_v46, %v5272_v60 }
 0x28c   : > { %v4962_v47 = vmax.f32 %v4960_v55, %v4961_v35  ;;  %v4971_v4 = vmax.f32 %v4969_v23, %v4970_v40  ;;  %v4980_v45 = vmax.f32 %v4978_v27, %v4979_v34  ;;  %v4988_v14 = vrot.slane %v4987_v54, 1 }
 0x28d   : > { %v5248_v49 = vmax.f32 %v5246_v57, %v5247_v53  ;;  %v5256_v51 = vrot.slane %v5255_v12, 2  ;;  %v5266_v38 = vmax.f32 %v5264_v0, %v5265_v59  ;;  %v5274_v62 = vrot.slane %v5273_v24, 2 }
 0x28e   : > { %v4989_v17 = vmax.f32 %v4987_v54, %v4988_v14  ;;  %v5530_v50 = vmax.f32 %v4962_v47, 0.0  ;;  %v5531_v7 = vmax.f32 %v4971_v4, 0.0  ;;  %v5532_v25 = vmax.f32 %v4980_v45, 0.0 }
 0x28f   : > { %v5249_v8 = vrot.slane %v5248_v49, 1  ;;  %v5257_v31 = vmax.f32 %v5255_v12, %v5256_v51  ;;  %v5267_v9 = vrot.slane %v5266_v38, 1  ;;  %v5275_v10 = vmax.f32 %v5273_v24, %v5274_v62 }
 0x290   : > { %v5533_v43 = vmax.f32 %v4989_v17, 0.0  ;;  %v5659_v3 = vsel %vm5658_vm1, %v5531_v7, %v5530_v50  ;;  %v4340_v44 = vrot.slane %v8817_v21, %v8812_v37  ;;  %v4347_v61 = vrot.slane %v4333_v33, %v8812_v37 }
 0x291   : > { %v5661_v5 = vsel %vm5660_vm2, %v5532_v25, %v5659_v3  ;;  %v5250_v6 = vmax.f32 %v5248_v49, %v5249_v8  ;;  %v5258_v63 = vrot.slane %v5257_v31, 1  ;;  %v5268_v29 = vmax.f32 %v5266_v38, %v5267_v9 }
 0x292   : > { %v5276_v30 = vrot.slane %v5275_v10, 1  ;;  %v4348_v48 = vcombine.high %v4340_v44, %v4340_v44  ;;  %v4349_v52 = vcombine.high %v4347_v61, %v4347_v61  ;;  %v4991_v26 = vsel %vm4085_vm15, %v4340_v44, -inf }
 0x293   : > { %v8857_v36 = vpop.f32.mrb[4].mxu1  ;;  %v5259_v11 = vmax.f32 %v5257_v31, %v5258_v63  ;;  %v5562_v39 = vmax.f32 %v5250_v6, 0.0  ;;  %v5564_v2 = vmax.f32 %v5268_v29, 0.0  ;;  %v5009_v58 = vsel %vm4085_vm15, %v4347_v61, -inf }
 0x294   : > { %v8848_v16 = vpop.f32.mrb[4].mxu0  ;;  %v8862_v22 = vpop.f32.mrb[5].mxu1  ;;  %v5277_v18 = vmax.f32 %v5275_v10, %v5276_v30  ;;  %v5000_v56 = vsel %vm4085_vm15, %v4348_v48, -inf  ;;  %v5018_v42 = vsel %vm4085_vm15, %v4349_v52, -inf  ;;  %v4605_v46 = vcombine.high %v8821_v41, %v8821_v41 }
 0x295   : > { %v8859_v1 = vpop.f32.mrb[5].mxu0  ;;  %v8867_v21 = vpop.f32.mrb[6].mxu1  ;;  %v5563_v55 = vmax.f32 %v5259_v11, 0.0  ;;  %v4612_v23 = vrot.slane %v8821_v41, %v8812_v37  ;;  %v4299_v27 = vcombine.high %v8823_v19, %v8823_v19  ;;  %v4306_v20 = vrot.slane %v8823_v19, %v8812_v37 }
 0x296   : > { %v8864_v28 = vpop.f32.mrb[6].mxu0  ;;  %v8872_v32 = vpop.f32.mrb[7].mxu1  ;;  %v5565_v57 = vmax.f32 %v5277_v18, 0.0  ;;  %v4619_v15 = vrot.slane %v4605_v46, %v8812_v37  ;;  %v8886_v0 = vsel %vm5662_vm3, %v5533_v43, %v5661_v5  ;;  %v4571_v60 = vcombine.high %v8828_v13, %v8828_v13 }
 0x297   : > { %v8869_v33 = vpop.f32.mrb[7].mxu0  ;;  %v5693_v35 = vsel %vm5658_vm1, %v5563_v55, %v5562_v39  ;;  %v4620_v40 = vcombine.high %v4612_v23, %v4612_v23  ;;  %v5279_v41 = vsel %vm4085_vm15, %v4612_v23, -inf  ;;  %v4313_v34 = vrot.slane %v4299_v27, %v8812_v37 }
 0x298   : > { %v5694_v54 = vsel %vm5660_vm2, %v5564_v2, %v5693_v35  ;;  %v4621_v53 = vcombine.high %v4619_v15, %v4619_v15  ;;  %v5297_v19 = vsel %vm4085_vm15, %v4619_v15, -inf  ;;  %v4314_v12 = vcombine.high %v4306_v20, %v4306_v20 }
 0x299   : > { %v5288_v59 = vsel %vm4085_vm15, %v4620_v40, -inf  ;;  %v4315_v24 = vcombine.high %v4313_v34, %v4313_v34  ;;  %v4990_v47 = vsel %vm4085_vm15, %v4306_v20, -inf  ;;  %v5008_v4 = vsel %vm4085_vm15, %v4313_v34, -inf }
 0x29a   : > { %v5306_v45 = vsel %vm4085_vm15, %v4621_v53, -inf  ;;  %v4992_v14 = vmax.f32 %v4990_v47, %v4991_v26  ;;  %v4999_v49 = vsel %vm4085_vm15, %v4314_v12, -inf  ;;  %v5010_v51 = vmax.f32 %v5008_v4, %v5009_v58 }
 0x29b   : > { %v5001_v38 = vmax.f32 %v4999_v49, %v5000_v56  ;;  %v5017_v62 = vsel %vm4085_vm15, %v4315_v24, -inf  ;;  %v4578_v17 = vrot.slane %v8828_v13, %v8812_v37  ;;  %v4585_v50 = vrot.slane %v4571_v60, %v8812_v37 }
 0x29c   : > { %v4993_v7 = vrot.slane %v4992_v14, 4  ;;  %v5011_v25 = vrot.slane %v5010_v51, 4  ;;  %v5019_v8 = vmax.f32 %v5017_v62, %v5018_v42  ;;  %v8905_v31 = vsel %vm5662_vm3, %v5565_v57, %v5694_v54 }
 0x29d   : > { %v5002_v9 = vrot.slane %v5001_v38, 4  ;;  %v4586_v10 = vcombine.high %v4578_v17, %v4578_v17  ;;  %v4587_v43 = vcombine.high %v4585_v50, %v4585_v50  ;;  %v5278_v3 = vsel %vm4085_vm15, %v4578_v17, -inf }
 0x29e   : > { %v4994_v44 = vmax.f32 %v4992_v14, %v4993_v7  ;;  %v5012_v61 = vmax.f32 %v5010_v51, %v5011_v25  ;;  %v5020_v5 = vrot.slane %v5019_v8, 4  ;;  %v5280_v6 = vmax.f32 %v5278_v3, %v5279_v41 }
 0x29f   : > { %v5003_v63 = vmax.f32 %v5001_v38, %v5002_v9  ;;  %v5287_v13 = vsel %vm4085_vm15, %v4586_v10, -inf  ;;  %v5296_v29 = vsel %vm4085_vm15, %v4585_v50, -inf  ;;  %v5305_v30 = vsel %vm4085_vm15, %v4587_v43, -inf }
 0x2a0   : > { %v4995_v48 = vrot.slane %v4994_v44, 2  ;;  %v5013_v52 = vrot.slane %v5012_v61, 2  ;;  %v5021_v26 = vmax.f32 %v5019_v8, %v5020_v5  ;;  %v5281_v11 = vrot.slane %v5280_v6, 4 }
 0x2a1   : > { %v5004_v39 = vrot.slane %v5003_v63, 2  ;;  %v5289_v2 = vmax.f32 %v5287_v13, %v5288_v59  ;;  %v5298_v58 = vmax.f32 %v5296_v29, %v5297_v19  ;;  %v5307_v18 = vmax.f32 %v5305_v30, %v5306_v45 }
 0x2a2   : > { %v4996_v56 = vmax.f32 %v4994_v44, %v4995_v48  ;;  %v5014_v42 = vmax.f32 %v5012_v61, %v5013_v52  ;;  %v5022_v46 = vrot.slane %v5021_v26, 2  ;;  %v5282_v55 = vmax.f32 %v5280_v6, %v5281_v11 }
 0x2a3   : > { %v5005_v23 = vmax.f32 %v5003_v63, %v5004_v39  ;;  %v5290_v27 = vrot.slane %v5289_v2, 4  ;;  %v5299_v20 = vrot.slane %v5298_v58, 4  ;;  %v5308_v57 = vrot.slane %v5307_v18, 4 }
 0x2a4   : > { %v4997_v15 = vrot.slane %v4996_v56, 1  ;;  %v5015_v60 = vrot.slane %v5014_v42, 1  ;;  %v5023_v35 = vmax.f32 %v5021_v26, %v5022_v46  ;;  %v5283_v40 = vrot.slane %v5282_v55, 2 }
 0x2a5   : > { %v5006_v41 = vrot.slane %v5005_v23, 1  ;;  %v5291_v34 = vmax.f32 %v5289_v2, %v5290_v27  ;;  %v5300_v54 = vmax.f32 %v5298_v58, %v5299_v20  ;;  %v5309_v53 = vmax.f32 %v5307_v18, %v5308_v57 }
 0x2a6   : > { %v4998_v19 = vmax.f32 %v4996_v56, %v4997_v15  ;;  %v5016_v12 = vmax.f32 %v5014_v42, %v5015_v60  ;;  %v5024_v59 = vrot.slane %v5023_v35, 1  ;;  %v5284_v24 = vmax.f32 %v5282_v55, %v5283_v40 }
 0x2a7   : > { %v5007_v47 = vmax.f32 %v5005_v23, %v5006_v41  ;;  %v5292_v4 = vrot.slane %v5291_v34, 2  ;;  %v5301_v45 = vrot.slane %v5300_v54, 2  ;;  %v5310_v14 = vrot.slane %v5309_v53, 2 }
 0x2a8   : > { %v5025_v49 = vmax.f32 %v5023_v35, %v5024_v59  ;;  %v5534_v51 = vmax.f32 %v4998_v19, 0.0  ;;  %v5536_v38 = vmax.f32 %v5016_v12, 0.0  ;;  %v5285_v62 = vrot.slane %v5284_v24, 1 }
 0x2a9   : > { %v5535_v17 = vmax.f32 %v5007_v47, 0.0  ;;  %v5293_v50 = vmax.f32 %v5291_v34, %v5292_v4  ;;  %v5302_v7 = vmax.f32 %v5300_v54, %v5301_v45  ;;  %v5311_v25 = vmax.f32 %v5309_v53, %v5310_v14 }
 0x2aa   : > { %v5537_v8 = vmax.f32 %v5025_v49, 0.0  ;;  %v5665_v9 = vsel %vm5664_vm4, %v5534_v51, %v8886_v0  ;;  %v5286_v10 = vmax.f32 %v5284_v24, %v5285_v62  ;;  %v4384_v43 = vcombine.high %v8848_v16, %v8848_v16 }
 0x2ab   : > { %v5667_v3 = vsel %vm5666_vm5, %v5535_v17, %v5665_v9  ;;  %v5294_v44 = vrot.slane %v5293_v50, 1  ;;  %v5303_v61 = vrot.slane %v5302_v7, 1  ;;  %v5312_v5 = vrot.slane %v5311_v25, 1 }
 0x2ac   : > { %v5669_v6 = vsel %vm5668_vm6, %v5536_v38, %v5667_v3  ;;  %v5566_v63 = vmax.f32 %v5286_v10, 0.0  ;;  %v4391_v13 = vrot.slane %v8848_v16, %v8812_v37  ;;  %v4398_v29 = vrot.slane %v4384_v43, %v8812_v37 }
 0x2ad   : > { %v5671_v30 = vsel %vm5670_vm7, %v5537_v8, %v5669_v6  ;;  %v5295_v0 = vmax.f32 %v5293_v50, %v5294_v44  ;;  %v5304_v48 = vmax.f32 %v5302_v7, %v5303_v61  ;;  %v5313_v52 = vmax.f32 %v5311_v25, %v5312_v5 }
 0x2ae   : > { %5729 = vst [vmem:[%s8924_s23] sm:$0xff] %v5671_v30  ;;  %v5696_v26 = vsel %vm5664_vm4, %v5566_v63, %v8905_v31  ;;  %v4399_v11 = vcombine.high %v4391_v13, %v4391_v13  ;;  %v4400_v39 = vcombine.high %v4398_v29, %v4398_v29  ;;  %v5027_v2 = vsel %vm4085_vm15, %v4391_v13, -inf }
 0x2af   : > { %v5567_v58 = vmax.f32 %v5295_v0, 0.0  ;;  %v5568_v16 = vmax.f32 %v5304_v48, 0.0  ;;  %v5569_v18 = vmax.f32 %v5313_v52, 0.0  ;;  %v5045_v56 = vsel %vm4085_vm15, %v4398_v29, -inf }
 0x2b0   : > { %v5036_v42 = vsel %vm4085_vm15, %v4399_v11, -inf  ;;  %v5054_v46 = vsel %vm4085_vm15, %v4400_v39, -inf  ;;  %v4656_v55 = vcombine.high %v8857_v36, %v8857_v36  ;;  %v4663_v31 = vrot.slane %v8857_v36, %v8812_v37 }
 0x2b1   : > { %v5697_v23 = vsel %vm5666_vm5, %v5567_v58, %v5696_v26  ;;  %v4350_v27 = vcombine.high %v8859_v1, %v8859_v1  ;;  %v4357_v20 = vrot.slane %v8859_v1, %v8812_v37  ;;  %v4622_v57 = vcombine.high %v8862_v22, %v8862_v22 }
 0x2b2   : > { %v5698_v15 = vsel %vm5668_vm6, %v5568_v16, %v5697_v23  ;;  %v4670_v60 = vrot.slane %v4656_v55, %v8812_v37  ;;  %v4671_v35 = vcombine.high %v4663_v31, %v4663_v31  ;;  %v5315_v40 = vsel %vm4085_vm15, %v4663_v31, -inf }
 0x2b3   : > { %v5699_v36 = vsel %vm5670_vm7, %v5569_v18, %v5698_v15  ;;  %v4364_v41 = vrot.slane %v4350_v27, %v8812_v37  ;;  %v4365_v34 = vcombine.high %v4357_v20, %v4357_v20  ;;  %v5026_v54 = vsel %vm4085_vm15, %v4357_v20, -inf }
 0x2b4   : > { %5733 = vst [vmem:[%s8924_s23 + $0x20] sm:$0xff] %v5699_v36  ;;  %v4672_v53 = vcombine.high %v4670_v60, %v4670_v60  ;;  %v5324_v1 = vsel %vm4085_vm15, %v4671_v35, -inf  ;;  %v5333_v19 = vsel %vm4085_vm15, %v4670_v60, -inf  ;;  %v5028_v12 = vmax.f32 %v5026_v54, %v5027_v2 }
 0x2b5   : > { %v4366_v59 = vcombine.high %v4364_v41, %v4364_v41  ;;  %v5035_v24 = vsel %vm4085_vm15, %v4365_v34, -inf  ;;  %v5044_v47 = vsel %vm4085_vm15, %v4364_v41, -inf  ;;  %v4629_v4 = vrot.slane %v8862_v22, %v8812_v37 }
 0x2b6   : > { %v5342_v45 = vsel %vm4085_vm15, %v4672_v53, -inf  ;;  %v5029_v14 = vrot.slane %v5028_v12, 4  ;;  %v5037_v49 = vmax.f32 %v5035_v24, %v5036_v42  ;;  %v5046_v51 = vmax.f32 %v5044_v47, %v5045_v56 }
 0x2b7   : > { %v8958_v38 = vpop.f32.mrb[8].mxu1  ;;  %v5053_v62 = vsel %vm4085_vm15, %v4366_v59, -inf  ;;  %v4636_v17 = vrot.slane %v4622_v57, %v8812_v37  ;;  %v4637_v50 = vcombine.high %v4629_v4, %v4629_v4  ;;  %v5314_v7 = vsel %vm4085_vm15, %v4629_v4, -inf }
 0x2b8   : > { %v8965_v8 = vpop.f32.mrb[9].mxu1  ;;  %v5030_v9 = vmax.f32 %v5028_v12, %v5029_v14  ;;  %v5038_v22 = vrot.slane %v5037_v49, 4  ;;  %v5047_v10 = vrot.slane %v5046_v51, 4  ;;  %v5055_v43 = vmax.f32 %v5053_v62, %v5054_v46 }
 0x2b9   : > { %v8963_v25 = vpop.f32.mrb[8].mxu0  ;;  %v8969_v44 = vpop.f32.mrb[10].mxu1  ;;  %v4638_v61 = vcombine.high %v4636_v17, %v4636_v17  ;;  %v5316_v5 = vmax.f32 %v5314_v7, %v5315_v40  ;;  %v5323_v6 = vsel %vm4085_vm15, %v4637_v50, -inf  ;;  %v5332_v63 = vsel %vm4085_vm15, %v4636_v17, -inf }
 0x2ba   : > { %v8967_v3 = vpop.f32.mrb[9].mxu0  ;;  %v8975_v29 = vpop.f32.mrb[11].mxu1  ;;  %v5031_v30 = vrot.slane %v5030_v9, 2  ;;  %v5039_v0 = vmax.f32 %v5037_v49, %v5038_v22  ;;  %v5048_v48 = vmax.f32 %v5046_v51, %v5047_v10  ;;  %v5056_v52 = vrot.slane %v5055_v43, 4 }
 0x2bb   : > { %v8973_v13 = vpop.f32.mrb[10].mxu0  ;;  %v5317_v11 = vrot.slane %v5316_v5, 4  ;;  %v5325_v39 = vmax.f32 %v5323_v6, %v5324_v1  ;;  %v5334_v2 = vmax.f32 %v5332_v63, %v5333_v19  ;;  %v5341_v58 = vsel %vm4085_vm15, %v4638_v61, -inf }
 0x2bc   : > { %v8977_v26 = vpop.f32.mrb[11].mxu0  ;;  %v5032_v16 = vmax.f32 %v5030_v9, %v5031_v30  ;;  %v5040_v18 = vrot.slane %v5039_v0, 2  ;;  %v5049_v56 = vrot.slane %v5048_v48, 2  ;;  %v5057_v42 = vmax.f32 %v5055_v43, %v5056_v52 }
 0x2bd   : > { %v5318_v46 = vmax.f32 %v5316_v5, %v5317_v11  ;;  %v5326_v55 = vrot.slane %v5325_v39, 4  ;;  %v5335_v31 = vrot.slane %v5334_v2, 4  ;;  %v5343_v23 = vmax.f32 %v5341_v58, %v5342_v45 }
 0x2be   : > { %v5033_v27 = vrot.slane %v5032_v16, 1  ;;  %v5041_v20 = vmax.f32 %v5039_v0, %v5040_v18  ;;  %v5050_v57 = vmax.f32 %v5048_v48, %v5049_v56  ;;  %v5058_v15 = vrot.slane %v5057_v42, 2 }
 0x2bf   : > { %v5319_v60 = vrot.slane %v5318_v46, 2  ;;  %v5327_v35 = vmax.f32 %v5325_v39, %v5326_v55  ;;  %v5336_v40 = vmax.f32 %v5334_v2, %v5335_v31  ;;  %v5344_v36 = vrot.slane %v5343_v23, 4 }
 0x2c0   : > { %v5034_v41 = vmax.f32 %v5032_v16, %v5033_v27  ;;  %v5042_v34 = vrot.slane %v5041_v20, 1  ;;  %v5051_v54 = vrot.slane %v5050_v57, 1  ;;  %v5059_v53 = vmax.f32 %v5057_v42, %v5058_v15 }
 0x2c1   : > { %v5320_v1 = vmax.f32 %v5318_v46, %v5319_v60  ;;  %v5328_v19 = vrot.slane %v5327_v35, 2  ;;  %v5337_v12 = vrot.slane %v5336_v40, 2  ;;  %v5345_v59 = vmax.f32 %v5343_v23, %v5344_v36 }
 0x2c2   : > { %v5043_v24 = vmax.f32 %v5041_v20, %v5042_v34  ;;  %v5052_v47 = vmax.f32 %v5050_v57, %v5051_v54  ;;  %v5060_v4 = vrot.slane %v5059_v53, 1  ;;  %v5538_v45 = vmax.f32 %v5034_v41, 0.0 }
 0x2c3   : > { %v5321_v14 = vrot.slane %v5320_v1, 1  ;;  %v5329_v49 = vmax.f32 %v5327_v35, %v5328_v19  ;;  %v5338_v51 = vmax.f32 %v5336_v40, %v5337_v12  ;;  %v5346_v62 = vrot.slane %v5345_v59, 2 }
 0x2c4   : > { %v5061_v17 = vmax.f32 %v5059_v53, %v5060_v4  ;;  %v5539_v50 = vmax.f32 %v5043_v24, 0.0  ;;  %v5540_v7 = vmax.f32 %v5052_v47, 0.0  ;;  %v4401_v9 = vcombine.high %v8864_v28, %v8864_v28 }
 0x2c5   : > { %v5322_v22 = vmax.f32 %v5320_v1, %v5321_v14  ;;  %v5330_v10 = vrot.slane %v5329_v49, 1  ;;  %v5339_v43 = vrot.slane %v5338_v51, 1  ;;  %v5347_v61 = vmax.f32 %v5345_v59, %v5346_v62 }
 0x2c6   : > { %v5541_v5 = vmax.f32 %v5061_v17, 0.0  ;;  %v5672_v6 = vsel %vm5658_vm1, %v5539_v50, %v5538_v45  ;;  %v4408_v63 = vrot.slane %v8864_v28, %v8812_v37  ;;  %v4415_v30 = vrot.slane %v4401_v9, %v8812_v37 }
 0x2c7   : > { %v5673_v0 = vsel %vm5660_vm2, %v5540_v7, %v5672_v6  ;;  %v5331_v48 = vmax.f32 %v5329_v49, %v5330_v10  ;;  %v5340_v52 = vmax.f32 %v5338_v51, %v5339_v43  ;;  %v5348_v11 = vrot.slane %v5347_v61, 1 }
 0x2c8   : > { %v5570_v39 = vmax.f32 %v5322_v22, 0.0  ;;  %v4416_v2 = vcombine.high %v4408_v63, %v4408_v63  ;;  %v4417_v58 = vcombine.high %v4415_v30, %v4415_v30  ;;  %v5063_v16 = vsel %vm4085_vm15, %v4408_v63, -inf }
 0x2c9   : > { %v5349_v18 = vmax.f32 %v5347_v61, %v5348_v11  ;;  %v5571_v56 = vmax.f32 %v5331_v48, 0.0  ;;  %v5572_v42 = vmax.f32 %v5340_v52, 0.0  ;;  %v5081_v46 = vsel %vm4085_vm15, %v4415_v30, -inf }
 0x2ca   : > { %v5072_v55 = vsel %vm4085_vm15, %v4416_v2, -inf  ;;  %v5090_v28 = vsel %vm4085_vm15, %v4417_v58, -inf  ;;  %v4673_v31 = vcombine.high %v8867_v21, %v8867_v21  ;;  %v4680_v23 = vrot.slane %v8867_v21, %v8812_v37 }
 0x2cb   : > { %v5573_v27 = vmax.f32 %v5349_v18, 0.0  ;;  %v5700_v20 = vsel %vm5658_vm1, %v5571_v56, %v5570_v39  ;;  %v4367_v57 = vcombine.high %v8869_v33, %v8869_v33  ;;  %v4374_v15 = vrot.slane %v8869_v33, %v8812_v37 }
 0x2cc   : > { %v5701_v60 = vsel %vm5660_vm2, %v5572_v42, %v5700_v20  ;;  %v4687_v35 = vrot.slane %v4673_v31, %v8812_v37  ;;  %v4688_v40 = vcombine.high %v4680_v23, %v4680_v23  ;;  %v5351_v36 = vsel %vm4085_vm15, %v4680_v23, -inf }
 0x2cd   : > { %v4381_v41 = vrot.slane %v4367_v57, %v8812_v37  ;;  %v4382_v34 = vcombine.high %v4374_v15, %v4374_v15  ;;  %v5062_v21 = vsel %vm4085_vm15, %v4374_v15, -inf  ;;  %v9006_v54 = vsel %vm5662_vm3, %v5541_v5, %v5673_v0 }
 0x2ce   : > { %v4689_v53 = vcombine.high %v4687_v35, %v4687_v35  ;;  %v5360_v1 = vsel %vm4085_vm15, %v4688_v40, -inf  ;;  %v5369_v33 = vsel %vm4085_vm15, %v4687_v35, -inf  ;;  %v5064_v19 = vmax.f32 %v5062_v21, %v5063_v16 }
 0x2cf   : > { %v4383_v12 = vcombine.high %v4381_v41, %v4381_v41  ;;  %v5071_v59 = vsel %vm4085_vm15, %v4382_v34, -inf  ;;  %v5080_v24 = vsel %vm4085_vm15, %v4381_v41, -inf  ;;  %v4639_v47 = vcombine.high %v8872_v32, %v8872_v32 }
 0x2d0   : > { %v5378_v4 = vsel %vm4085_vm15, %v4689_v53, -inf  ;;  %v5065_v45 = vrot.slane %v5064_v19, 4  ;;  %v5073_v14 = vmax.f32 %v5071_v59, %v5072_v55  ;;  %v5082_v49 = vmax.f32 %v5080_v24, %v5081_v46 }
 0x2d1   : > { %v5089_v51 = vsel %vm4085_vm15, %v4383_v12, -inf  ;;  %v4646_v62 = vrot.slane %v8872_v32, %v8812_v37  ;;  %v4653_v17 = vrot.slane %v4639_v47, %v8812_v37  ;;  %v9020_v50 = vsel %vm5662_vm3, %v5573_v27, %v5701_v60 }
 0x2d2   : > { %v5066_v7 = vmax.f32 %v5064_v19, %v5065_v45  ;;  %v5074_v9 = vrot.slane %v5073_v14, 4  ;;  %v5083_v22 = vrot.slane %v5082_v49, 4  ;;  %v5091_v10 = vmax.f32 %v5089_v51, %v5090_v28 }
 0x2d3   : > { %v4654_v43 = vcombine.high %v4646_v62, %v4646_v62  ;;  %v4655_v61 = vcombine.high %v4653_v17, %v4653_v17  ;;  %v5350_v5 = vsel %vm4085_vm15, %v4646_v62, -inf  ;;  %v5368_v6 = vsel %vm4085_vm15, %v4653_v17, -inf }
 0x2d4   : > { %v5067_v63 = vrot.slane %v5066_v7, 2  ;;  %v5075_v30 = vmax.f32 %v5073_v14, %v5074_v9  ;;  %v5084_v0 = vmax.f32 %v5082_v49, %v5083_v22  ;;  %v5092_v48 = vrot.slane %v5091_v10, 4 }
 0x2d5   : > { %v5352_v32 = vmax.f32 %v5350_v5, %v5351_v36  ;;  %v5359_v52 = vsel %vm4085_vm15, %v4654_v43, -inf  ;;  %v5370_v11 = vmax.f32 %v5368_v6, %v5369_v33  ;;  %v5377_v39 = vsel %vm4085_vm15, %v4655_v61, -inf }
 0x2d6   : > { %v5068_v2 = vmax.f32 %v5066_v7, %v5067_v63  ;;  %v5076_v58 = vrot.slane %v5075_v30, 2  ;;  %v5085_v16 = vrot.slane %v5084_v0, 2  ;;  %v5093_v18 = vmax.f32 %v5091_v10, %v5092_v48 }
 0x2d7   : > { %v5353_v56 = vrot.slane %v5352_v32, 4  ;;  %v5361_v42 = vmax.f32 %v5359_v52, %v5360_v1  ;;  %v5371_v46 = vrot.slane %v5370_v11, 4  ;;  %v5379_v55 = vmax.f32 %v5377_v39, %v5378_v4 }
 0x2d8   : > { %v5069_v28 = vrot.slane %v5068_v2, 1  ;;  %v5077_v31 = vmax.f32 %v5075_v30, %v5076_v58  ;;  %v5086_v23 = vmax.f32 %v5084_v0, %v5085_v16  ;;  %v5094_v27 = vrot.slane %v5093_v18, 2 }
 0x2d9   : > { %v5354_v20 = vmax.f32 %v5352_v32, %v5353_v56  ;;  %v5362_v57 = vrot.slane %v5361_v42, 4  ;;  %v5372_v15 = vmax.f32 %v5370_v11, %v5371_v46  ;;  %v5380_v60 = vrot.slane %v5379_v55, 4 }
 0x2da   : > { %v5070_v35 = vmax.f32 %v5068_v2, %v5069_v28  ;;  %v5078_v40 = vrot.slane %v5077_v31, 1  ;;  %v5087_v36 = vrot.slane %v5086_v23, 1  ;;  %v5095_v41 = vmax.f32 %v5093_v18, %v5094_v27 }
 0x2db   : > { %v5355_v34 = vrot.slane %v5354_v20, 2  ;;  %v5363_v21 = vmax.f32 %v5361_v42, %v5362_v57  ;;  %v5373_v53 = vrot.slane %v5372_v15, 2  ;;  %v5381_v33 = vmax.f32 %v5379_v55, %v5380_v60 }
 0x2dc   : > { %v5079_v19 = vmax.f32 %v5077_v31, %v5078_v40  ;;  %v5088_v1 = vmax.f32 %v5086_v23, %v5087_v36  ;;  %v5096_v12 = vrot.slane %v5095_v41, 1  ;;  %v5542_v59 = vmax.f32 %v5070_v35, 0.0 }
 0x2dd   : > { %v5356_v24 = vmax.f32 %v5354_v20, %v5355_v34  ;;  %v5364_v47 = vrot.slane %v5363_v21, 2  ;;  %v5374_v4 = vmax.f32 %v5372_v15, %v5373_v53  ;;  %v5382_v45 = vrot.slane %v5381_v33, 2 }
 0x2de   : > { %v5097_v14 = vmax.f32 %v5095_v41, %v5096_v12  ;;  %v5543_v49 = vmax.f32 %v5079_v19, 0.0  ;;  %v5544_v51 = vmax.f32 %v5088_v1, 0.0  ;;  %v5675_v62 = vsel %vm5664_vm4, %v5542_v59, %v9006_v54 }
 0x2df   : > { %v5357_v17 = vrot.slane %v5356_v24, 1  ;;  %v5365_v7 = vmax.f32 %v5363_v21, %v5364_v47  ;;  %v5375_v9 = vrot.slane %v5374_v4, 1  ;;  %v5383_v22 = vmax.f32 %v5381_v33, %v5382_v45 }
 0x2e0   : > { %v5545_v10 = vmax.f32 %v5097_v14, 0.0  ;;  %v5676_v43 = vsel %vm5666_vm5, %v5543_v49, %v5675_v62  ;;  %v4452_v61 = vcombine.high %v8963_v25, %v8963_v25  ;;  %v4459_v5 = vrot.slane %v8963_v25, %v8812_v37 }
 0x2e1   : > { %v5677_v6 = vsel %vm5668_vm6, %v5544_v51, %v5676_v43  ;;  %v5358_v63 = vmax.f32 %v5356_v24, %v5357_v17  ;;  %v5366_v30 = vrot.slane %v5365_v7, 1  ;;  %v5376_v0 = vmax.f32 %v5374_v4, %v5375_v9 }
 0x2e2   : > { %v5678_v54 = vsel %vm5670_vm7, %v5545_v10, %v5677_v6  ;;  %v5384_v48 = vrot.slane %v5383_v22, 1  ;;  %v4466_v32 = vrot.slane %v4452_v61, %v8812_v37  ;;  %v4467_v52 = vcombine.high %v4459_v5, %v4459_v5 }
 0x2e3   : > { %5730 = vst [vmem:[%s8924_s23 + $0x8] sm:$0xff] %v5678_v54  ;;  %v5367_v11 = vmax.f32 %v5365_v7, %v5366_v30  ;;  %v5574_v39 = vmax.f32 %v5358_v63, 0.0  ;;  %v5576_v2 = vmax.f32 %v5376_v0, 0.0  ;;  %v5099_v58 = vsel %vm4085_vm15, %v4459_v5, -inf }
 0x2e4   : > { %v5385_v16 = vmax.f32 %v5383_v22, %v5384_v48  ;;  %v4468_v18 = vcombine.high %v4466_v32, %v4466_v32  ;;  %v5108_v25 = vsel %vm4085_vm15, %v4467_v52, -inf  ;;  %v5117_v56 = vsel %vm4085_vm15, %v4466_v32, -inf }
 0x2e5   : > { %v5575_v42 = vmax.f32 %v5367_v11, 0.0  ;;  %v5703_v46 = vsel %vm5664_vm4, %v5574_v39, %v9020_v50  ;;  %v4724_v55 = vcombine.high %v8958_v38, %v8958_v38  ;;  %v4731_v28 = vrot.slane %v8958_v38, %v8812_v37 }
 0x2e6   : > { %v5577_v31 = vmax.f32 %v5385_v16, 0.0  ;;  %v5126_v23 = vsel %vm4085_vm15, %v4468_v18, -inf  ;;  %v4418_v27 = vcombine.high %v8967_v3, %v8967_v3  ;;  %v4425_v20 = vrot.slane %v8967_v3, %v8812_v37 }
 0x2e7   : > { %v5704_v57 = vsel %vm5666_vm5, %v5575_v42, %v5703_v46  ;;  %v4738_v50 = vrot.slane %v4724_v55, %v8812_v37  ;;  %v4739_v15 = vcombine.high %v4731_v28, %v4731_v28  ;;  %v5387_v60 = vsel %vm4085_vm15, %v4731_v28, -inf }
 0x2e8   : > { %v5705_v35 = vsel %vm5668_vm6, %v5576_v2, %v5704_v57  ;;  %v4432_v38 = vrot.slane %v4418_v27, %v8812_v37  ;;  %v4433_v40 = vcombine.high %v4425_v20, %v4425_v20  ;;  %v5098_v36 = vsel %vm4085_vm15, %v4425_v20, -inf }
 0x2e9   : > { %v5706_v41 = vsel %vm5670_vm7, %v5577_v31, %v5705_v35  ;;  %v4740_v34 = vcombine.high %v4738_v50, %v4738_v50  ;;  %v5396_v21 = vsel %vm4085_vm15, %v4739_v15, -inf  ;;  %v5405_v3 = vsel %vm4085_vm15, %v4738_v50, -inf }
 0x2ea   : > { %5734 = vst [vmem:[%s8924_s23 + $0x28] sm:$0xff] %v5706_v41  ;;  %v4434_v53 = vcombine.high %v4432_v38, %v4432_v38  ;;  %v5100_v33 = vmax.f32 %v5098_v36, %v5099_v58  ;;  %v5107_v19 = vsel %vm4085_vm15, %v4433_v40, -inf  ;;  %v5116_v1 = vsel %vm4085_vm15, %v4432_v38, -inf }
 0x2eb   : > { %v5414_v12 = vsel %vm4085_vm15, %v4740_v34, -inf  ;;  %v5109_v59 = vmax.f32 %v5107_v19, %v5108_v25  ;;  %v5118_v24 = vmax.f32 %v5116_v1, %v5117_v56  ;;  %v4690_v47 = vcombine.high %v8965_v8, %v8965_v8 }
 0x2ec   : > { %v5101_v4 = vrot.slane %v5100_v33, 4  ;;  %v5125_v45 = vsel %vm4085_vm15, %v4434_v53, -inf  ;;  %v4697_v14 = vrot.slane %v8965_v8, %v8812_v37  ;;  %v4469_v49 = vcombine.high %v8973_v13, %v8973_v13 }
 0x2ed   : > { %v5110_v51 = vrot.slane %v5109_v59, 4  ;;  %v5119_v62 = vrot.slane %v5118_v24, 4  ;;  %v5127_v17 = vmax.f32 %v5125_v45, %v5126_v23  ;;  %v4704_v7 = vrot.slane %v4690_v47, %v8812_v37 }
 0x2ee   : > { %v5102_v9 = vmax.f32 %v5100_v33, %v5101_v4  ;;  %v4705_v22 = vcombine.high %v4697_v14, %v4697_v14  ;;  %v5386_v10 = vsel %vm4085_vm15, %v4697_v14, -inf  ;;  %v4476_v43 = vrot.slane %v8973_v13, %v8812_v37 }
 0x2ef   : > { %v5111_v61 = vmax.f32 %v5109_v59, %v5110_v51  ;;  %v5120_v5 = vmax.f32 %v5118_v24, %v5119_v62  ;;  %v5128_v6 = vrot.slane %v5127_v17, 4  ;;  %v4706_v63 = vcombine.high %v4704_v7, %v4704_v7 }
 0x2f0   : > { %v5103_v8 = vrot.slane %v5102_v9, 2  ;;  %v5388_v30 = vmax.f32 %v5386_v10, %v5387_v60  ;;  %v5395_v0 = vsel %vm4085_vm15, %v4705_v22, -inf  ;;  %v5404_v54 = vsel %vm4085_vm15, %v4704_v7, -inf }
 0x2f1   : > { %v5112_v48 = vrot.slane %v5111_v61, 2  ;;  %v5121_v32 = vrot.slane %v5120_v5, 2  ;;  %v5129_v52 = vmax.f32 %v5127_v17, %v5128_v6  ;;  %v5397_v11 = vmax.f32 %v5395_v0, %v5396_v21 }
 0x2f2   : > { %v5104_v39 = vmax.f32 %v5102_v9, %v5103_v8  ;;  %v5389_v2 = vrot.slane %v5388_v30, 4  ;;  %v5406_v58 = vmax.f32 %v5404_v54, %v5405_v3  ;;  %v5413_v16 = vsel %vm4085_vm15, %v4706_v63, -inf }
 0x2f3   : > { %v5113_v13 = vmax.f32 %v5111_v61, %v5112_v48  ;;  %v5122_v18 = vmax.f32 %v5120_v5, %v5121_v32  ;;  %v5130_v25 = vrot.slane %v5129_v52, 2  ;;  %v5398_v56 = vrot.slane %v5397_v11, 4 }
 0x2f4   : > { %v5105_v42 = vrot.slane %v5104_v39, 1  ;;  %v5390_v46 = vmax.f32 %v5388_v30, %v5389_v2  ;;  %v5407_v55 = vrot.slane %v5406_v58, 4  ;;  %v5415_v28 = vmax.f32 %v5413_v16, %v5414_v12 }
 0x2f5   : > { %v5114_v31 = vrot.slane %v5113_v13, 1  ;;  %v5123_v23 = vrot.slane %v5122_v18, 1  ;;  %v5131_v27 = vmax.f32 %v5129_v52, %v5130_v25  ;;  %v5399_v20 = vmax.f32 %v5397_v11, %v5398_v56 }
 0x2f6   : > { %v5106_v57 = vmax.f32 %v5104_v39, %v5105_v42  ;;  %v5391_v50 = vrot.slane %v5390_v46, 2  ;;  %v5408_v15 = vmax.f32 %v5406_v58, %v5407_v55  ;;  %v5416_v60 = vrot.slane %v5415_v28, 4 }
 0x2f7   : > { %v5115_v35 = vmax.f32 %v5113_v13, %v5114_v31  ;;  %v5124_v38 = vmax.f32 %v5122_v18, %v5123_v23  ;;  %v5132_v40 = vrot.slane %v5131_v27, 1  ;;  %v5400_v36 = vrot.slane %v5399_v20, 2 }
 0x2f8   : > { %v5546_v41 = vmax.f32 %v5106_v57, 0.0  ;;  %v5392_v34 = vmax.f32 %v5390_v46, %v5391_v50  ;;  %v5409_v21 = vrot.slane %v5408_v15, 2  ;;  %v5417_v3 = vmax.f32 %v5415_v28, %v5416_v60 }
 0x2f9   : > { %v5133_v53 = vmax.f32 %v5131_v27, %v5132_v40  ;;  %v5547_v33 = vmax.f32 %v5115_v35, 0.0  ;;  %v5548_v19 = vmax.f32 %v5124_v38, 0.0  ;;  %v5401_v1 = vmax.f32 %v5399_v20, %v5400_v36 }
 0x2fa   : > { %v5393_v12 = vrot.slane %v5392_v34, 1  ;;  %v5410_v59 = vmax.f32 %v5408_v15, %v5409_v21  ;;  %v5418_v24 = vrot.slane %v5417_v3, 2  ;;  %v4483_v47 = vrot.slane %v4469_v49, %v8812_v37 }
 0x2fb   : > { %v5549_v4 = vmax.f32 %v5133_v53, 0.0  ;;  %v5679_v45 = vsel %vm5658_vm1, %v5547_v33, %v5546_v41  ;;  %v5402_v14 = vrot.slane %v5401_v1, 1  ;;  %v4484_v51 = vcombine.high %v4476_v43, %v4476_v43 }
 0x2fc   : > { %v5680_v62 = vsel %vm5660_vm2, %v5548_v19, %v5679_v45  ;;  %v5394_v17 = vmax.f32 %v5392_v34, %v5393_v12  ;;  %v5411_v7 = vrot.slane %v5410_v59, 1  ;;  %v5419_v9 = vmax.f32 %v5417_v3, %v5418_v24 }
 0x2fd   : > { %v5403_v22 = vmax.f32 %v5401_v1, %v5402_v14  ;;  %v4485_v10 = vcombine.high %v4483_v47, %v4483_v47  ;;  %v5135_v61 = vsel %vm4085_vm15, %v4476_v43, -inf  ;;  %v5144_v5 = vsel %vm4085_vm15, %v4484_v51, -inf }
 0x2fe   : > { %v5412_v6 = vmax.f32 %v5410_v59, %v5411_v7  ;;  %v5420_v63 = vrot.slane %v5419_v9, 1  ;;  %v5578_v8 = vmax.f32 %v5394_v17, 0.0  ;;  %v5153_v49 = vsel %vm4085_vm15, %v4483_v47, -inf }
 0x2ff   : > { %v5579_v30 = vmax.f32 %v5403_v22, 0.0  ;;  %v5162_v0 = vsel %vm4085_vm15, %v4485_v10, -inf  ;;  %v4741_v54 = vcombine.high %v8969_v44, %v8969_v44  ;;  %v4748_v48 = vrot.slane %v8969_v44, %v8812_v37  ;;  %v9089_v32 = vpop.f32.mrb[12].mxu1 }
 0x300   : > { %v5421_v52 = vmax.f32 %v5419_v9, %v5420_v63  ;;  %v5580_v43 = vmax.f32 %v5412_v6, 0.0  ;;  %v4435_v11 = vcombine.high %v8977_v26, %v8977_v26  ;;  %v4442_v39 = vrot.slane %v8977_v26, %v8812_v37  ;;  %v9095_v2 = vpop.f32.mrb[13].mxu1 }
 0x301   : > { %v5707_v58 = vsel %vm5658_vm1, %v5579_v30, %v5578_v8  ;;  %v4755_v16 = vrot.slane %v4741_v54, %v8812_v37  ;;  %v4756_v13 = vcombine.high %v4748_v48, %v4748_v48  ;;  %v5423_v18 = vsel %vm4085_vm15, %v4748_v48, -inf  ;;  %v9100_v44 = vpop.f32.mrb[12].mxu0  ;;  %v9102_v25 = vpop.f32.mrb[14].mxu1 }
 0x302   : > { %v5581_v56 = vmax.f32 %v5421_v52, 0.0  ;;  %v5708_v42 = vsel %vm5660_vm2, %v5580_v43, %v5707_v58  ;;  %v4449_v46 = vrot.slane %v4435_v11, %v8812_v37  ;;  %v4450_v55 = vcombine.high %v4442_v39, %v4442_v39  ;;  %v9106_v26 = vpop.f32.mrb[13].mxu0  ;;  %v9108_v28 = vpop.f32.mrb[15].mxu1 }
 0x303   : > { %v4757_v31 = vcombine.high %v4755_v16, %v4755_v16  ;;  %v5432_v23 = vsel %vm4085_vm15, %v4756_v13, -inf  ;;  %v5441_v27 = vsel %vm4085_vm15, %v4755_v16, -inf  ;;  %v5134_v20 = vsel %vm4085_vm15, %v4442_v39, -inf  ;;  %v9113_v57 = vpop.f32.mrb[14].mxu0 }
 0x304   : > { %v4451_v50 = vcombine.high %v4449_v46, %v4449_v46  ;;  %v5136_v15 = vmax.f32 %v5134_v20, %v5135_v61  ;;  %v5143_v60 = vsel %vm4085_vm15, %v4450_v55, -inf  ;;  %v5152_v35 = vsel %vm4085_vm15, %v4449_v46, -inf  ;;  %v9117_v38 = vpop.f32.mrb[15].mxu0 }
 0x305   : > { %v5450_v40 = vsel %vm4085_vm15, %v4757_v31, -inf  ;;  %v5145_v36 = vmax.f32 %v5143_v60, %v5144_v5  ;;  %v5154_v41 = vmax.f32 %v5152_v35, %v5153_v49  ;;  %v5681_v34 = vsel %vm5662_vm3, %v5549_v4, %v5680_v62 }
 0x306   : > { %v5137_v21 = vrot.slane %v5136_v15, 4  ;;  %v5161_v3 = vsel %vm4085_vm15, %v4451_v50, -inf  ;;  %v4707_v53 = vcombine.high %v8975_v29, %v8975_v29  ;;  %v4714_v33 = vrot.slane %v8975_v29, %v8812_v37 }
 0x307   : > { %v5146_v19 = vrot.slane %v5145_v36, 4  ;;  %v5155_v1 = vrot.slane %v5154_v41, 4  ;;  %v5163_v12 = vmax.f32 %v5161_v3, %v5162_v0  ;;  %v9127_v59 = vsel %vm5662_vm3, %v5581_v56, %v5708_v42 }
 0x308   : > { %v5138_v24 = vmax.f32 %v5136_v15, %v5137_v21  ;;  %v4721_v47 = vrot.slane %v4707_v53, %v8812_v37  ;;  %v4722_v45 = vcombine.high %v4714_v33, %v4714_v33  ;;  %v5422_v4 = vsel %vm4085_vm15, %v4714_v33, -inf }
 0x309   : > { %v5147_v14 = vmax.f32 %v5145_v36, %v5146_v19  ;;  %v5156_v51 = vmax.f32 %v5154_v41, %v5155_v1  ;;  %v5164_v62 = vrot.slane %v5163_v12, 4  ;;  %v5424_v17 = vmax.f32 %v5422_v4, %v5423_v18 }
 0x30a   : > { %v5139_v7 = vrot.slane %v5138_v24, 2  ;;  %v4723_v9 = vcombine.high %v4721_v47, %v4721_v47  ;;  %v5431_v29 = vsel %vm4085_vm15, %v4722_v45, -inf  ;;  %v5440_v22 = vsel %vm4085_vm15, %v4721_v47, -inf }
 0x30b   : > { %v5148_v10 = vrot.slane %v5147_v14, 2  ;;  %v5157_v61 = vrot.slane %v5156_v51, 2  ;;  %v5165_v5 = vmax.f32 %v5163_v12, %v5164_v62  ;;  %v5425_v6 = vrot.slane %v5424_v17, 4 }
 0x30c   : > { %v5140_v63 = vmax.f32 %v5138_v24, %v5139_v7  ;;  %v5433_v8 = vmax.f32 %v5431_v29, %v5432_v23  ;;  %v5442_v49 = vmax.f32 %v5440_v22, %v5441_v27  ;;  %v5449_v30 = vsel %vm4085_vm15, %v4723_v9, -inf }
 0x30d   : > { %v5149_v0 = vmax.f32 %v5147_v14, %v5148_v10  ;;  %v5158_v54 = vmax.f32 %v5156_v51, %v5157_v61  ;;  %v5166_v48 = vrot.slane %v5165_v5, 2  ;;  %v5426_v52 = vmax.f32 %v5424_v17, %v5425_v6 }
 0x30e   : > { %v5141_v43 = vrot.slane %v5140_v63, 1  ;;  %v5434_v11 = vrot.slane %v5433_v8, 4  ;;  %v5443_v39 = vrot.slane %v5442_v49, 4  ;;  %v5451_v58 = vmax.f32 %v5449_v30, %v5450_v40 }
 0x30f   : > { %v5150_v16 = vrot.slane %v5149_v0, 1  ;;  %v5159_v13 = vrot.slane %v5158_v54, 1  ;;  %v5167_v18 = vmax.f32 %v5165_v5, %v5166_v48  ;;  %v5427_v56 = vrot.slane %v5426_v52, 2 }
 0x310   : > { %v5142_v42 = vmax.f32 %v5140_v63, %v5141_v43  ;;  %v5435_v46 = vmax.f32 %v5433_v8, %v5434_v11  ;;  %v5444_v55 = vmax.f32 %v5442_v49, %v5443_v39  ;;  %v5452_v31 = vrot.slane %v5451_v58, 4 }
 0x311   : > { %v5151_v23 = vmax.f32 %v5149_v0, %v5150_v16  ;;  %v5160_v27 = vmax.f32 %v5158_v54, %v5159_v13  ;;  %v5168_v20 = vrot.slane %v5167_v18, 1  ;;  %v5428_v50 = vmax.f32 %v5426_v52, %v5427_v56 }
 0x312   : > { %v5550_v15 = vmax.f32 %v5142_v42, 0.0  ;;  %v5436_v60 = vrot.slane %v5435_v46, 2  ;;  %v5445_v35 = vrot.slane %v5444_v55, 2  ;;  %v5453_v36 = vmax.f32 %v5451_v58, %v5452_v31 }
 0x313   : > { %v5169_v41 = vmax.f32 %v5167_v18, %v5168_v20  ;;  %v5551_v21 = vmax.f32 %v5151_v23, 0.0  ;;  %v5552_v3 = vmax.f32 %v5160_v27, 0.0  ;;  %v5429_v40 = vrot.slane %v5428_v50, 1 }
 0x314   : > { %v5682_v53 = vsel %vm5664_vm4, %v5550_v15, %v5681_v34  ;;  %v5437_v33 = vmax.f32 %v5435_v46, %v5436_v60  ;;  %v5446_v19 = vmax.f32 %v5444_v55, %v5445_v35  ;;  %v5454_v1 = vrot.slane %v5453_v36, 2 }
 0x315   : > { %v5553_v12 = vmax.f32 %v5169_v41, 0.0  ;;  %v5683_v24 = vsel %vm5666_vm5, %v5551_v21, %v5682_v53  ;;  %v5430_v47 = vmax.f32 %v5428_v50, %v5429_v40  ;;  %v4520_v45 = vcombine.high %v9100_v44, %v9100_v44 }
 0x316   : > { %v5684_v4 = vsel %vm5668_vm6, %v5552_v3, %v5683_v24  ;;  %v5438_v14 = vrot.slane %v5437_v33, 1  ;;  %v5447_v51 = vrot.slane %v5446_v19, 1  ;;  %v5455_v62 = vmax.f32 %v5453_v36, %v5454_v1 }
 0x317   : > { %v5685_v17 = vsel %vm5670_vm7, %v5553_v12, %v5684_v4  ;;  %v5582_v7 = vmax.f32 %v5430_v47, 0.0  ;;  %v4527_v34 = vrot.slane %v9100_v44, %v8812_v37  ;;  %v4534_v9 = vrot.slane %v4520_v45, %v8812_v37 }
 0x318   : > { %5731 = vst [vmem:[%s8924_s23 + $0x10] sm:$0xff] %v5685_v17  ;;  %v5439_v29 = vmax.f32 %v5437_v33, %v5438_v14  ;;  %v5448_v22 = vmax.f32 %v5446_v19, %v5447_v51  ;;  %v5456_v10 = vrot.slane %v5455_v62, 1  ;;  %v4792_v61 = vcombine.high %v9089_v32, %v9089_v32 }
 0x319   : > { %v5710_v5 = vsel %vm5664_vm4, %v5582_v7, %v9127_v59  ;;  %v4535_v6 = vcombine.high %v4527_v34, %v4527_v34  ;;  %v4536_v63 = vcombine.high %v4534_v9, %v4534_v9  ;;  %v5171_v8 = vsel %vm4085_vm15, %v4527_v34, -inf }
 0x31a   : > { %v5457_v49 = vmax.f32 %v5455_v62, %v5456_v10  ;;  %v5583_v30 = vmax.f32 %v5439_v29, 0.0  ;;  %v5584_v0 = vmax.f32 %v5448_v22, 0.0  ;;  %v5189_v44 = vsel %vm4085_vm15, %v4534_v9, -inf }
 0x31b   : > { %v5180_v54 = vsel %vm4085_vm15, %v4535_v6, -inf  ;;  %v5198_v48 = vsel %vm4085_vm15, %v4536_v63, -inf  ;;  %v4799_v52 = vrot.slane %v9089_v32, %v8812_v37  ;;  %v4806_v43 = vrot.slane %v4792_v61, %v8812_v37 }
 0x31c   : > { %v5585_v59 = vmax.f32 %v5457_v49, 0.0  ;;  %v5711_v11 = vsel %vm5666_vm5, %v5583_v30, %v5710_v5  ;;  %v4486_v39 = vcombine.high %v9106_v26, %v9106_v26  ;;  %v4493_v58 = vrot.slane %v9106_v26, %v8812_v37 }
 0x31d   : > { %v5712_v16 = vsel %vm5668_vm6, %v5584_v0, %v5711_v11  ;;  %v4807_v13 = vcombine.high %v4799_v52, %v4799_v52  ;;  %v4808_v18 = vcombine.high %v4806_v43, %v4806_v43  ;;  %v5459_v56 = vsel %vm4085_vm15, %v4799_v52, -inf }
 0x31e   : > { %v5713_v42 = vsel %vm5670_vm7, %v5585_v59, %v5712_v16  ;;  %v5477_v32 = vsel %vm4085_vm15, %v4806_v43, -inf  ;;  %v4500_v46 = vrot.slane %v4486_v39, %v8812_v37  ;;  %v4501_v55 = vcombine.high %v4493_v58, %v4493_v58 }
 0x31f   : > { %5735 = vst [vmem:[%s8924_s23 + $0x30] sm:$0xff] %v5713_v42  ;;  %v5468_v31 = vsel %vm4085_vm15, %v4807_v13, -inf  ;;  %v5486_v23 = vsel %vm4085_vm15, %v4808_v18, -inf  ;;  %v5170_v26 = vsel %vm4085_vm15, %v4493_v58, -inf  ;;  %v4758_v27 = vcombine.high %v9095_v2, %v9095_v2 }
 0x320   : > { %v4502_v20 = vcombine.high %v4500_v46, %v4500_v46  ;;  %v5172_v50 = vmax.f32 %v5170_v26, %v5171_v8  ;;  %v5179_v15 = vsel %vm4085_vm15, %v4501_v55, -inf  ;;  %v5188_v60 = vsel %vm4085_vm15, %v4500_v46, -inf }
 0x321   : > { %v5181_v35 = vmax.f32 %v5179_v15, %v5180_v54  ;;  %v5190_v36 = vmax.f32 %v5188_v60, %v5189_v44  ;;  %v4765_v41 = vrot.slane %v9095_v2, %v8812_v37  ;;  %v4772_v21 = vrot.slane %v4758_v27, %v8812_v37 }
 0x322   : > { %v5173_v3 = vrot.slane %v5172_v50, 4  ;;  %v5197_v40 = vsel %vm4085_vm15, %v4502_v20, -inf  ;;  %v4537_v53 = vcombine.high %v9113_v57, %v9113_v57  ;;  %v9181_v33 = vrot.slane %v9113_v57, %v8812_v37 }
 0x323   : > { %v5182_v19 = vrot.slane %v5181_v35, 4  ;;  %v5191_v1 = vrot.slane %v5190_v36, 4  ;;  %v5199_v12 = vmax.f32 %v5197_v40, %v5198_v48  ;;  %v4773_v24 = vcombine.high %v4765_v41, %v4765_v41 }
 0x324   : > { %v5174_v47 = vmax.f32 %v5172_v50, %v5173_v3  ;;  %v4774_v45 = vcombine.high %v4772_v21, %v4772_v21  ;;  %v5458_v2 = vsel %vm4085_vm15, %v4765_v41, -inf  ;;  %v5476_v4 = vsel %vm4085_vm15, %v4772_v21, -inf }
 0x325   : > { %v5183_v14 = vmax.f32 %v5181_v35, %v5182_v19  ;;  %v5192_v51 = vmax.f32 %v5190_v36, %v5191_v1  ;;  %v5200_v62 = vrot.slane %v5199_v12, 4  ;;  %v5460_v17 = vmax.f32 %v5458_v2, %v5459_v56 }
 0x326   : > { %v5175_v7 = vrot.slane %v5174_v47, 2  ;;  %v5467_v34 = vsel %vm4085_vm15, %v4773_v24, -inf  ;;  %v5478_v9 = vmax.f32 %v5476_v4, %v5477_v32  ;;  %v5485_v57 = vsel %vm4085_vm15, %v4774_v45, -inf }
 0x327   : > { %v5184_v29 = vrot.slane %v5183_v14, 2  ;;  %v5193_v22 = vrot.slane %v5192_v51, 2  ;;  %v5201_v10 = vmax.f32 %v5199_v12, %v5200_v62  ;;  %v5461_v61 = vrot.slane %v5460_v17, 4 }
 0x328   : > { %v5176_v5 = vmax.f32 %v5174_v47, %v5175_v7  ;;  %v5469_v6 = vmax.f32 %v5467_v34, %v5468_v31  ;;  %v5479_v63 = vrot.slane %v5478_v9, 4  ;;  %v5487_v8 = vmax.f32 %v5485_v57, %v5486_v23 }
 0x329   : > { %v5185_v49 = vmax.f32 %v5183_v14, %v5184_v29  ;;  %v5194_v30 = vmax.f32 %v5192_v51, %v5193_v22  ;;  %v5202_v0 = vrot.slane %v5201_v10, 2  ;;  %v5462_v44 = vmax.f32 %v5460_v17, %v5461_v61 }
 0x32a   : > { %v5177_v54 = vrot.slane %v5176_v5, 1  ;;  %v5470_v48 = vrot.slane %v5469_v6, 4  ;;  %v5480_v52 = vmax.f32 %v5478_v9, %v5479_v63  ;;  %v5488_v43 = vrot.slane %v5487_v8, 4 }
 0x32b   : > { %v5186_v59 = vrot.slane %v5185_v49, 1  ;;  %v5195_v11 = vrot.slane %v5194_v30, 1  ;;  %v5203_v39 = vmax.f32 %v5201_v10, %v5202_v0  ;;  %v5463_v58 = vrot.slane %v5462_v44, 2 }
 0x32c   : > { %v5178_v16 = vmax.f32 %v5176_v5, %v5177_v54  ;;  %v5471_v13 = vmax.f32 %v5469_v6, %v5470_v48  ;;  %v5481_v18 = vrot.slane %v5480_v52, 2  ;;  %v5489_v56 = vmax.f32 %v5487_v8, %v5488_v43 }
 0x32d   : > { %v5187_v42 = vmax.f32 %v5185_v49, %v5186_v59  ;;  %v5196_v32 = vmax.f32 %v5194_v30, %v5195_v11  ;;  %v5204_v46 = vrot.slane %v5203_v39, 1  ;;  %v5464_v55 = vmax.f32 %v5462_v44, %v5463_v58 }
 0x32e   : > { %v5554_v31 = vmax.f32 %v5178_v16, 0.0  ;;  %v5472_v23 = vrot.slane %v5471_v13, 2  ;;  %v5482_v26 = vmax.f32 %v5480_v52, %v5481_v18  ;;  %v5490_v27 = vrot.slane %v5489_v56, 2 }
 0x32f   : > { %v5205_v20 = vmax.f32 %v5203_v39, %v5204_v46  ;;  %v5555_v50 = vmax.f32 %v5187_v42, 0.0  ;;  %v5556_v15 = vmax.f32 %v5196_v32, 0.0  ;;  %v5465_v60 = vrot.slane %v5464_v55, 1 }
 0x330   : > { %v5473_v35 = vmax.f32 %v5471_v13, %v5472_v23  ;;  %v5483_v36 = vrot.slane %v5482_v26, 1  ;;  %v5491_v41 = vmax.f32 %v5489_v56, %v5490_v27  ;;  %v4551_v21 = vrot.slane %v4537_v53, %v8812_v37 }
 0x331   : > { %v5557_v3 = vmax.f32 %v5205_v20, 0.0  ;;  %v5686_v40 = vsel %vm5658_vm1, %v5555_v50, %v5554_v31  ;;  %v5466_v19 = vmax.f32 %v5464_v55, %v5465_v60  ;;  %v4552_v1 = vcombine.high %v9181_v33, %v9181_v33 }
 0x332   : > { %v5687_v12 = vsel %vm5660_vm2, %v5556_v15, %v5686_v40  ;;  %v5474_v24 = vrot.slane %v5473_v35, 1  ;;  %v5484_v47 = vmax.f32 %v5482_v26, %v5483_v36  ;;  %v5492_v45 = vrot.slane %v5491_v41, 1 }
 0x333   : > { %v5586_v2 = vmax.f32 %v5466_v19, 0.0  ;;  %v4553_v4 = vcombine.high %v4551_v21, %v4551_v21  ;;  %v5207_v14 = vsel %vm4085_vm15, %v9181_v33, -inf  ;;  %v5216_v51 = vsel %vm4085_vm15, %v4552_v1, -inf }
 0x334   : > { %v5475_v53 = vmax.f32 %v5473_v35, %v5474_v24  ;;  %v5493_v62 = vmax.f32 %v5491_v41, %v5492_v45  ;;  %v5588_v17 = vmax.f32 %v5484_v47, 0.0  ;;  %v5225_v7 = vsel %vm4085_vm15, %v4551_v21, -inf }
 0x335   : > { %v5234_v34 = vsel %vm4085_vm15, %v4553_v4, -inf  ;;  %v4809_v9 = vcombine.high %v9102_v25, %v9102_v25  ;;  %v4816_v57 = vrot.slane %v9102_v25, %v8812_v37  ;;  %v4503_v29 = vcombine.high %v9117_v38, %v9117_v38 }
 0x336   : > { %v5587_v22 = vmax.f32 %v5475_v53, 0.0  ;;  %v5589_v33 = vmax.f32 %v5493_v62, 0.0  ;;  %v4510_v10 = vrot.slane %v9117_v38, %v8812_v37  ;;  %v9206_v61 = vsel %vm5662_vm3, %v5557_v3, %v5687_v12 }
 0x337   : > { %v4823_v5 = vrot.slane %v4809_v9, %v8812_v37  ;;  %v4824_v6 = vcombine.high %v4816_v57, %v4816_v57  ;;  %v5495_v63 = vsel %vm4085_vm15, %v4816_v57, -inf  ;;  %v4517_v8 = vrot.slane %v4503_v29, %v8812_v37 }
 0x338   : > { %v5714_v25 = vsel %vm5658_vm1, %v5587_v22, %v5586_v2  ;;  %v4518_v49 = vcombine.high %v4510_v10, %v4510_v10  ;;  %v5206_v30 = vsel %vm4085_vm15, %v4510_v10, -inf  ;;  %v4775_v0 = vcombine.high %v9108_v28, %v9108_v28 }
 0x339   : > { %v5715_v38 = vsel %vm5660_vm2, %v5588_v17, %v5714_v25  ;;  %v4825_v44 = vcombine.high %v4823_v5, %v4823_v5  ;;  %v5504_v54 = vsel %vm4085_vm15, %v4824_v6, -inf  ;;  %v5513_v48 = vsel %vm4085_vm15, %v4823_v5, -inf }
 0x33a   : > { %v4519_v52 = vcombine.high %v4517_v8, %v4517_v8  ;;  %v5208_v43 = vmax.f32 %v5206_v30, %v5207_v14  ;;  %v5215_v59 = vsel %vm4085_vm15, %v4518_v49, -inf  ;;  %v5224_v11 = vsel %vm4085_vm15, %v4517_v8, -inf }
 0x33b   : > { %v5522_v39 = vsel %vm4085_vm15, %v4825_v44, -inf  ;;  %v5217_v58 = vmax.f32 %v5215_v59, %v5216_v51  ;;  %v5226_v16 = vmax.f32 %v5224_v11, %v5225_v7  ;;  %v4782_v13 = vrot.slane %v9108_v28, %v8812_v37 }
 0x33c   : > { %v5209_v18 = vrot.slane %v5208_v43, 4  ;;  %v5233_v56 = vsel %vm4085_vm15, %v4519_v52, -inf  ;;  %v4789_v42 = vrot.slane %v4775_v0, %v8812_v37  ;;  %v9226_v32 = vsel %vm5662_vm3, %v5589_v33, %v5715_v38 }
 0x33d   : > { %v5218_v46 = vrot.slane %v5217_v58, 4  ;;  %v5227_v55 = vrot.slane %v5226_v16, 4  ;;  %v5235_v31 = vmax.f32 %v5233_v56, %v5234_v34  ;;  %v4790_v23 = vcombine.high %v4782_v13, %v4782_v13 }
 0x33e   : > { %v5210_v26 = vmax.f32 %v5208_v43, %v5209_v18  ;;  %v4791_v27 = vcombine.high %v4789_v42, %v4789_v42  ;;  %v5494_v20 = vsel %vm4085_vm15, %v4782_v13, -inf  ;;  %v5512_v50 = vsel %vm4085_vm15, %v4789_v42, -inf }
 0x33f   : > { %v5219_v15 = vmax.f32 %v5217_v58, %v5218_v46  ;;  %v5228_v28 = vmax.f32 %v5226_v16, %v5227_v55  ;;  %v5236_v60 = vrot.slane %v5235_v31, 4  ;;  %v5496_v35 = vmax.f32 %v5494_v20, %v5495_v63 }
 0x340   : > { %v5211_v36 = vrot.slane %v5210_v26, 2  ;;  %v5503_v37 = vsel %vm4085_vm15, %v4790_v23, -inf  ;;  %v5514_v41 = vmax.f32 %v5512_v50, %v5513_v48  ;;  %v5521_v21 = vsel %vm4085_vm15, %v4791_v27, -inf }
 0x341   : > { %v5220_v3 = vrot.slane %v5219_v15, 2  ;;  %v5229_v40 = vrot.slane %v5228_v28, 2  ;;  %v5237_v19 = vmax.f32 %v5235_v31, %v5236_v60  ;;  %v5497_v1 = vrot.slane %v5496_v35, 4 }
 0x342   : > { %v5212_v12 = vmax.f32 %v5210_v26, %v5211_v36  ;;  %v5505_v24 = vmax.f32 %v5503_v37, %v5504_v54  ;;  %v5515_v47 = vrot.slane %v5514_v41, 4  ;;  %v5523_v45 = vmax.f32 %v5521_v21, %v5522_v39 }
 0x343   : > { %v5221_v2 = vmax.f32 %v5219_v15, %v5220_v3  ;;  %v5230_v4 = vmax.f32 %v5228_v28, %v5229_v40  ;;  %v5238_v14 = vrot.slane %v5237_v19, 2  ;;  %v5498_v51 = vmax.f32 %v5496_v35, %v5497_v1 }
 0x344   : > { %v5213_v53 = vrot.slane %v5212_v12, 1  ;;  %v5506_v62 = vrot.slane %v5505_v24, 4  ;;  %v5516_v17 = vmax.f32 %v5514_v41, %v5515_v47  ;;  %v5524_v7 = vrot.slane %v5523_v45, 4 }
 0x345   : > { %v5222_v34 = vrot.slane %v5221_v2, 1  ;;  %v5231_v9 = vrot.slane %v5230_v4, 1  ;;  %v5239_v57 = vmax.f32 %v5237_v19, %v5238_v14  ;;  %v5499_v29 = vrot.slane %v5498_v51, 2 }
 0x346   : > { %v5214_v22 = vmax.f32 %v5212_v12, %v5213_v53  ;;  %v5507_v33 = vmax.f32 %v5505_v24, %v5506_v62  ;;  %v5517_v10 = vrot.slane %v5516_v17, 2  ;;  %v5525_v5 = vmax.f32 %v5523_v45, %v5524_v7 }
 0x347   : > { %v5223_v6 = vmax.f32 %v5221_v2, %v5222_v34  ;;  %v5232_v63 = vmax.f32 %v5230_v4, %v5231_v9  ;;  %v5240_v8 = vrot.slane %v5239_v57, 1  ;;  %v5500_v25 = vmax.f32 %v5498_v51, %v5499_v29 }
 0x348   : > { %v5558_v49 = vmax.f32 %v5214_v22, 0.0  ;;  %v5508_v30 = vrot.slane %v5507_v33, 2  ;;  %v5518_v0 = vmax.f32 %v5516_v17, %v5517_v10  ;;  %v5526_v38 = vrot.slane %v5525_v5, 2 }
 0x349   : > { %v5241_v44 = vmax.f32 %v5239_v57, %v5240_v8  ;;  %v5559_v54 = vmax.f32 %v5223_v6, 0.0  ;;  %v5560_v48 = vmax.f32 %v5232_v63, 0.0  ;;  %v5501_v52 = vrot.slane %v5500_v25, 1 }
 0x34a   : > { %v5689_v43 = vsel %vm5664_vm4, %v5558_v49, %v9206_v61  ;;  %v5509_v59 = vmax.f32 %v5507_v33, %v5508_v30  ;;  %v5519_v11 = vrot.slane %v5518_v0, 1  ;;  %v5527_v39 = vmax.f32 %v5525_v5, %v5526_v38 }
 0x34b   : > { %v5561_v58 = vmax.f32 %v5241_v44, 0.0  ;;  %v5690_v16 = vsel %vm5666_vm5, %v5559_v54, %v5689_v43  ;;  %v5502_v13 = vmax.f32 %v5500_v25, %v5501_v52 }
 0x34c   : > { %v5691_v18 = vsel %vm5668_vm6, %v5560_v48, %v5690_v16  ;;  %v5510_v56 = vrot.slane %v5509_v59, 1  ;;  %v5528_v42 = vrot.slane %v5527_v39, 1  ;;  %v5520_v55 = vmax.f32 %v5518_v0, %v5519_v11 }
 0x34d   : > { %v5692_v46 = vsel %vm5670_vm7, %v5561_v58, %v5691_v18  ;;  %v5590_v31 = vmax.f32 %v5502_v13, 0.0 }
 0x34e   : > { %5732 = vst [vmem:[%s8924_s23 + $0x18] sm:$0xff] %v5692_v46  ;;  %v5511_v61 = vmax.f32 %v5509_v59, %v5510_v56  ;;  %v5529_v23 = vmax.f32 %v5527_v39, %v5528_v42  ;;  %v5592_v20 = vmax.f32 %v5520_v55, 0.0 }
 0x34f   : > { %v5717_v26 = vsel %vm5664_vm4, %v5590_v31, %v9226_v32 }
 0x350   : > { %v5591_v27 = vmax.f32 %v5511_v61, 0.0  ;;  %v5593_v50 = vmax.f32 %v5529_v23, 0.0 }
 0x352   : > { %v5718_v15 = vsel %vm5666_vm5, %v5591_v27, %v5717_v26 }
 0x353   : > { %v5719_v28 = vsel %vm5668_vm6, %v5592_v20, %v5718_v15 }
 0x354   : > { %v5720_v32 = vsel %vm5670_vm7, %v5593_v50, %v5719_v28 }
 0x355   : > { %5736 = vst [vmem:[%s8924_s23 + $0x38] sm:$0xff] %v5720_v32 }
 0x356   : > { %7038 = shalt.err (!%p7035_p3)
}
 0x357   : > { %s7039_s6 = scalar_lea.hbm %s9246_s29, 1024  ;;  %s7043_s14 = scalar_lea.hbm %s9299_s2, 2048 }
 0x358   : > { %p7040_p4 = scmp.ne.s32.totalorder %s9246_s29, %s7039_s6  ;;  %p7044_p9 = scmp.lt.u32.totalorder %s9246_s29, %s9299_s2 }
 0x359   : > { %p7045_p10 = scmp.lt.u32.totalorder %s7043_s14, %s7039_s6  ;;  %p7047_p12 = scmp.lt.u32.totalorder %s7039_s6, %s9246_s29 }
 0x35a   : > { %p7041_p7 = pnand %p7040_p4, %p7153_p5 }
 0x35b   : > { %p7046_p11 = por %p7045_p10, %p7044_p9 }
 0x35c   : > { %p7042_p8 = pneg %p7041_p7 }
 0x35d   : > { %p7048_p13 = por %p7047_p12, %p7046_p11 }
 0x35f   : > { %p7049_p0 = pnand %p7048_p13, %p7042_p8 }
 0x361   : > { %7052 = shalt.err (!%p7049_p0)
}
 0x362   : > { %s7099_s21 = smov 128  }
 0x363   : > { %6333 = dma.vmem_to_hbm [thread:$0]  (%p7153_p5), %s9249_s25, 1024, %s9246_s29, %s9255_s13, %s7099_s21, %s7099_s21, %s7090_s27  }
 0x364 PF: > { %p6339_p1 = scmp.ge.s32.totalorder %s7087_s12, 2  ;;  %s5766_s22 = sand.u32 1, %s7075_s9  }
 0x365   : > { %s5767_s23 = scalar_lea.sflag [#allocation4], %s5766_s22 }
 0x366   : > { %p6336_p2 = pnand %p6339_p1, %p7157_p6 }
 0x368   : > { %7070 = dma.done.wait (!%p6336_p2), %s5767_s23, 1024  }
 0x369   : > { %7072 = vsyncadd (!%p6336_p2), %s5767_s23, 4294966272  ;;  %p12_p3 = scmp.ge.s32.totalorder %s7140_s15, 4   ;;  %s9306_s9 = smov %s7079_s10 }
 0x36a   : > { %s9307_s10 = smov %s7083_s11  ;;  %s9308_s11 = smov %s7151_s18 }
 0x36b   : > { %s9309_s12 = smov %s7140_s15  ;;  %14 = sbr.rel (!%p12_p3) target bundleno = 3 (0x3), region = 65 }
 0x372   :  { %5772 = vsyncpa [#allocation4], 1 }
 0x373   :  { %5774 = vsyncpa [#allocation4 + $0x1], 1 }

</bundles_post_ra>
